<compile_context>
chip_gen: v6e
topology: v6e:2x2x1
jax: 0.10.0
libtpu: 0.0.40
codegen_flags: <defaults>
</compile_context>

<pallas_src>
import functools

import jax
import jax.numpy as jnp
from jax import lax
from jax.experimental import pallas as pl
from jax.experimental.pallas import tpu as pltpu

_TIME_CHUNK = 32                     # max timesteps per grid step (sublane aligned)
_UNROLL = 8                          # bounded unroll of the in-kernel step loop
_LANE = 128
_SUBLANE = 8
_BATCH_BLOCK = 8                     # batch rows per recurrence grid step
_FULL_K_MAX = 2048                   # use full-K (scratch-free) matmul up to this K


def _round_up(x, m):
    return (x + m - 1) // m * m


def _pick_tile(dim, candidates):
    # With the 8/128 padding below a candidate always divides `dim`; the fallback
    # (full dim) would only trigger if the padding rules changed.
    for c in candidates:
        if dim % c == 0:
            return c
    return dim


def _vmem_limit_bytes():
    """Generation-aware scoped-VMEM cap (~60% of physical VMEM).

    v5e/v6e: 128 MiB physical -> ~76 MiB; v7x: 64 MiB per TC -> ~38 MiB.
    Falls back to the conservative (everywhere-safe) 32 MiB if the query fails.
    """
    try:
        cap = int(pltpu.get_tpu_info().vmem_capacity_bytes)
        return max(32 * 1024 * 1024, min(int(cap * 0.6), 100 * 1024 * 1024))
    except Exception:  # pragma: no cover - hardware-query fallback
        return 32 * 1024 * 1024


# ----------------------------------------------------------------------------
# Generic tiled  A @ W + b  (used for the hoisted input projection AND the
# output projection).  N (vocab / 4H) axis is OUTERMOST so the big W operand is
# streamed from HBM exactly once; both axes are "parallel" (v7x megacore).
# ----------------------------------------------------------------------------
def _matmul_bias_fullk_kernel(a_ref, w_ref, b_ref, o_ref):
    o_ref[...] = (jnp.dot(a_ref[...], w_ref[...],
                          preferred_element_type=jnp.float32)
                  + b_ref[...]).astype(o_ref.dtype)


def _matmul_bias_ksplit_kernel(a_ref, w_ref, b_ref, o_ref, acc_ref):
    kk = pl.program_id(2)

    @pl.when(kk == 0)
    def _init():
        acc_ref[...] = jnp.zeros_like(acc_ref)

    acc_ref[...] += jnp.dot(a_ref[...], w_ref[...],
                            preferred_element_type=jnp.float32)

    @pl.when(kk == pl.num_programs(2) - 1)
    def _fin():
        o_ref[...] = (acc_ref[...] + b_ref[...]).astype(o_ref.dtype)


def _matmul_bias(a, w, b, out_dtype=jnp.float32):
    """a: (M, K), w: (K, N), b: (1, N) -> (M, N) in out_dtype (f32 accumulation)."""
    m, k = a.shape
    n = w.shape[1]
    # 256-aligned tiles preferred (v6e/v7x MXU is 2x256x256); tiles capped at 512
    # so the working set stays well inside even the 32 MiB fallback VMEM budget.
    tm = _pick_tile(m, (512, 256, 128, 64, 32, 16, 8))
    tn = _pick_tile(n, (512, 256, 128))
    vmem_limit = _vmem_limit_bytes()

    if k <= _FULL_K_MAX:
        # Full-K: no accumulator scratch, no init/finalize, both axes parallel.
        grid_spec = pltpu.PrefetchScalarGridSpec(
            num_scalar_prefetch=0,
            grid=(n // tn, m // tm),                       # N outermost, M innermost
            in_specs=[
                pl.BlockSpec((tm, k), lambda j, i: (i, 0)),
                pl.BlockSpec((k, tn), lambda j, i: (0, j)),
                pl.BlockSpec((1, tn), lambda j, i: (0, j)),
            ],
            out_specs=pl.BlockSpec((tm, tn), lambda j, i: (i, j)),
        )
        return pl.pallas_call(
            _matmul_bias_fullk_kernel,
            out_shape=jax.ShapeDtypeStruct((m, n), out_dtype),
            grid_spec=grid_spec,
            compiler_params=pltpu.CompilerParams(
                dimension_semantics=("parallel", "parallel"),
                vmem_limit_bytes=vmem_limit),
        )(a, w, b)

    # Very large K: fall back to a K-split accumulator (K innermost, "arbitrary").
    tk = _pick_tile(k, (512, 256, 128))
    grid_spec = pltpu.PrefetchScalarGridSpec(
        num_scalar_prefetch=0,
        grid=(n // tn, m // tm, k // tk),
        in_specs=[
            pl.BlockSpec((tm, tk), lambda j, i, kk: (i, kk)),
            pl.BlockSpec((tk, tn), lambda j, i, kk: (kk, j)),
            pl.BlockSpec((1, tn), lambda j, i, kk: (0, j)),
        ],
        out_specs=pl.BlockSpec((tm, tn), lambda j, i, kk: (i, j)),
        scratch_shapes=[pltpu.VMEM((tm, tn), jnp.float32)],
    )
    return pl.pallas_call(
        _matmul_bias_ksplit_kernel,
        out_shape=jax.ShapeDtypeStruct((m, n), out_dtype),
        grid_spec=grid_spec,
        compiler_params=pltpu.CompilerParams(
            dimension_semantics=("parallel", "parallel", "arbitrary"),
            vmem_limit_bytes=vmem_limit),
    )(a, w, b)


# ----------------------------------------------------------------------------
# LSTM recurrence over a (batch-block, time-chunk) grid.
# gates_pre already contains X @ W_ih^T + (b_ih + b_hh); the serial loop only
# adds h @ W_hh^T.  Gate order follows PyTorch nn.LSTM: [i, f, g, o].
# ----------------------------------------------------------------------------
def _lstm_chunk_kernel(g_ref, w_hh_ref, h_seq_ref, h_scr, c_scr):
    # Reset the h/c carry at the start of each batch block's time loop.
    @pl.when(pl.program_id(1) == 0)
    def _init():
        h_scr[...] = jnp.zeros_like(h_scr)
        c_scr[...] = jnp.zeros_like(c_scr)

    hp = h_scr.shape[1]
    tc = g_ref.shape[1]

    # Hoist the loop-invariant weight load out of the step loop.
    w_hh = w_hh_ref[...]                       # (Hp, 4Hp) compute dtype (f32/bf16)
    cdt = w_hh.dtype

    def step(s, carry):
        h, c = carry                                        # f32 (TB, Hp)
        gates = g_ref[:, s, :] + jnp.dot(h.astype(cdt), w_hh,
                                         preferred_element_type=jnp.float32)
        i_g = jax.nn.sigmoid(gates[:, 0 * hp:1 * hp])
        f_g = jax.nn.sigmoid(gates[:, 1 * hp:2 * hp])
        g_g = jnp.tanh(gates[:, 2 * hp:3 * hp])
        o_g = jax.nn.sigmoid(gates[:, 3 * hp:4 * hp])
        c_new = f_g * c + i_g * g_g
        h_new = o_g * jnp.tanh(c_new)
        h_seq_ref[:, s, :] = h_new.astype(h_seq_ref.dtype)  # bf16 store
        return h_new, c_new

    h_fin, c_fin = lax.fori_loop(0, tc, step, (h_scr[...], c_scr[...]),
                                 unroll=_UNROLL)
    h_scr[...] = h_fin            # carry state to the next time chunk
    c_scr[...] = c_fin


def _lstm_recurrence(gates_pre, w_hh_t, *, time_chunk, out_dtype=jnp.bfloat16):
    """gates_pre: (Bp, Tp, 4Hp) f32 -> h sequence (Bp, Tp, Hp) in out_dtype."""
    bp, tp, _ = gates_pre.shape
    hp = w_hh_t.shape[0]
    tc = time_chunk
    tb = min(bp, _BATCH_BLOCK)      # bp is a multiple of 8, so tb always divides bp

    grid_spec = pltpu.PrefetchScalarGridSpec(
        num_scalar_prefetch=0,
        grid=(bp // tb, tp // tc),
        in_specs=[
            pl.BlockSpec((tb, tc, 4 * hp), lambda ib, it: (ib, it, 0)),  # gates chunk
            # Grid-invariant weight: Pallas skips the re-DMA when the block index
            # repeats; left at default buffering (allocation cost only).
            pl.BlockSpec((hp, 4 * hp), lambda ib, it: (0, 0)),           # W_hh^T
        ],
        out_specs=pl.BlockSpec((tb, tc, hp), lambda ib, it: (ib, it, 0)),
        scratch_shapes=[
            pltpu.VMEM((tb, hp), jnp.float32),                           # h carry
            pltpu.VMEM((tb, hp), jnp.float32),                           # c carry
        ],
    )
    return pl.pallas_call(
        _lstm_chunk_kernel,
        out_shape=jax.ShapeDtypeStruct((bp, tp, hp), out_dtype),
        grid_spec=grid_spec,
        compiler_params=pltpu.CompilerParams(
            # Batch blocks are independent ("parallel", v7x megacore); the time
            # axis carries h/c in VMEM scratch and must stay "arbitrary".
            dimension_semantics=("parallel", "arbitrary"),
            vmem_limit_bytes=_vmem_limit_bytes()),
    )(gates_pre, w_hh_t)


# ----------------------------------------------------------------------------
# Parameter packing: transpose + lane-pad weights ONCE, outside the hot path.
# Zero padding is exact: padded gate lanes keep h/c at 0 and padded vocab lanes
# produce logits that are sliced off.
# ----------------------------------------------------------------------------
def _pad_gate_axis(w, h, hp):
    """Pad the trailing 4H axis per gate ([i,f,g,o] each H -> Hp) with zeros."""
    if h == hp:
        return w
    parts = jnp.split(w, 4, axis=-1)
    pad = [(0, 0)] * (w.ndim - 1) + [(0, hp - h)]
    return jnp.concatenate([jnp.pad(p, pad) for p in parts], axis=-1)


def pack_params(params, compute_dtype=jnp.float32):
    """compute_dtype=bf16 is recommended on ALL TPU generations (incl. v5e): the
    MXU is bf16-native and bf16 halves weight DMA.  Accumulation, gate
    nonlinearities and the h/c carries always stay in float32."""
    h = params["w_hh"].shape[1]
    v, _ = params["embedding"].shape
    hp = _round_up(h, _LANE)
    vp = _round_up(v, _LANE)

    w_ih_t = _pad_gate_axis(params["w_ih"].T, h, hp)                   # (E, 4Hp)
    w_hh_t = jnp.pad(params["w_hh"].T, ((0, hp - h), (0, 0)))
    w_hh_t = _pad_gate_axis(w_hh_t, h, hp)                             # (Hp, 4Hp)
    b_gates = _pad_gate_axis((params["b_ih"] + params["b_hh"])[None, :], h, hp)
    w_lin_t = jnp.pad(params["w_lin"].T, ((0, hp - h), (0, vp - v)))   # (Hp, Vp)
    b_lin = jnp.pad(params["b_lin"], (0, vp - v))[None, :]             # (1, Vp)

    return {
        "embedding": params["embedding"],          # lookup table stays f32
        "w_ih_t": w_ih_t.astype(compute_dtype),
        "w_hh_t": w_hh_t.astype(compute_dtype),
        "b_gates": b_gates.astype(jnp.float32),    # bias added in f32
        "w_lin_t": w_lin_t.astype(compute_dtype),
        "b_lin": b_lin.astype(jnp.float32),
    }


# ----------------------------------------------------------------------------
# DecoderRNN.forward
# ----------------------------------------------------------------------------
@jax.jit
def decoder_rnn_forward(kparams, features, captions):
    """features: (B, E) f32, captions: (B, S) int32 -> logits (B, S, V) f32."""
    emb = kparams["embedding"]
    v = emb.shape[0]
    cap_emb = emb[captions[:, :-1]]                               # (B, S-1, E)
    x = jnp.concatenate([features[:, None, :], cap_emb], axis=1)  # (B, T, E)
    b, t, e = x.shape

    compute_dtype = kparams["w_ih_t"].dtype
    hp = kparams["w_hh_t"].shape[0]
    vp = kparams["w_lin_t"].shape[1]

    # Sublane-pad batch; pad time to the chunk size (shrunk for short sequences).
    bp = _round_up(b, _SUBLANE)
    tc = min(_TIME_CHUNK, _round_up(t, _SUBLANE))
    tp = _round_up(t, tc)
    x_pad = jnp.pad(x, ((0, bp - b), (0, tp - t), (0, 0))).astype(compute_dtype)

    # 1) Hoisted input projection: one big parallel MXU matmul, off the serial path.
    gates_pre = _matmul_bias(x_pad.reshape(bp * tp, e),
                             kparams["w_ih_t"], kparams["b_gates"],
                             out_dtype=jnp.float32)               # (Bp*Tp, 4Hp) f32
    gates_pre = gates_pre.reshape(bp, tp, 4 * hp)

    # 2) Serial recurrence: only h @ W_hh^T per step; h_seq emitted in bf16.
    h_seq = _lstm_recurrence(gates_pre, kparams["w_hh_t"],
                             time_chunk=tc)                       # (Bp, Tp, Hp) bf16

    # 3) Output projection: (Bp*Tp, Hp) @ (Hp, Vp) + b, vocab axis outermost.
    logits = _matmul_bias(h_seq.reshape(bp * tp, hp),
                          kparams["w_lin_t"], kparams["b_lin"],
                          out_dtype=jnp.float32)
    return logits.reshape(bp, tp, vp)[:b, :t, :v]                 # (B, T, V)


# ----------------------------------------------------------------------------
# Pure-JAX reference (same math, no Pallas, unpadded torch-layout params).
# ----------------------------------------------------------------------------
def decoder_rnn_reference(params, features, captions):
    emb = params["embedding"]
    cap_emb = emb[captions[:, :-1]]
    x = jnp.concatenate([features[:, None, :], cap_emb], axis=1)  # (B, T, E)
    b = x.shape[0]
    h_dim = params["w_hh"].shape[1]
    w_ih_t, w_hh_t = params["w_ih"].T, params["w_hh"].T
    bias = params["b_ih"] + params["b_hh"]
    w_lin_t = params["w_lin"].T

    def step(carry, x_t):
        h, c = carry
        gates = x_t @ w_ih_t + h @ w_hh_t + bias
        i_g = jax.nn.sigmoid(gates[:, 0 * h_dim:1 * h_dim])
        f_g = jax.nn.sigmoid(gates[:, 1 * h_dim:2 * h_dim])
        g_g = jnp.tanh(gates[:, 2 * h_dim:3 * h_dim])
        o_g = jax.nn.sigmoid(gates[:, 3 * h_dim:4 * h_dim])
        c = f_g * c + i_g * g_g
        h = o_g * jnp.tanh(c)
        return (h, c), h @ w_lin_t + params["b_lin"]

    h0 = jnp.zeros((b, h_dim), jnp.float32)
    c0 = jnp.zeros((b, h_dim), jnp.float32)
    _, logits_t = lax.scan(step, (h0, c0), jnp.transpose(x, (1, 0, 2)))
    return jnp.transpose(logits_t, (1, 0, 2))


# ----------------------------------------------------------------------------
# Deterministic init (shapes per nn.Embedding / nn.LSTM / nn.Linear).
# ----------------------------------------------------------------------------
def init_params(key, embed_size, hidden_size, vocab_size):
    ks = jax.random.split(key, 7)
    scale = 0.1
    e, h, v = embed_size, hidden_size, vocab_size
    return {
        "embedding": scale * jax.random.normal(ks[0], (v, e), jnp.float32),
        "w_ih": scale * jax.random.normal(ks[1], (4 * h, e), jnp.float32),
        "w_hh": scale * jax.random.normal(ks[2], (4 * h, h), jnp.float32),
        "b_ih": scale * jax.random.normal(ks[3], (4 * h,), jnp.float32),
        "b_hh": scale * jax.random.normal(ks[4], (4 * h,), jnp.float32),
        "w_lin": scale * jax.random.normal(ks[5], (v, h), jnp.float32),
        "b_lin": scale * jax.random.normal(ks[6], (v,), jnp.float32),
    }


if __name__ == "__main__":
    # TODO(synk): DecoderRNN.sample() (host-driven greedy autoregressive decode
    # with per-step .item()) is not implemented; only forward() is reproduced.
    embed_size, hidden_size, vocab_size = 16, 32, 40
    batch, seq_len = 2, 8          # LSTM sees T = 1 (image feature) + 7 tokens = 8

    key = jax.random.PRNGKey(0)
    k_par, k_feat, k_cap = jax.random.split(key, 3)
    params = init_params(k_par, embed_size, hidden_size, vocab_size)
    features = jax.random.normal(k_feat, (batch, embed_size), jnp.float32)
    captions = jax.random.randint(k_cap, (batch, seq_len), 0, vocab_size,
                                  dtype=jnp.int32)

    ref = jax.block_until_ready(decoder_rnn_reference(params, features, captions))

    # f32 compute path (h_seq is intentionally bf16, hence the slightly relaxed tol).
    out = jax.block_until_ready(
        decoder_rnn_forward(pack_params(params, jnp.float32), features, captions))
    assert out.shape == (batch, seq_len, vocab_size), out.shape
    assert jnp.allclose(out, ref, atol=1e-2, rtol=1e-2), \
        f"f32 max abs diff {jnp.max(jnp.abs(out - ref))}"

    # bf16 matmul-input path (recommended on v5e/v6e/v7x; f32 accumulation/carries).
    out_bf16 = jax.block_until_ready(
        decoder_rnn_forward(pack_params(params, jnp.bfloat16), features, captions))
    assert jnp.allclose(out_bf16, ref, atol=1e-1, rtol=1e-1), \
        f"bf16 max abs diff {jnp.max(jnp.abs(out_bf16 - ref))}"

    print("KERNEL_OK")
</pallas_src>

<mosaic_0001>
module attributes {stable_mosaic.version = 11 : i64} {
  func.func @_matmul_bias_fullk_kernel(%arg0: i32, %arg1: i32, %arg2: memref<64x16xf32, #tpu.memory_space<vmem>>, %arg3: memref<16x512xf32, #tpu.memory_space<vmem>>, %arg4: memref<1x512xf32, #tpu.memory_space<vmem>>, %arg5: memref<64x512xf32, #tpu.memory_space<vmem>>) attributes {dimension_semantics = [#tpu.dimension_semantics<parallel>, #tpu.dimension_semantics<parallel>], iteration_bounds = array<i64: 1, 1>, scalar_prefetch = 0 : i64, scratch_operands = 0 : i64, tpu.core_type = #tpu.core_type<tc>, window_params = [{transform_indices = @transform_0, window_bounds = array<i64: 64, 16>}, {transform_indices = @transform_1, window_bounds = array<i64: 16, 512>}, {transform_indices = @transform_2, window_bounds = array<i64: 1, 512>}, {transform_indices = @transform_3, window_bounds = array<i64: 64, 512>}]} {
    %c0 = arith.constant 0 : index
    %c0_0 = arith.constant 0 : index
    %0 = vector.load %arg2[%c0, %c0_0] : memref<64x16xf32, #tpu.memory_space<vmem>>, vector<64x16xf32>
    %c0_1 = arith.constant 0 : index
    %c0_2 = arith.constant 0 : index
    %1 = vector.load %arg3[%c0_1, %c0_2] : memref<16x512xf32, #tpu.memory_space<vmem>>, vector<16x512xf32>
    %cst = arith.constant dense<0.000000e+00> : vector<64x512xf32>
    %2 = tpu.matmul %0, %1, %cst {dimension_numbers = #tpu.dot_dimension_numbers<[1], [0], [0], [1], [0, 0, 1, 1], [], []>} : vector<64x16xf32>, vector<16x512xf32>, vector<64x512xf32> -> vector<64x512xf32>
    %c0_3 = arith.constant 0 : index
    %c0_4 = arith.constant 0 : index
    %3 = vector.load %arg4[%c0_3, %c0_4] : memref<1x512xf32, #tpu.memory_space<vmem>>, vector<1x512xf32>
    %4 = vector.broadcast %3 : vector<1x512xf32> to vector<64x512xf32>
    %5 = arith.addf %2, %4 : vector<64x512xf32>
    %c0_5 = arith.constant 0 : index
    %c0_6 = arith.constant 0 : index
    %6 = vector.load %arg5[%c0_5, %c0_6] : memref<64x512xf32, #tpu.memory_space<vmem>>, vector<64x512xf32>
    tpu.vector_store %arg5[%c0_5, %c0_6], %5 {strides = array<i32>} : memref<64x512xf32, #tpu.memory_space<vmem>>, vector<64x512xf32>,
    return
  }
  func.func @transform_0(%arg0: i32, %arg1: i32) -> (i32, i32) {
    %c0_i32 = arith.constant 0 : i32
    %c0_i32_0 = arith.constant 0 : i32
    return %arg1, %c0_i32 : i32, i32
  }
  func.func @transform_1(%arg0: i32, %arg1: i32) -> (i32, i32) {
    %c0_i32 = arith.constant 0 : i32
    %c0_i32_0 = arith.constant 0 : i32
    return %c0_i32, %arg0 : i32, i32
  }
  func.func @transform_2(%arg0: i32, %arg1: i32) -> (i32, i32) {
    %c0_i32 = arith.constant 0 : i32
    %c0_i32_0 = arith.constant 0 : i32
    return %c0_i32, %arg0 : i32, i32
  }
  func.func @transform_3(%arg0: i32, %arg1: i32) -> (i32, i32) {
    %c0_i32 = arith.constant 0 : i32
    return %arg1, %arg0 : i32, i32
  }
}

module attributes {stable_mosaic.version = 11 : i64} {
  func.func @_matmul_bias_fullk_kernel(%arg0: i32, %arg1: i32, %arg2: memref<64x128xbf16, #tpu.memory_space<vmem>>, %arg3: memref<128x128xf32, #tpu.memory_space<vmem>>, %arg4: memref<1x128xf32, #tpu.memory_space<vmem>>, %arg5: memref<64x128xf32, #tpu.memory_space<vmem>>) attributes {dimension_semantics = [#tpu.dimension_semantics<parallel>, #tpu.dimension_semantics<parallel>], iteration_bounds = array<i64: 1, 1>, scalar_prefetch = 0 : i64, scratch_operands = 0 : i64, tpu.core_type = #tpu.core_type<tc>, window_params = [{transform_indices = @transform_0, window_bounds = array<i64: 64, 128>}, {transform_indices = @transform_1, window_bounds = array<i64: 128, 128>}, {transform_indices = @transform_2, window_bounds = array<i64: 1, 128>}, {transform_indices = @transform_3, window_bounds = array<i64: 64, 128>}]} {
    %c0 = arith.constant 0 : index
    %c0_0 = arith.constant 0 : index
    %0 = vector.load %arg2[%c0, %c0_0] : memref<64x128xbf16, #tpu.memory_space<vmem>>, vector<64x128xbf16>
    %c0_1 = arith.constant 0 : index
    %c0_2 = arith.constant 0 : index
    %1 = vector.load %arg3[%c0_1, %c0_2] : memref<128x128xf32, #tpu.memory_space<vmem>>, vector<128x128xf32>
    %cst = arith.constant dense<0.000000e+00> : vector<64x128xf32>
    %2 = tpu.matmul %0, %1, %cst {dimension_numbers = #tpu.dot_dimension_numbers<[1], [0], [0], [1], [0, 0, 1, 1], [], []>} : vector<64x128xbf16>, vector<128x128xf32>, vector<64x128xf32> -> vector<64x128xf32>
    %c0_3 = arith.constant 0 : index
    %c0_4 = arith.constant 0 : index
    %3 = vector.load %arg4[%c0_3, %c0_4] : memref<1x128xf32, #tpu.memory_space<vmem>>, vector<1x128xf32>
    %4 = vector.broadcast %3 : vector<1x128xf32> to vector<64x128xf32>
    %5 = arith.addf %2, %4 : vector<64x128xf32>
    %c0_5 = arith.constant 0 : index
    %c0_6 = arith.constant 0 : index
    %6 = vector.load %arg5[%c0_5, %c0_6] : memref<64x128xf32, #tpu.memory_space<vmem>>, vector<64x128xf32>
    tpu.vector_store %arg5[%c0_5, %c0_6], %5 {strides = array<i32>} : memref<64x128xf32, #tpu.memory_space<vmem>>, vector<64x128xf32>,
    return
  }
  func.func @transform_0(%arg0: i32, %arg1: i32) -> (i32, i32) {
    %c0_i32 = arith.constant 0 : i32
    %c0_i32_0 = arith.constant 0 : i32
    return %arg1, %c0_i32 : i32, i32
  }
  func.func @transform_1(%arg0: i32, %arg1: i32) -> (i32, i32) {
    %c0_i32 = arith.constant 0 : i32
    %c0_i32_0 = arith.constant 0 : i32
    return %c0_i32, %arg0 : i32, i32
  }
  func.func @transform_2(%arg0: i32, %arg1: i32) -> (i32, i32) {
    %c0_i32 = arith.constant 0 : i32
    %c0_i32_0 = arith.constant 0 : i32
    return %c0_i32, %arg0 : i32, i32
  }
  func.func @transform_3(%arg0: i32, %arg1: i32) -> (i32, i32) {
    %c0_i32 = arith.constant 0 : i32
    return %arg1, %arg0 : i32, i32
  }
}

module attributes {stable_mosaic.version = 11 : i64} {
  func.func @_lstm_chunk_kernel(%arg0: i32, %arg1: i32, %arg2: memref<8x8x512xf32, #tpu.memory_space<vmem>>, %arg3: memref<128x512xf32, #tpu.memory_space<vmem>>, %arg4: memref<8x8x128xbf16, #tpu.memory_space<vmem>>, %arg5: memref<8x128xf32, #tpu.memory_space<vmem>>, %arg6: memref<8x128xf32, #tpu.memory_space<vmem>>) attributes {dimension_semantics = [#tpu.dimension_semantics<parallel>, #tpu.dimension_semantics<arbitrary>], iteration_bounds = array<i64: 1, 1>, scalar_prefetch = 0 : i64, scratch_operands = 2 : i64, tpu.core_type = #tpu.core_type<tc>, window_params = [{transform_indices = @transform_0, window_bounds = array<i64: 8, 8, 512>}, {pipeline_mode = #tpu.pipeline_mode<synchronous>, transform_indices = @transform_1, window_bounds = array<i64: 128, 512>}, {transform_indices = @transform_2, window_bounds = array<i64: 8, 8, 128>}]} {
    %c0_i32 = arith.constant 0 : i32
    %0 = arith.cmpi eq, %arg1, %c0_i32 : i32
    %1 = arith.extui %0 : i1 to i32
    %c0_i32_0 = arith.constant 0 : i32
    %2 = arith.cmpi ne, %1, %c0_i32_0 : i32
    scf.if %2 {
      %cst_74 = arith.constant 0.000000e+00 : f32
      %288 = vector.broadcast %cst_74 : f32 to vector<8x128xf32>
      %c0_75 = arith.constant 0 : index
      %c0_76 = arith.constant 0 : index
      %289 = vector.load %arg5[%c0_75, %c0_76] : memref<8x128xf32, #tpu.memory_space<vmem>>, vector<8x128xf32>
      tpu.vector_store %arg5[%c0_75, %c0_76], %288 {strides = array<i32>} : memref<8x128xf32, #tpu.memory_space<vmem>>, vector<8x128xf32>,
      %cst_77 = arith.constant 0.000000e+00 : f32
      %290 = vector.broadcast %cst_77 : f32 to vector<8x128xf32>
      %c0_78 = arith.constant 0 : index
      %c0_79 = arith.constant 0 : index
      %291 = vector.load %arg6[%c0_78, %c0_79] : memref<8x128xf32, #tpu.memory_space<vmem>>, vector<8x128xf32>
      tpu.vector_store %arg6[%c0_78, %c0_79], %290 {strides = array<i32>} : memref<8x128xf32, #tpu.memory_space<vmem>>, vector<8x128xf32>,
    } else {
    }
    %c0 = arith.constant 0 : index
    %c0_1 = arith.constant 0 : index
    %3 = vector.load %arg3[%c0, %c0_1] : memref<128x512xf32, #tpu.memory_space<vmem>>, vector<128x512xf32>
    %c0_2 = arith.constant 0 : index
    %c0_3 = arith.constant 0 : index
    %4 = vector.load %arg5[%c0_2, %c0_3] : memref<8x128xf32, #tpu.memory_space<vmem>>, vector<8x128xf32>
    %c0_4 = arith.constant 0 : index
    %c0_5 = arith.constant 0 : index
    %5 = vector.load %arg6[%c0_4, %c0_5] : memref<8x128xf32, #tpu.memory_space<vmem>>, vector<8x128xf32>
    %c0_i32_6 = arith.constant 0 : i32
    %c0_7 = arith.constant 0 : index
    %6 = arith.index_cast %c0_i32_6 : i32 to index
    %c0_8 = arith.constant 0 : index
    %7 = vector.load %arg2[%c0_7, %6, %c0_8] : memref<8x8x512xf32, #tpu.memory_space<vmem>>, vector<8x1x512xf32>
    %8 = vector.shape_cast %7 : vector<8x1x512xf32> to vector<8x512xf32>
    %cst = arith.constant dense<0.000000e+00> : vector<8x512xf32>
    %9 = tpu.matmul %4, %3, %cst {dimension_numbers = #tpu.dot_dimension_numbers<[1], [0], [0], [1], [0, 0, 1, 1], [], []>} : vector<8x128xf32>, vector<128x512xf32>, vector<8x512xf32> -> vector<8x512xf32>
    %10 = arith.addf %8, %9 : vector<8x512xf32>
    %11 = vector.extract_strided_slice %10 {offsets = [0, 0], sizes = [8, 128], strides = [1, 1]} : vector<8x512xf32> to vector<8x128xf32>
    %12 = arith.negf %11 : vector<8x128xf32>
    %13 = math.exp %12 : vector<8x128xf32>
    %cst_9 = arith.constant 1.000000e+00 : f32
    %14 = vector.broadcast %cst_9 : f32 to vector<8x128xf32>
    %15 = arith.addf %14, %13 : vector<8x128xf32>
    %16 = arith.divf %14, %15 : vector<8x128xf32>
    %17 = vector.extract_strided_slice %10 {offsets = [0, 128], sizes = [8, 128], strides = [1, 1]} : vector<8x512xf32> to vector<8x128xf32>
    %18 = arith.negf %17 : vector<8x128xf32>
    %19 = math.exp %18 : vector<8x128xf32>
    %cst_10 = arith.constant 1.000000e+00 : f32
    %20 = vector.broadcast %cst_10 : f32 to vector<8x128xf32>
    %21 = arith.addf %20, %19 : vector<8x128xf32>
    %22 = arith.divf %20, %21 : vector<8x128xf32>
    %23 = vector.extract_strided_slice %10 {offsets = [0, 256], sizes = [8, 128], strides = [1, 1]} : vector<8x512xf32> to vector<8x128xf32>
    %24 = math.tanh %23 : vector<8x128xf32>
    %25 = vector.extract_strided_slice %10 {offsets = [0, 384], sizes = [8, 128], strides = [1, 1]} : vector<8x512xf32> to vector<8x128xf32>
    %26 = arith.negf %25 : vector<8x128xf32>
    %27 = math.exp %26 : vector<8x128xf32>
    %cst_11 = arith.constant 1.000000e+00 : f32
    %28 = vector.broadcast %cst_11 : f32 to vector<8x128xf32>
    %29 = arith.addf %28, %27 : vector<8x128xf32>
    %30 = arith.divf %28, %29 : vector<8x128xf32>
    %31 = arith.mulf %22, %5 : vector<8x128xf32>
    %32 = arith.mulf %16, %24 : vector<8x128xf32>
    %33 = arith.addf %31, %32 : vector<8x128xf32>
    %34 = math.tanh %33 : vector<8x128xf32>
    %35 = arith.mulf %30, %34 : vector<8x128xf32>
    %36 = arith.truncf %35 : vector<8x128xf32> to vector<8x128xbf16>
    %c0_12 = arith.constant 0 : index
    %37 = arith.index_cast %c0_i32_6 : i32 to index
    %c0_13 = arith.constant 0 : index
    %38 = vector.load %arg4[%c0_12, %37, %c0_13] : memref<8x8x128xbf16, #tpu.memory_space<vmem>>, vector<8x1x128xbf16>
    %39 = vector.shape_cast %38 : vector<8x1x128xbf16> to vector<8x128xbf16>
    %40 = vector.shape_cast %36 : vector<8x128xbf16> to vector<8x1x128xbf16>
    tpu.vector_store %arg4[%c0_12, %37, %c0_13], %40 {strides = array<i32>} : memref<8x8x128xbf16, #tpu.memory_space<vmem>>, vector<8x1x128xbf16>,
    %c1_i32 = arith.constant 1 : i32
    %c0_14 = arith.constant 0 : index
    %41 = arith.index_cast %c1_i32 : i32 to index
    %c0_15 = arith.constant 0 : index
    %42 = vector.load %arg2[%c0_14, %41, %c0_15] : memref<8x8x512xf32, #tpu.memory_space<vmem>>, vector<8x1x512xf32>
    %43 = vector.shape_cast %42 : vector<8x1x512xf32> to vector<8x512xf32>
    %cst_16 = arith.constant dense<0.000000e+00> : vector<8x512xf32>
    %44 = tpu.matmul %35, %3, %cst_16 {dimension_numbers = #tpu.dot_dimension_numbers<[1], [0], [0], [1], [0, 0, 1, 1], [], []>} : vector<8x128xf32>, vector<128x512xf32>, vector<8x512xf32> -> vector<8x512xf32>
    %45 = arith.addf %43, %44 : vector<8x512xf32>
    %46 = vector.extract_strided_slice %45 {offsets = [0, 0], sizes = [8, 128], strides = [1, 1]} : vector<8x512xf32> to vector<8x128xf32>
    %47 = arith.negf %46 : vector<8x128xf32>
    %48 = math.exp %47 : vector<8x128xf32>
    %cst_17 = arith.constant 1.000000e+00 : f32
    %49 = vector.broadcast %cst_17 : f32 to vector<8x128xf32>
    %50 = arith.addf %49, %48 : vector<8x128xf32>
    %51 = arith.divf %49, %50 : vector<8x128xf32>
    %52 = vector.extract_strided_slice %45 {offsets = [0, 128], sizes = [8, 128], strides = [1, 1]} : vector<8x512xf32> to vector<8x128xf32>
    %53 = arith.negf %52 : vector<8x128xf32>
    %54 = math.exp %53 : vector<8x128xf32>
    %cst_18 = arith.constant 1.000000e+00 : f32
    %55 = vector.broadcast %cst_18 : f32 to vector<8x128xf32>
    %56 = arith.addf %55, %54 : vector<8x128xf32>
    %57 = arith.divf %55, %56 : vector<8x128xf32>
    %58 = vector.extract_strided_slice %45 {offsets = [0, 256], sizes = [8, 128], strides = [1, 1]} : vector<8x512xf32> to vector<8x128xf32>
    %59 = math.tanh %58 : vector<8x128xf32>
    %60 = vector.extract_strided_slice %45 {offsets = [0, 384], sizes = [8, 128], strides = [1, 1]} : vector<8x512xf32> to vector<8x128xf32>
    %61 = arith.negf %60 : vector<8x128xf32>
    %62 = math.exp %61 : vector<8x128xf32>
    %cst_19 = arith.constant 1.000000e+00 : f32
    %63 = vector.broadcast %cst_19 : f32 to vector<8x128xf32>
    %64 = arith.addf %63, %62 : vector<8x128xf32>
    %65 = arith.divf %63, %64 : vector<8x128xf32>
    %66 = arith.mulf %57, %33 : vector<8x128xf32>
    %67 = arith.mulf %51, %59 : vector<8x128xf32>
    %68 = arith.addf %66, %67 : vector<8x128xf32>
    %69 = math.tanh %68 : vector<8x128xf32>
    %70 = arith.mulf %65, %69 : vector<8x128xf32>
    %71 = arith.truncf %70 : vector<8x128xf32> to vector<8x128xbf16>
    %c0_20 = arith.constant 0 : index
    %72 = arith.index_cast %c1_i32 : i32 to index
    %c0_21 = arith.constant 0 : index
    %73 = vector.load %arg4[%c0_20, %72, %c0_21] : memref<8x8x128xbf16, #tpu.memory_space<vmem>>, vector<8x1x128xbf16>
    %74 = vector.shape_cast %73 : vector<8x1x128xbf16> to vector<8x128xbf16>
    %75 = vector.shape_cast %71 : vector<8x128xbf16> to vector<8x1x128xbf16>
    tpu.vector_store %arg4[%c0_20, %72, %c0_21], %75 {strides = array<i32>} : memref<8x8x128xbf16, #tpu.memory_space<vmem>>, vector<8x1x128xbf16>,
    %c2_i32 = arith.constant 2 : i32
    %c0_22 = arith.constant 0 : index
    %76 = arith.index_cast %c2_i32 : i32 to index
    %c0_23 = arith.constant 0 : index
    %77 = vector.load %arg2[%c0_22, %76, %c0_23] : memref<8x8x512xf32, #tpu.memory_space<vmem>>, vector<8x1x512xf32>
    %78 = vector.shape_cast %77 : vector<8x1x512xf32> to vector<8x512xf32>
    %cst_24 = arith.constant dense<0.000000e+00> : vector<8x512xf32>
    %79 = tpu.matmul %70, %3, %cst_24 {dimension_numbers = #tpu.dot_dimension_numbers<[1], [0], [0], [1], [0, 0, 1, 1], [], []>} : vector<8x128xf32>, vector<128x512xf32>, vector<8x512xf32> -> vector<8x512xf32>
    %80 = arith.addf %78, %79 : vector<8x512xf32>
    %81 = vector.extract_strided_slice %80 {offsets = [0, 0], sizes = [8, 128], strides = [1, 1]} : vector<8x512xf32> to vector<8x128xf32>
    %82 = arith.negf %81 : vector<8x128xf32>
    %83 = math.exp %82 : vector<8x128xf32>
    %cst_25 = arith.constant 1.000000e+00 : f32
    %84 = vector.broadcast %cst_25 : f32 to vector<8x128xf32>
    %85 = arith.addf %84, %83 : vector<8x128xf32>
    %86 = arith.divf %84, %85 : vector<8x128xf32>
    %87 = vector.extract_strided_slice %80 {offsets = [0, 128], sizes = [8, 128], strides = [1, 1]} : vector<8x512xf32> to vector<8x128xf32>
    %88 = arith.negf %87 : vector<8x128xf32>
    %89 = math.exp %88 : vector<8x128xf32>
    %cst_26 = arith.constant 1.000000e+00 : f32
    %90 = vector.broadcast %cst_26 : f32 to vector<8x128xf32>
    %91 = arith.addf %90, %89 : vector<8x128xf32>
    %92 = arith.divf %90, %91 : vector<8x128xf32>
    %93 = vector.extract_strided_slice %80 {offsets = [0, 256], sizes = [8, 128], strides = [1, 1]} : vector<8x512xf32> to vector<8x128xf32>
    %94 = math.tanh %93 : vector<8x128xf32>
    %95 = vector.extract_strided_slice %80 {offsets = [0, 384], sizes = [8, 128], strides = [1, 1]} : vector<8x512xf32> to vector<8x128xf32>
    %96 = arith.negf %95 : vector<8x128xf32>
    %97 = math.exp %96 : vector<8x128xf32>
    %cst_27 = arith.constant 1.000000e+00 : f32
    %98 = vector.broadcast %cst_27 : f32 to vector<8x128xf32>
    %99 = arith.addf %98, %97 : vector<8x128xf32>
    %100 = arith.divf %98, %99 : vector<8x128xf32>
    %101 = arith.mulf %92, %68 : vector<8x128xf32>
    %102 = arith.mulf %86, %94 : vector<8x128xf32>
    %103 = arith.addf %101, %102 : vector<8x128xf32>
    %104 = math.tanh %103 : vector<8x128xf32>
    %105 = arith.mulf %100, %104 : vector<8x128xf32>
    %106 = arith.truncf %105 : vector<8x128xf32> to vector<8x128xbf16>
    %c0_28 = arith.constant 0 : index
    %107 = arith.index_cast %c2_i32 : i32 to index
    %c0_29 = arith.constant 0 : index
    %108 = vector.load %arg4[%c0_28, %107, %c0_29] : memref<8x8x128xbf16, #tpu.memory_space<vmem>>, vector<8x1x128xbf16>
    %109 = vector.shape_cast %108 : vector<8x1x128xbf16> to vector<8x128xbf16>
    %110 = vector.shape_cast %106 : vector<8x128xbf16> to vector<8x1x128xbf16>
    tpu.vector_store %arg4[%c0_28, %107, %c0_29], %110 {strides = array<i32>} : memref<8x8x128xbf16, #tpu.memory_space<vmem>>, vector<8x1x128xbf16>,
    %c3_i32 = arith.constant 3 : i32
    %c0_30 = arith.constant 0 : index
    %111 = arith.index_cast %c3_i32 : i32 to index
    %c0_31 = arith.constant 0 : index
    %112 = vector.load %arg2[%c0_30, %111, %c0_31] : memref<8x8x512xf32, #tpu.memory_space<vmem>>, vector<8x1x512xf32>
    %113 = vector.shape_cast %112 : vector<8x1x512xf32> to vector<8x512xf32>
    %cst_32 = arith.constant dense<0.000000e+00> : vector<8x512xf32>
    %114 = tpu.matmul %105, %3, %cst_32 {dimension_numbers = #tpu.dot_dimension_numbers<[1], [0], [0], [1], [0, 0, 1, 1], [], []>} : vector<8x128xf32>, vector<128x512xf32>, vector<8x512xf32> -> vector<8x512xf32>
    %115 = arith.addf %113, %114 : vector<8x512xf32>
    %116 = vector.extract_strided_slice %115 {offsets = [0, 0], sizes = [8, 128], strides = [1, 1]} : vector<8x512xf32> to vector<8x128xf32>
    %117 = arith.negf %116 : vector<8x128xf32>
    %118 = math.exp %117 : vector<8x128xf32>
    %cst_33 = arith.constant 1.000000e+00 : f32
    %119 = vector.broadcast %cst_33 : f32 to vector<8x128xf32>
    %120 = arith.addf %119, %118 : vector<8x128xf32>
    %121 = arith.divf %119, %120 : vector<8x128xf32>
    %122 = vector.extract_strided_slice %115 {offsets = [0, 128], sizes = [8, 128], strides = [1, 1]} : vector<8x512xf32> to vector<8x128xf32>
    %123 = arith.negf %122 : vector<8x128xf32>
    %124 = math.exp %123 : vector<8x128xf32>
    %cst_34 = arith.constant 1.000000e+00 : f32
    %125 = vector.broadcast %cst_34 : f32 to vector<8x128xf32>
    %126 = arith.addf %125, %124 : vector<8x128xf32>
    %127 = arith.divf %125, %126 : vector<8x128xf32>
    %128 = vector.extract_strided_slice %115 {offsets = [0, 256], sizes = [8, 128], strides = [1, 1]} : vector<8x512xf32> to vector<8x128xf32>
    %129 = math.tanh %128 : vector<8x128xf32>
    %130 = vector.extract_strided_slice %115 {offsets = [0, 384], sizes = [8, 128], strides = [1, 1]} : vector<8x512xf32> to vector<8x128xf32>
    %131 = arith.negf %130 : vector<8x128xf32>
    %132 = math.exp %131 : vector<8x128xf32>
    %cst_35 = arith.constant 1.000000e+00 : f32
    %133 = vector.broadcast %cst_35 : f32 to vector<8x128xf32>
    %134 = arith.addf %133, %132 : vector<8x128xf32>
    %135 = arith.divf %133, %134 : vector<8x128xf32>
    %136 = arith.mulf %127, %103 : vector<8x128xf32>
    %137 = arith.mulf %121, %129 : vector<8x128xf32>
    %138 = arith.addf %136, %137 : vector<8x128xf32>
    %139 = math.tanh %138 : vector<8x128xf32>
    %140 = arith.mulf %135, %139 : vector<8x128xf32>
    %141 = arith.truncf %140 : vector<8x128xf32> to vector<8x128xbf16>
    %c0_36 = arith.constant 0 : index
    %142 = arith.index_cast %c3_i32 : i32 to index
    %c0_37 = arith.constant 0 : index
    %143 = vector.load %arg4[%c0_36, %142, %c0_37] : memref<8x8x128xbf16, #tpu.memory_space<vmem>>, vector<8x1x128xbf16>
    %144 = vector.shape_cast %143 : vector<8x1x128xbf16> to vector<8x128xbf16>
    %145 = vector.shape_cast %141 : vector<8x128xbf16> to vector<8x1x128xbf16>
    tpu.vector_store %arg4[%c0_36, %142, %c0_37], %145 {strides = array<i32>} : memref<8x8x128xbf16, #tpu.memory_space<vmem>>, vector<8x1x128xbf16>,
    %c4_i32 = arith.constant 4 : i32
    %c0_38 = arith.constant 0 : index
    %146 = arith.index_cast %c4_i32 : i32 to index
    %c0_39 = arith.constant 0 : index
    %147 = vector.load %arg2[%c0_38, %146, %c0_39] : memref<8x8x512xf32, #tpu.memory_space<vmem>>, vector<8x1x512xf32>
    %148 = vector.shape_cast %147 : vector<8x1x512xf32> to vector<8x512xf32>
    %cst_40 = arith.constant dense<0.000000e+00> : vector<8x512xf32>
    %149 = tpu.matmul %140, %3, %cst_40 {dimension_numbers = #tpu.dot_dimension_numbers<[1], [0], [0], [1], [0, 0, 1, 1], [], []>} : vector<8x128xf32>, vector<128x512xf32>, vector<8x512xf32> -> vector<8x512xf32>
    %150 = arith.addf %148, %149 : vector<8x512xf32>
    %151 = vector.extract_strided_slice %150 {offsets = [0, 0], sizes = [8, 128], strides = [1, 1]} : vector<8x512xf32> to vector<8x128xf32>
    %152 = arith.negf %151 : vector<8x128xf32>
    %153 = math.exp %152 : vector<8x128xf32>
    %cst_41 = arith.constant 1.000000e+00 : f32
    %154 = vector.broadcast %cst_41 : f32 to vector<8x128xf32>
    %155 = arith.addf %154, %153 : vector<8x128xf32>
    %156 = arith.divf %154, %155 : vector<8x128xf32>
    %157 = vector.extract_strided_slice %150 {offsets = [0, 128], sizes = [8, 128], strides = [1, 1]} : vector<8x512xf32> to vector<8x128xf32>
    %158 = arith.negf %157 : vector<8x128xf32>
    %159 = math.exp %158 : vector<8x128xf32>
    %cst_42 = arith.constant 1.000000e+00 : f32
    %160 = vector.broadcast %cst_42 : f32 to vector<8x128xf32>
    %161 = arith.addf %160, %159 : vector<8x128xf32>
    %162 = arith.divf %160, %161 : vector<8x128xf32>
    %163 = vector.extract_strided_slice %150 {offsets = [0, 256], sizes = [8, 128], strides = [1, 1]} : vector<8x512xf32> to vector<8x128xf32>
    %164 = math.tanh %163 : vector<8x128xf32>
    %165 = vector.extract_strided_slice %150 {offsets = [0, 384], sizes = [8, 128], strides = [1, 1]} : vector<8x512xf32> to vector<8x128xf32>
    %166 = arith.negf %165 : vector<8x128xf32>
    %167 = math.exp %166 : vector<8x128xf32>
    %cst_43 = arith.constant 1.000000e+00 : f32
    %168 = vector.broadcast %cst_43 : f32 to vector<8x128xf32>
    %169 = arith.addf %168, %167 : vector<8x128xf32>
    %170 = arith.divf %168, %169 : vector<8x128xf32>
    %171 = arith.mulf %162, %138 : vector<8x128xf32>
    %172 = arith.mulf %156, %164 : vector<8x128xf32>
    %173 = arith.addf %171, %172 : vector<8x128xf32>
    %174 = math.tanh %173 : vector<8x128xf32>
    %175 = arith.mulf %170, %174 : vector<8x128xf32>
    %176 = arith.truncf %175 : vector<8x128xf32> to vector<8x128xbf16>
    %c0_44 = arith.constant 0 : index
    %177 = arith.index_cast %c4_i32 : i32 to index
    %c0_45 = arith.constant 0 : index
    %178 = vector.load %arg4[%c0_44, %177, %c0_45] : memref<8x8x128xbf16, #tpu.memory_space<vmem>>, vector<8x1x128xbf16>
    %179 = vector.shape_cast %178 : vector<8x1x128xbf16> to vector<8x128xbf16>
    %180 = vector.shape_cast %176 : vector<8x128xbf16> to vector<8x1x128xbf16>
    tpu.vector_store %arg4[%c0_44, %177, %c0_45], %180 {strides = array<i32>} : memref<8x8x128xbf16, #tpu.memory_space<vmem>>, vector<8x1x128xbf16>,
    %c5_i32 = arith.constant 5 : i32
    %c0_46 = arith.constant 0 : index
    %181 = arith.index_cast %c5_i32 : i32 to index
    %c0_47 = arith.constant 0 : index
    %182 = vector.load %arg2[%c0_46, %181, %c0_47] : memref<8x8x512xf32, #tpu.memory_space<vmem>>, vector<8x1x512xf32>
    %183 = vector.shape_cast %182 : vector<8x1x512xf32> to vector<8x512xf32>
    %cst_48 = arith.constant dense<0.000000e+00> : vector<8x512xf32>
    %184 = tpu.matmul %175, %3, %cst_48 {dimension_numbers = #tpu.dot_dimension_numbers<[1], [0], [0], [1], [0, 0, 1, 1], [], []>} : vector<8x128xf32>, vector<128x512xf32>, vector<8x512xf32> -> vector<8x512xf32>
    %185 = arith.addf %183, %184 : vector<8x512xf32>
    %186 = vector.extract_strided_slice %185 {offsets = [0, 0], sizes = [8, 128], strides = [1, 1]} : vector<8x512xf32> to vector<8x128xf32>
    %187 = arith.negf %186 : vector<8x128xf32>
    %188 = math.exp %187 : vector<8x128xf32>
    %cst_49 = arith.constant 1.000000e+00 : f32
    %189 = vector.broadcast %cst_49 : f32 to vector<8x128xf32>
    %190 = arith.addf %189, %188 : vector<8x128xf32>
    %191 = arith.divf %189, %190 : vector<8x128xf32>
    %192 = vector.extract_strided_slice %185 {offsets = [0, 128], sizes = [8, 128], strides = [1, 1]} : vector<8x512xf32> to vector<8x128xf32>
    %193 = arith.negf %192 : vector<8x128xf32>
    %194 = math.exp %193 : vector<8x128xf32>
    %cst_50 = arith.constant 1.000000e+00 : f32
    %195 = vector.broadcast %cst_50 : f32 to vector<8x128xf32>
    %196 = arith.addf %195, %194 : vector<8x128xf32>
    %197 = arith.divf %195, %196 : vector<8x128xf32>
    %198 = vector.extract_strided_slice %185 {offsets = [0, 256], sizes = [8, 128], strides = [1, 1]} : vector<8x512xf32> to vector<8x128xf32>
    %199 = math.tanh %198 : vector<8x128xf32>
    %200 = vector.extract_strided_slice %185 {offsets = [0, 384], sizes = [8, 128], strides = [1, 1]} : vector<8x512xf32> to vector<8x128xf32>
    %201 = arith.negf %200 : vector<8x128xf32>
    %202 = math.exp %201 : vector<8x128xf32>
    %cst_51 = arith.constant 1.000000e+00 : f32
    %203 = vector.broadcast %cst_51 : f32 to vector<8x128xf32>
    %204 = arith.addf %203, %202 : vector<8x128xf32>
    %205 = arith.divf %203, %204 : vector<8x128xf32>
    %206 = arith.mulf %197, %173 : vector<8x128xf32>
    %207 = arith.mulf %191, %199 : vector<8x128xf32>
    %208 = arith.addf %206, %207 : vector<8x128xf32>
    %209 = math.tanh %208 : vector<8x128xf32>
    %210 = arith.mulf %205, %209 : vector<8x128xf32>
    %211 = arith.truncf %210 : vector<8x128xf32> to vector<8x128xbf16>
    %c0_52 = arith.constant 0 : index
    %212 = arith.index_cast %c5_i32 : i32 to index
    %c0_53 = arith.constant 0 : index
    %213 = vector.load %arg4[%c0_52, %212, %c0_53] : memref<8x8x128xbf16, #tpu.memory_space<vmem>>, vector<8x1x128xbf16>
    %214 = vector.shape_cast %213 : vector<8x1x128xbf16> to vector<8x128xbf16>
    %215 = vector.shape_cast %211 : vector<8x128xbf16> to vector<8x1x128xbf16>
    tpu.vector_store %arg4[%c0_52, %212, %c0_53], %215 {strides = array<i32>} : memref<8x8x128xbf16, #tpu.memory_space<vmem>>, vector<8x1x128xbf16>,
    %c6_i32 = arith.constant 6 : i32
    %c0_54 = arith.constant 0 : index
    %216 = arith.index_cast %c6_i32 : i32 to index
    %c0_55 = arith.constant 0 : index
    %217 = vector.load %arg2[%c0_54, %216, %c0_55] : memref<8x8x512xf32, #tpu.memory_space<vmem>>, vector<8x1x512xf32>
    %218 = vector.shape_cast %217 : vector<8x1x512xf32> to vector<8x512xf32>
    %cst_56 = arith.constant dense<0.000000e+00> : vector<8x512xf32>
    %219 = tpu.matmul %210, %3, %cst_56 {dimension_numbers = #tpu.dot_dimension_numbers<[1], [0], [0], [1], [0, 0, 1, 1], [], []>} : vector<8x128xf32>, vector<128x512xf32>, vector<8x512xf32> -> vector<8x512xf32>
    %220 = arith.addf %218, %219 : vector<8x512xf32>
    %221 = vector.extract_strided_slice %220 {offsets = [0, 0], sizes = [8, 128], strides = [1, 1]} : vector<8x512xf32> to vector<8x128xf32>
    %222 = arith.negf %221 : vector<8x128xf32>
    %223 = math.exp %222 : vector<8x128xf32>
    %cst_57 = arith.constant 1.000000e+00 : f32
    %224 = vector.broadcast %cst_57 : f32 to vector<8x128xf32>
    %225 = arith.addf %224, %223 : vector<8x128xf32>
    %226 = arith.divf %224, %225 : vector<8x128xf32>
    %227 = vector.extract_strided_slice %220 {offsets = [0, 128], sizes = [8, 128], strides = [1, 1]} : vector<8x512xf32> to vector<8x128xf32>
    %228 = arith.negf %227 : vector<8x128xf32>
    %229 = math.exp %228 : vector<8x128xf32>
    %cst_58 = arith.constant 1.000000e+00 : f32
    %230 = vector.broadcast %cst_58 : f32 to vector<8x128xf32>
    %231 = arith.addf %230, %229 : vector<8x128xf32>
    %232 = arith.divf %230, %231 : vector<8x128xf32>
    %233 = vector.extract_strided_slice %220 {offsets = [0, 256], sizes = [8, 128], strides = [1, 1]} : vector<8x512xf32> to vector<8x128xf32>
    %234 = math.tanh %233 : vector<8x128xf32>
    %235 = vector.extract_strided_slice %220 {offsets = [0, 384], sizes = [8, 128], strides = [1, 1]} : vector<8x512xf32> to vector<8x128xf32>
    %236 = arith.negf %235 : vector<8x128xf32>
    %237 = math.exp %236 : vector<8x128xf32>
    %cst_59 = arith.constant 1.000000e+00 : f32
    %238 = vector.broadcast %cst_59 : f32 to vector<8x128xf32>
    %239 = arith.addf %238, %237 : vector<8x128xf32>
    %240 = arith.divf %238, %239 : vector<8x128xf32>
    %241 = arith.mulf %232, %208 : vector<8x128xf32>
    %242 = arith.mulf %226, %234 : vector<8x128xf32>
    %243 = arith.addf %241, %242 : vector<8x128xf32>
    %244 = math.tanh %243 : vector<8x128xf32>
    %245 = arith.mulf %240, %244 : vector<8x128xf32>
    %246 = arith.truncf %245 : vector<8x128xf32> to vector<8x128xbf16>
    %c0_60 = arith.constant 0 : index
    %247 = arith.index_cast %c6_i32 : i32 to index
    %c0_61 = arith.constant 0 : index
    %248 = vector.load %arg4[%c0_60, %247, %c0_61] : memref<8x8x128xbf16, #tpu.memory_space<vmem>>, vector<8x1x128xbf16>
    %249 = vector.shape_cast %248 : vector<8x1x128xbf16> to vector<8x128xbf16>
    %250 = vector.shape_cast %246 : vector<8x128xbf16> to vector<8x1x128xbf16>
    tpu.vector_store %arg4[%c0_60, %247, %c0_61], %250 {strides = array<i32>} : memref<8x8x128xbf16, #tpu.memory_space<vmem>>, vector<8x1x128xbf16>,
    %c7_i32 = arith.constant 7 : i32
    %c0_62 = arith.constant 0 : index
    %251 = arith.index_cast %c7_i32 : i32 to index
    %c0_63 = arith.constant 0 : index
    %252 = vector.load %arg2[%c0_62, %251, %c0_63] : memref<8x8x512xf32, #tpu.memory_space<vmem>>, vector<8x1x512xf32>
    %253 = vector.shape_cast %252 : vector<8x1x512xf32> to vector<8x512xf32>
    %cst_64 = arith.constant dense<0.000000e+00> : vector<8x512xf32>
    %254 = tpu.matmul %245, %3, %cst_64 {dimension_numbers = #tpu.dot_dimension_numbers<[1], [0], [0], [1], [0, 0, 1, 1], [], []>} : vector<8x128xf32>, vector<128x512xf32>, vector<8x512xf32> -> vector<8x512xf32>
    %255 = arith.addf %253, %254 : vector<8x512xf32>
    %256 = vector.extract_strided_slice %255 {offsets = [0, 0], sizes = [8, 128], strides = [1, 1]} : vector<8x512xf32> to vector<8x128xf32>
    %257 = arith.negf %256 : vector<8x128xf32>
    %258 = math.exp %257 : vector<8x128xf32>
    %cst_65 = arith.constant 1.000000e+00 : f32
    %259 = vector.broadcast %cst_65 : f32 to vector<8x128xf32>
    %260 = arith.addf %259, %258 : vector<8x128xf32>
    %261 = arith.divf %259, %260 : vector<8x128xf32>
    %262 = vector.extract_strided_slice %255 {offsets = [0, 128], sizes = [8, 128], strides = [1, 1]} : vector<8x512xf32> to vector<8x128xf32>
    %263 = arith.negf %262 : vector<8x128xf32>
    %264 = math.exp %263 : vector<8x128xf32>
    %cst_66 = arith.constant 1.000000e+00 : f32
    %265 = vector.broadcast %cst_66 : f32 to vector<8x128xf32>
    %266 = arith.addf %265, %264 : vector<8x128xf32>
    %267 = arith.divf %265, %266 : vector<8x128xf32>
    %268 = vector.extract_strided_slice %255 {offsets = [0, 256], sizes = [8, 128], strides = [1, 1]} : vector<8x512xf32> to vector<8x128xf32>
    %269 = math.tanh %268 : vector<8x128xf32>
    %270 = vector.extract_strided_slice %255 {offsets = [0, 384], sizes = [8, 128], strides = [1, 1]} : vector<8x512xf32> to vector<8x128xf32>
    %271 = arith.negf %270 : vector<8x128xf32>
    %272 = math.exp %271 : vector<8x128xf32>
    %cst_67 = arith.constant 1.000000e+00 : f32
    %273 = vector.broadcast %cst_67 : f32 to vector<8x128xf32>
    %274 = arith.addf %273, %272 : vector<8x128xf32>
    %275 = arith.divf %273, %274 : vector<8x128xf32>
    %276 = arith.mulf %267, %243 : vector<8x128xf32>
    %277 = arith.mulf %261, %269 : vector<8x128xf32>
    %278 = arith.addf %276, %277 : vector<8x128xf32>
    %279 = math.tanh %278 : vector<8x128xf32>
    %280 = arith.mulf %275, %279 : vector<8x128xf32>
    %281 = arith.truncf %280 : vector<8x128xf32> to vector<8x128xbf16>
    %c0_68 = arith.constant 0 : index
    %282 = arith.index_cast %c7_i32 : i32 to index
    %c0_69 = arith.constant 0 : index
    %283 = vector.load %arg4[%c0_68, %282, %c0_69] : memref<8x8x128xbf16, #tpu.memory_space<vmem>>, vector<8x1x128xbf16>
    %284 = vector.shape_cast %283 : vector<8x1x128xbf16> to vector<8x128xbf16>
    %285 = vector.shape_cast %281 : vector<8x128xbf16> to vector<8x1x128xbf16>
    tpu.vector_store %arg4[%c0_68, %282, %c0_69], %285 {strides = array<i32>} : memref<8x8x128xbf16, #tpu.memory_space<vmem>>, vector<8x1x128xbf16>,
    %c8_i32 = arith.constant 8 : i32
    %c0_70 = arith.constant 0 : index
    %c0_71 = arith.constant 0 : index
    %286 = vector.load %arg5[%c0_70, %c0_71] : memref<8x128xf32, #tpu.memory_space<vmem>>, vector<8x128xf32>
    tpu.vector_store %arg5[%c0_70, %c0_71], %280 {strides = array<i32>} : memref<8x128xf32, #tpu.memory_space<vmem>>, vector<8x128xf32>,
    %c0_72 = arith.constant 0 : index
    %c0_73 = arith.constant 0 : index
    %287 = vector.load %arg6[%c0_72, %c0_73] : memref<8x128xf32, #tpu.memory_space<vmem>>, vector<8x128xf32>
    tpu.vector_store %arg6[%c0_72, %c0_73], %278 {strides = array<i32>} : memref<8x128xf32, #tpu.memory_space<vmem>>, vector<8x128xf32>,
    return
  }
  func.func @transform_0(%arg0: i32, %arg1: i32) -> (i32, i32, i32) {
    %c0_i32 = arith.constant 0 : i32
    %c0_i32_0 = arith.constant 0 : i32
    return %arg0, %arg1, %c0_i32 : i32, i32, i32
  }
  func.func @transform_1(%arg0: i32, %arg1: i32) -> (i32, i32) {
    %c0_i32 = arith.constant 0 : i32
    %c0_i32_0 = arith.constant 0 : i32
    %c0_i32_1 = arith.constant 0 : i32
    return %c0_i32, %c0_i32_0 : i32, i32
  }
  func.func @transform_2(%arg0: i32, %arg1: i32) -> (i32, i32, i32) {
    %c0_i32 = arith.constant 0 : i32
    %c0_i32_0 = arith.constant 0 : i32
    return %arg0, %arg1, %c0_i32 : i32, i32, i32
  }
}

</mosaic_0001>

<bundles_post_ra>
// kernel: decoder_rnn_forward.5
= control target key start
LH: loop header
LB: loop body
LE: loop exit
PB: predicated region body
PF: predicated region fallthrough
CT: control target
= control target key end

     0   :  { %s387_s1 = inlined_call_operand.vmem [shape: f32[128,128], index: 1, kind: input, shape index: {}]   ;;  %s388_s0 = inlined_call_operand.vmem [shape: bf16[64,128], index: 0, kind: input, shape index: {}]   ;;  %s389_s2 = inlined_call_operand.vmem [shape: f32[1,128], index: 2, kind: input, shape index: {}]   ;;  %s390_s3 = inlined_call_operand.vmem [shape: f32[64,128], index: 3, kind: output, shape index: {}]  }
   0x1   :  { %v38_v0 = vld [vmem:[%s387_s1 + $0x78] sm:$0xff]  ;;  %v37_v1 = vld [vmem:[%s387_s1 + $0x70] sm:$0xff]  ;;  %v36_v2 = vld [vmem:[%s387_s1 + $0x68] sm:$0xff] }
   0x2   :  { %204 = vmatprep.subr.mxu0 %v38_v0  ;;  %244 = vmatprep.subr.mxu1 %v38_v0  ;;  %v35_v3 = vld [vmem:[%s387_s1 + $0x60] sm:$0xff]  ;;  %v34_v4 = vld [vmem:[%s387_s1 + $0x58] sm:$0xff]  ;;  %v33_v5 = vld [vmem:[%s387_s1 + $0x50] sm:$0xff] }
   0x3   :  { %205 = vmatpush3.msra.mxu0 %v38_v0  ;;  %260 = vmatpush3.msra.mxu1 %v38_v0  ;;  %v32_v6 = vld [vmem:[%s387_s1 + $0x48] sm:$0xff]  ;;  %v31_v7 = vld [vmem:[%s387_s1 + $0x40] sm:$0xff]  ;;  %v30_v8 = vld [vmem:[%s387_s1 + $0x38] sm:$0xff] }
   0x4   :  { %206 = vmatprep.subr.mxu0 %v37_v1  ;;  %245 = vmatprep.subr.mxu1 %v37_v1  ;;  %v29_v9 = vld [vmem:[%s387_s1 + $0x30] sm:$0xff]  ;;  %v28_v10 = vld [vmem:[%s387_s1 + $0x28] sm:$0xff]  ;;  %v27_v11 = vld [vmem:[%s387_s1 + $0x20] sm:$0xff] }
   0x5   :  { %207 = vmatpush3.msra.mxu0 %v37_v1  ;;  %261 = vmatpush3.msra.mxu1 %v37_v1  ;;  %v26_v12 = vld [vmem:[%s387_s1 + $0x18] sm:$0xff]  ;;  %v25_v13 = vld [vmem:[%s387_s1 + $0x10] sm:$0xff]  ;;  %v24_v14 = vld [vmem:[%s387_s1 + $0x8] sm:$0xff] }
   0x6   :  { %208 = vmatprep.subr.mxu0 %v36_v2  ;;  %246 = vmatprep.subr.mxu1 %v36_v2  ;;  %v23_v15 = vld [vmem:[%s387_s1] sm:$0xff]  ;;  %v277_v17 = vld [vmem:[%s388_s0 + $0x10] sm:$0xff]   ;;  %v278_v18 = vld [vmem:[%s388_s0 + $0x8] sm:$0xff]  }
   0x7   :  { %209 = vmatpush3.msra.mxu0 %v36_v2  ;;  %262 = vmatpush3.msra.mxu1 %v36_v2  ;;  %v276_v16 = vld [vmem:[%s388_s0] sm:$0xff]   ;;  %v279_v19 = vld [vmem:[%s388_s0 + $0x18] sm:$0xff]  }
   0x8   :  { %210 = vmatprep.subr.mxu0 %v35_v3  ;;  %247 = vmatprep.subr.mxu1 %v35_v3  ;;  %v179_v20 = vld [vmem:[%s389_s2] ss:$0 sm:$0xff] }
   0x9   :  { %211 = vmatpush3.msra.mxu0 %v35_v3  ;;  %263 = vmatpush3.msra.mxu1 %v35_v3 }
   0xa   :  { %212 = vmatprep.subr.mxu0 %v34_v4  ;;  %248 = vmatprep.subr.mxu1 %v34_v4 }
   0xb   :  { %213 = vmatpush3.msra.mxu0 %v34_v4  ;;  %264 = vmatpush3.msra.mxu1 %v34_v4 }
   0xc   :  { %214 = vmatprep.subr.mxu0 %v33_v5  ;;  %249 = vmatprep.subr.mxu1 %v33_v5 }
   0xd   :  { %215 = vmatpush3.msra.mxu0 %v33_v5  ;;  %265 = vmatpush3.msra.mxu1 %v33_v5 }
   0xe   :  { %216 = vmatprep.subr.mxu0 %v32_v6  ;;  %250 = vmatprep.subr.mxu1 %v32_v6 }
   0xf   :  { %217 = vmatpush3.msra.mxu0 %v32_v6  ;;  %266 = vmatpush3.msra.mxu1 %v32_v6 }
  0x10   :  { %218 = vmatprep.subr.mxu0 %v31_v7  ;;  %251 = vmatprep.subr.mxu1 %v31_v7 }
  0x11   :  { %219 = vmatpush3.msra.mxu0 %v31_v7  ;;  %267 = vmatpush3.msra.mxu1 %v31_v7 }
  0x12   :  { %220 = vmatprep.subr.mxu0 %v30_v8  ;;  %252 = vmatprep.subr.mxu1 %v30_v8 }
  0x13   :  { %221 = vmatpush3.msra.mxu0 %v30_v8  ;;  %268 = vmatpush3.msra.mxu1 %v30_v8 }
  0x14   :  { %222 = vmatprep.subr.mxu0 %v29_v9  ;;  %253 = vmatprep.subr.mxu1 %v29_v9 }
  0x15   :  { %223 = vmatpush3.msra.mxu0 %v29_v9  ;;  %269 = vmatpush3.msra.mxu1 %v29_v9 }
  0x16   :  { %224 = vmatprep.subr.mxu0 %v28_v10  ;;  %254 = vmatprep.subr.mxu1 %v28_v10 }
  0x17   :  { %225 = vmatpush3.msra.mxu0 %v28_v10  ;;  %270 = vmatpush3.msra.mxu1 %v28_v10 }
  0x18   :  { %226 = vmatprep.subr.mxu0 %v27_v11  ;;  %255 = vmatprep.subr.mxu1 %v27_v11 }
  0x19   :  { %227 = vmatpush3.msra.mxu0 %v27_v11  ;;  %271 = vmatpush3.msra.mxu1 %v27_v11 }
  0x1a   :  { %228 = vmatprep.subr.mxu0 %v26_v12  ;;  %256 = vmatprep.subr.mxu1 %v26_v12 }
  0x1b   :  { %229 = vmatpush3.msra.mxu0 %v26_v12  ;;  %272 = vmatpush3.msra.mxu1 %v26_v12 }
  0x1c   :  { %230 = vmatprep.subr.mxu0 %v25_v13  ;;  %257 = vmatprep.subr.mxu1 %v25_v13 }
  0x1d   :  { %231 = vmatpush3.msra.mxu0 %v25_v13  ;;  %273 = vmatpush3.msra.mxu1 %v25_v13 }
  0x1e   :  { %232 = vmatprep.subr.mxu0 %v24_v14  ;;  %258 = vmatprep.subr.mxu1 %v24_v14 }
  0x1f   :  { %233 = vmatpush3.msra.mxu0 %v24_v14  ;;  %274 = vmatpush3.msra.mxu1 %v24_v14 }
  0x20   :  { %234 = vmatprep.subr.mxu0 %v23_v15  ;;  %259 = vmatprep.subr.mxu1 %v23_v15 }
  0x21   :  { %235 = vmatpush3.msra.mxu0 %v23_v15  ;;  %275 = vmatpush3.msra.mxu1 %v23_v15 }
  0x22   :  { %236 = vmatprep.mubr.bf16.mxu0 %v276_v16  ;;  %240 = vmatprep.mubr.bf16.mxu1 %v277_v17 }
  0x23   :  { %237 = vmatmul.mubr.bf16.vlgmr.msra.gmra.mxu0 %v278_v18  ;;  %241 = vmatmul.mubr.bf16.vlgmr.msra.gmra.mxu1 %v279_v19 }
  0xe3   :  { %v238_v21 = vpop.f32.mrf.mxu0  ;;  %v242_v22 = vpop.f32.mrf.mxu1 }
  0xe4   :  { %v145_v23 = vadd.f32 %v238_v21, %v179_v20  ;;  %v161_v24 = vadd.f32 %v242_v22, %v179_v20 }
  0xe5   :  { %v136_v25 = vpop.f32.mrf.mxu0  ;;  %v152_v26 = vpop.f32.mrf.mxu1 }
  0xe6   :  { %169 = vst [vmem:[%s390_s3 + $0x10] sm:$0xff] %v145_v23  ;;  %173 = vst [vmem:[%s390_s3 + $0x30] sm:$0xff] %v161_v24  ;;  %v137_v27 = vadd.f32 %v179_v20, %v136_v25  ;;  %v153_v28 = vadd.f32 %v179_v20, %v152_v26 }
  0xe7   :  { %v239_v29 = vpop.f32.mrf.mxu0  ;;  %v243_v30 = vpop.f32.mrf.mxu1 }
  0xe8   :  { %167 = vst [vmem:[%s390_s3] sm:$0xff] %v137_v27  ;;  %171 = vst [vmem:[%s390_s3 + $0x20] sm:$0xff] %v153_v28  ;;  %v148_v31 = vadd.f32 %v239_v29, %v179_v20  ;;  %v164_v32 = vadd.f32 %v243_v30, %v179_v20 }
  0xe9   :  { %v139_v33 = vpop.f32.mrf.mxu0  ;;  %v155_v34 = vpop.f32.mrf.mxu1 }
  0xea   :  { %170 = vst [vmem:[%s390_s3 + $0x18] sm:$0xff] %v148_v31  ;;  %174 = vst [vmem:[%s390_s3 + $0x38] sm:$0xff] %v164_v32  ;;  %v140_v35 = vadd.f32 %v179_v20, %v139_v33  ;;  %v156_v36 = vadd.f32 %v179_v20, %v155_v34 }
  0xec   :  { %168 = vst [vmem:[%s390_s3 + $0x8] sm:$0xff] %v140_v35  ;;  %172 = vst [vmem:[%s390_s3 + $0x28] sm:$0xff] %v156_v36 }

// kernel: decoder_rnn_forward.3
= control target key start
LH: loop header
LB: loop body
LE: loop exit
PB: predicated region body
PF: predicated region fallthrough
CT: control target
= control target key end

     0   :  { %8 = vsyncpa [#allocation3], 0  ;;  %s639_s0 = inlined_call_operand.vmem [shape: f32[64,16], index: 0, kind: input, shape index: {}]   ;;  %s640_s1 = inlined_call_operand.hbm [shape: f32[16,512], index: 1, kind: input, shape index: {}]   ;;  %s641_s2 = inlined_call_operand.hbm [shape: f32[1,512], index: 2, kind: input, shape index: {}]   ;;  %s642_s3 = inlined_call_operand.vmem [shape: f32[64,512], index: 3, kind: output, shape index: {}]  }
   0x1   :  { %9 = vsyncpa [#allocation5], 0  ;;  %s432_s12 = smov [#allocation2]  }
   0x2   :  { %s17_s13 = sshll.u32 %s432_s12, 4  ;;  %s18_s13 = int_to_ptr.vmem [resolvable:$true] %s17_s13 }
   0x3   :  { %s396_s14 = scalar_lea.vmem %s18_s13, 1024  ;;  %p401_p1 = scmp.lt.s32.totalorder %s18_s13, %s18_s13 }
   0x4   :  { %p397_p0 = scmp.ne.s32.totalorder %s18_s13, %s396_s14  ;;  %p402_p2 = scmp.lt.s32.totalorder %s396_s14, %s396_s14 }
   0x6   :  { %p403_p3 = por %p402_p2, %p401_p1 }
   0x8   :  { %p404_p4 = pnand %p403_p3, %p397_p0 }
   0xa   :  { %407 = shalt.err (!%p404_p4)
}
   0xb   :  { %s433_s15 = smov 512   ;;  %s434_s16 = smov 32  }
   0xc   :  { %23 = dma.hbm_to_vmem [thread:$0]  %s640_s1, 1024, %s18_s13, [#allocation3], %s433_s15, %s433_s15, %s434_s16  }
   0xd   :  { %s435_s19 = smov [#allocation4]  }
   0xe   :  { %s30_s20 = sshll.u32 %s435_s19, 4  ;;  %s31_s20 = int_to_ptr.vmem [resolvable:$true] %s30_s20 }
   0xf   :  { %s416_s21 = scalar_lea.vmem %s31_s20, 64  ;;  %p421_p6 = scmp.lt.s32.totalorder %s31_s20, %s31_s20 }
  0x10   :  { %p417_p5 = scmp.ne.s32.totalorder %s31_s20, %s416_s21  ;;  %p422_p7 = scmp.lt.s32.totalorder %s416_s21, %s416_s21 }
  0x12   :  { %p423_p8 = por %p422_p7, %p421_p6 }
  0x14   :  { %p424_p9 = pnand %p423_p8, %p417_p5 }
  0x16   :  { %427 = shalt.err (!%p424_p9)
}
  0x17   :  { %33 = dma.hbm_to_vmem [thread:$0]  %s641_s2, 64, %s31_s20, [#allocation5]  }
  0x18   :  { %428 = dma.done.wait [#allocation3], 1024  }
  0x19   :  { %429 = vsyncadd [#allocation3], 4294966272 }
  0x1a   :  { %430 = dma.done.wait [#allocation5], 64  }
  0x1b   :  { %431 = vsyncadd [#allocation5], 4294967232  ;;  %v436_v0 = vmov 0.0   ;;  %v53_v1 = vld [vmem:[#allocation2 + $0x28] sm:$0xff]  ;;  %v55_v2 = vld [vmem:[#allocation2 + $0x38] sm:$0xff]  ;;  %vm78_vm0 = vcmask 130048   ;;  %v58_v17 = vlaneseq }
  0x1c   :  { %167 = vmatprep.mubr.f32.mxu0 %v436_v0  ;;  %280 = vmatprep.mubr.f32.mxu1 %v436_v0  ;;  %v52_v3 = vld [vmem:[#allocation2 + $0x20] sm:$0xff]  ;;  %v54_v4 = vld [vmem:[#allocation2 + $0x30] sm:$0xff]  ;;  %v49_v5 = vld [vmem:[#allocation2 + $0x8] sm:$0xff] }
  0x1d   :  { %131 = vmatprep.subr.mxu0 %v53_v1  ;;  %244 = vmatprep.subr.mxu1 %v55_v2  ;;  %v51_v6 = vld [vmem:[#allocation2 + $0x18] sm:$0xff]  ;;  %v48_v7 = vld [vmem:[#allocation2] sm:$0xff]  ;;  %v50_v8 = vld [vmem:[#allocation2 + $0x10] sm:$0xff]  ;;  %v59_v18 = vshrl.u32 %v58_v17, 7 }
  0x1e   :  { %132 = vmatpush1.msra.mxu0 %v52_v3  ;;  %245 = vmatpush1.msra.mxu1 %v54_v4  ;;  %v40_v9 = vld [vmem:[%s639_s0] sm:$0xff]  ;;  %v41_v10 = vld [vmem:[%s639_s0 + $0x8] sm:$0xff]  ;;  %v42_v11 = vld [vmem:[%s639_s0 + $0x10] sm:$0xff] }
  0x1f   :  { %133 = vmatprep.subr.mxu0 %v49_v5  ;;  %246 = vmatprep.subr.mxu1 %v51_v6  ;;  %v43_v12 = vld [vmem:[%s639_s0 + $0x18] sm:$0xff]  ;;  %v44_v13 = vld [vmem:[%s639_s0 + $0x20] sm:$0xff]  ;;  %v45_v14 = vld [vmem:[%s639_s0 + $0x28] sm:$0xff]  ;;  %v60_v19 = vsub.s32 0, %v59_v18  ;;  %v68_v20 = vsub.s32 2, %v59_v18  ;;  %v64_v22 = vsub.s32 1, %v59_v18 }
  0x20   :  { %134 = vmatpush1.msra.mxu0 %v48_v7  ;;  %247 = vmatpush1.msra.mxu1 %v50_v8  ;;  %v46_v15 = vld [vmem:[%s639_s0 + $0x30] sm:$0xff]  ;;  %v47_v16 = vld [vmem:[%s639_s0 + $0x38] sm:$0xff]  ;;  %v56_v21 = vld [vmem:[#allocation4] sm:$0xf]  ;;  %v72_v23 = vsub.s32 3, %v59_v18 }
  0x21   :  { %367 = vmatmul.mubr.msk.f32.vlgmr.msra.gmra.mxu0 %vm78_vm0, %v40_v9  ;;  %375 = vmatmul.mubr.msk.f32.vlgmr.msra.gmra.mxu1 %vm78_vm0, %v40_v9  ;;  %v503_v24 = vrot.slane %v56_v21, %v60_v19  ;;  %v505_v25 = vrot.slane %v56_v21, %v68_v20  ;;  %v507_v26 = vrot.slane %v56_v21, %v64_v22 }
  0x22   :  { %173 = vmatprep.mubr.f32.mxu0 %v436_v0  ;;  %286 = vmatprep.mubr.f32.mxu1 %v436_v0  ;;  %v509_v27 = vrot.slane %v56_v21, %v72_v23 }
  0x25   :  { %368 = vmatmul.mubr.msk.f32.gmra.mxu0 %vm78_vm0, %v41_v10  ;;  %376 = vmatmul.mubr.msk.f32.gmra.mxu1 %vm78_vm0, %v41_v10 }
  0x26   :  { %179 = vmatprep.mubr.f32.mxu0 %v436_v0  ;;  %292 = vmatprep.mubr.f32.mxu1 %v436_v0 }
  0x29   :  { %369 = vmatmul.mubr.msk.f32.gmra.mxu0 %vm78_vm0, %v42_v11  ;;  %377 = vmatmul.mubr.msk.f32.gmra.mxu1 %vm78_vm0, %v42_v11 }
  0x2a   :  { %185 = vmatprep.mubr.f32.mxu0 %v436_v0  ;;  %298 = vmatprep.mubr.f32.mxu1 %v436_v0 }
  0x2d   :  { %370 = vmatmul.mubr.msk.f32.gmra.mxu0 %vm78_vm0, %v43_v12  ;;  %378 = vmatmul.mubr.msk.f32.gmra.mxu1 %vm78_vm0, %v43_v12 }
  0x2e   :  { %191 = vmatprep.mubr.f32.mxu0 %v436_v0  ;;  %304 = vmatprep.mubr.f32.mxu1 %v436_v0 }
  0x31   :  { %371 = vmatmul.mubr.msk.f32.gmra.mxu0 %vm78_vm0, %v44_v13  ;;  %379 = vmatmul.mubr.msk.f32.gmra.mxu1 %vm78_vm0, %v44_v13 }
  0x32   :  { %197 = vmatprep.mubr.f32.mxu0 %v436_v0  ;;  %310 = vmatprep.mubr.f32.mxu1 %v436_v0 }
  0x35   :  { %372 = vmatmul.mubr.msk.f32.gmra.mxu0 %vm78_vm0, %v45_v14  ;;  %380 = vmatmul.mubr.msk.f32.gmra.mxu1 %vm78_vm0, %v45_v14 }
  0x36   :  { %203 = vmatprep.mubr.f32.mxu0 %v436_v0  ;;  %316 = vmatprep.mubr.f32.mxu1 %v436_v0 }
  0x39   :  { %373 = vmatmul.mubr.msk.f32.gmra.mxu0 %vm78_vm0, %v46_v15  ;;  %381 = vmatmul.mubr.msk.f32.gmra.mxu1 %vm78_vm0, %v46_v15 }
  0x3a   :  { %209 = vmatprep.mubr.f32.mxu0 %v436_v0  ;;  %322 = vmatprep.mubr.f32.mxu1 %v436_v0 }
  0x3d   :  { %374 = vmatmul.mubr.msk.f32.gmra.mxu0 %vm78_vm0, %v47_v16  ;;  %382 = vmatmul.mubr.msk.f32.gmra.mxu1 %vm78_vm0, %v47_v16 }
  0xe1   :  { %v169_v28 = vpop.f32.mrf.mxu0  ;;  %v282_v29 = vpop.f32.mrf.mxu1 }
  0xe2   :  { %v170_v30 = vadd.f32 %v169_v28, %v503_v24  ;;  %v283_v31 = vadd.f32 %v282_v29, %v505_v25 }
  0xe3   :  { %v171_v32 = vpop.f32.mrf.mxu0  ;;  %v284_v33 = vpop.f32.mrf.mxu1 }
  0xe4   :  { %329 = vst [vmem:[%s642_s3] sm:$0xff] %v170_v30  ;;  %331 = vst [vmem:[%s642_s3 + $0x10] sm:$0xff] %v283_v31  ;;  %v172_v34 = vadd.f32 %v171_v32, %v507_v26  ;;  %v285_v35 = vadd.f32 %v284_v33, %v509_v27 }
  0xe5   :  { %v175_v36 = vpop.f32.mrf.mxu0  ;;  %v288_v37 = vpop.f32.mrf.mxu1 }
  0xe6   :  { %330 = vst [vmem:[%s642_s3 + $0x8] sm:$0xff] %v172_v34  ;;  %332 = vst [vmem:[%s642_s3 + $0x18] sm:$0xff] %v285_v35  ;;  %v176_v38 = vadd.f32 %v175_v36, %v503_v24  ;;  %v289_v39 = vadd.f32 %v288_v37, %v505_v25 }
  0xe7   :  { %v177_v40 = vpop.f32.mrf.mxu0  ;;  %v290_v41 = vpop.f32.mrf.mxu1 }
  0xe8   :  { %333 = vst [vmem:[%s642_s3 + $0x20] sm:$0xff] %v176_v38  ;;  %335 = vst [vmem:[%s642_s3 + $0x30] sm:$0xff] %v289_v39  ;;  %v178_v42 = vadd.f32 %v177_v40, %v507_v26  ;;  %v291_v43 = vadd.f32 %v290_v41, %v509_v27 }
  0xe9   :  { %v181_v44 = vpop.f32.mrf.mxu0  ;;  %v294_v45 = vpop.f32.mrf.mxu1 }
  0xea   :  { %334 = vst [vmem:[%s642_s3 + $0x28] sm:$0xff] %v178_v42  ;;  %336 = vst [vmem:[%s642_s3 + $0x38] sm:$0xff] %v291_v43  ;;  %v182_v46 = vadd.f32 %v181_v44, %v503_v24  ;;  %v295_v47 = vadd.f32 %v294_v45, %v505_v25 }
  0xeb   :  { %v183_v48 = vpop.f32.mrf.mxu0  ;;  %v296_v49 = vpop.f32.mrf.mxu1 }
  0xec   :  { %337 = vst [vmem:[%s642_s3 + $0x40] sm:$0xff] %v182_v46  ;;  %339 = vst [vmem:[%s642_s3 + $0x50] sm:$0xff] %v295_v47  ;;  %v184_v50 = vadd.f32 %v183_v48, %v507_v26  ;;  %v297_v51 = vadd.f32 %v296_v49, %v509_v27 }
  0xed   :  { %v187_v52 = vpop.f32.mrf.mxu0  ;;  %v300_v53 = vpop.f32.mrf.mxu1 }
  0xee   :  { %338 = vst [vmem:[%s642_s3 + $0x48] sm:$0xff] %v184_v50  ;;  %340 = vst [vmem:[%s642_s3 + $0x58] sm:$0xff] %v297_v51  ;;  %v188_v54 = vadd.f32 %v187_v52, %v503_v24  ;;  %v301_v55 = vadd.f32 %v300_v53, %v505_v25 }
  0xef   :  { %v189_v56 = vpop.f32.mrf.mxu0  ;;  %v302_v57 = vpop.f32.mrf.mxu1 }
  0xf0   :  { %341 = vst [vmem:[%s642_s3 + $0x60] sm:$0xff] %v188_v54  ;;  %343 = vst [vmem:[%s642_s3 + $0x70] sm:$0xff] %v301_v55  ;;  %v190_v58 = vadd.f32 %v189_v56, %v507_v26  ;;  %v303_v59 = vadd.f32 %v302_v57, %v509_v27 }
  0xf1   :  { %v193_v60 = vpop.f32.mrf.mxu0  ;;  %v306_v61 = vpop.f32.mrf.mxu1 }
  0xf2   :  { %342 = vst [vmem:[%s642_s3 + $0x68] sm:$0xff] %v190_v58  ;;  %344 = vst [vmem:[%s642_s3 + $0x78] sm:$0xff] %v303_v59  ;;  %v194_v62 = vadd.f32 %v193_v60, %v503_v24  ;;  %v307_v63 = vadd.f32 %v306_v61, %v505_v25 }
  0xf3   :  { %v195_v0 = vpop.f32.mrf.mxu0  ;;  %v308_v1 = vpop.f32.mrf.mxu1 }
  0xf4   :  { %345 = vst [vmem:[%s642_s3 + $0x80] sm:$0xff] %v194_v62  ;;  %347 = vst [vmem:[%s642_s3 + $0x90] sm:$0xff] %v307_v63  ;;  %v196_v2 = vadd.f32 %v195_v0, %v507_v26  ;;  %v309_v3 = vadd.f32 %v308_v1, %v509_v27 }
  0xf5   :  { %v199_v4 = vpop.f32.mrf.mxu0  ;;  %v312_v5 = vpop.f32.mrf.mxu1 }
  0xf6   :  { %346 = vst [vmem:[%s642_s3 + $0x88] sm:$0xff] %v196_v2  ;;  %348 = vst [vmem:[%s642_s3 + $0x98] sm:$0xff] %v309_v3  ;;  %v200_v6 = vadd.f32 %v199_v4, %v503_v24  ;;  %v313_v7 = vadd.f32 %v312_v5, %v505_v25 }
  0xf7   :  { %v201_v8 = vpop.f32.mrf.mxu0  ;;  %v314_v9 = vpop.f32.mrf.mxu1 }
  0xf8   :  { %349 = vst [vmem:[%s642_s3 + $0xa0] sm:$0xff] %v200_v6  ;;  %351 = vst [vmem:[%s642_s3 + $0xb0] sm:$0xff] %v313_v7  ;;  %v202_v10 = vadd.f32 %v201_v8, %v507_v26  ;;  %v315_v11 = vadd.f32 %v314_v9, %v509_v27 }
  0xf9   :  { %v205_v12 = vpop.f32.mrf.mxu0  ;;  %v318_v13 = vpop.f32.mrf.mxu1 }
  0xfa   :  { %350 = vst [vmem:[%s642_s3 + $0xa8] sm:$0xff] %v202_v10  ;;  %352 = vst [vmem:[%s642_s3 + $0xb8] sm:$0xff] %v315_v11  ;;  %v206_v14 = vadd.f32 %v205_v12, %v503_v24  ;;  %v319_v15 = vadd.f32 %v318_v13, %v505_v25 }
  0xfb   :  { %v207_v16 = vpop.f32.mrf.mxu0  ;;  %v320_v17 = vpop.f32.mrf.mxu1 }
  0xfc   :  { %353 = vst [vmem:[%s642_s3 + $0xc0] sm:$0xff] %v206_v14  ;;  %355 = vst [vmem:[%s642_s3 + $0xd0] sm:$0xff] %v319_v15  ;;  %v208_v18 = vadd.f32 %v207_v16, %v507_v26  ;;  %v321_v19 = vadd.f32 %v320_v17, %v509_v27 }
  0xfd   :  { %v211_v20 = vpop.f32.mrf.mxu0  ;;  %v324_v21 = vpop.f32.mrf.mxu1 }
  0xfe   :  { %354 = vst [vmem:[%s642_s3 + $0xc8] sm:$0xff] %v208_v18  ;;  %356 = vst [vmem:[%s642_s3 + $0xd8] sm:$0xff] %v321_v19  ;;  %v212_v22 = vadd.f32 %v211_v20, %v503_v24  ;;  %v325_v23 = vadd.f32 %v324_v21, %v505_v25 }
  0xff   :  { %v213_v28 = vpop.f32.mrf.mxu0  ;;  %v326_v29 = vpop.f32.mrf.mxu1 }
 0x100   :  { %357 = vst [vmem:[%s642_s3 + $0xe0] sm:$0xff] %v212_v22  ;;  %359 = vst [vmem:[%s642_s3 + $0xf0] sm:$0xff] %v325_v23  ;;  %v214_v30 = vadd.f32 %v213_v28, %v507_v26  ;;  %v327_v31 = vadd.f32 %v326_v29, %v509_v27 }
 0x102   :  { %358 = vst [vmem:[%s642_s3 + $0xe8] sm:$0xff] %v214_v30  ;;  %360 = vst [vmem:[%s642_s3 + $0xf8] sm:$0xff] %v327_v31 }
 0x103   :  { %365 = vsyncpa [#allocation3], 1 }
 0x104   :  { %366 = vsyncpa [#allocation5], 1 }

// kernel: decoder_rnn_forward.4
= control target key start
LH: loop header
LB: loop body
LE: loop exit
PB: predicated region body
PF: predicated region fallthrough
CT: control target
= control target key end

     0   :  { %v10184_v3 = vmov 0.0   ;;  %vm642_vm0 = vcmask 1040384   ;;  %vm643_vm1 = vsmask.f32 256  ;;  %vm1285_vm3 = vsmask.f32 7938  ;;  %s10181_s1 = inlined_call_operand.vmem [shape: f32[128,512], index: 1, kind: input, shape index: {}]   ;;  %s10182_s0 = inlined_call_operand.vmem [shape: f32[8,8,512], index: 0, kind: input, shape index: {}]   ;;  %s10183_s2 = inlined_call_operand.vmem [shape: bf16[8,8,128], index: 2, kind: output, shape index: {}]  }
   0x1   :  { %v6869_v0 = vld [vmem:[%s10181_s1 + $0x1e8] sm:$0xff]  ;;  %v6874_v1 = vld [vmem:[%s10181_s1 + $0x1f8] sm:$0xff]  ;;  %v6879_v2 = vld [vmem:[%s10181_s1 + $0x1e0] sm:$0xff]  ;;  %162 = vmatprep.mubr.f32.mxu0 %v10184_v3  ;;  %233 = vmatprep.mubr.f32.mxu1 %v10184_v3  ;;  %vm1911_vm5 = vcmask 1041409   ;;  %vm1912_vm6 = vsmask.f32 1280 }
   0x2   :  { %98 = vmatprep.subr.mxu0 %v6869_v0  ;;  %169 = vmatprep.subr.mxu1 %v6874_v1  ;;  %v6888_v4 = vld [vmem:[%s10181_s1 + $0x1f0] sm:$0xff]  ;;  %v6893_v5 = vld [vmem:[%s10181_s1 + $0x1c8] sm:$0xff]  ;;  %v6898_v6 = vld [vmem:[%s10181_s1 + $0x1d8] sm:$0xff]  ;;  %vm2562_vm8 = vsmask.f32 7942  ;;  %vm3188_vm10 = vcmask 1042434  }
   0x3   :  { %99 = vmatpush1.msra.mxu0 %v6879_v2  ;;  %170 = vmatpush1.msra.mxu1 %v6888_v4  ;;  %v6905_v7 = vld [vmem:[%s10181_s1 + $0x1c0] sm:$0xff]  ;;  %v6910_v8 = vld [vmem:[%s10181_s1 + $0x1d0] sm:$0xff]  ;;  %v6915_v9 = vld [vmem:[%s10181_s1 + $0x1a8] sm:$0xff]  ;;  %vm3189_vm11 = vsmask.f32 2304  ;;  %vm4465_vm15 = vcmask 1043459  }
   0x4   :  { %100 = vmatprep.subr.mxu0 %v6893_v5  ;;  %171 = vmatprep.subr.mxu1 %v6898_v6  ;;  %v6922_v10 = vld [vmem:[%s10181_s1 + $0x1b8] sm:$0xff]  ;;  %v6927_v11 = vld [vmem:[%s10181_s1 + $0x1a0] sm:$0xff]  ;;  %v6932_v12 = vld [vmem:[%s10181_s1 + $0x1b0] sm:$0xff]  ;;  %vm3839_vm13 = vsmask.f32 7946 }
   0x5   :  { %101 = vmatpush1.msra.mxu0 %v6905_v7  ;;  %172 = vmatpush1.msra.mxu1 %v6910_v8  ;;  %v6939_v13 = vld [vmem:[%s10181_s1 + $0x188] sm:$0xff]  ;;  %v6944_v14 = vld [vmem:[%s10181_s1 + $0x198] sm:$0xff]  ;;  %v6951_v15 = vld [vmem:[%s10181_s1 + $0x180] sm:$0xff] }
   0x6   :  { %102 = vmatprep.subr.mxu0 %v6915_v9  ;;  %173 = vmatprep.subr.mxu1 %v6922_v10  ;;  %v6956_v16 = vld [vmem:[%s10181_s1 + $0x190] sm:$0xff]  ;;  %v6963_v17 = vld [vmem:[%s10181_s1 + $0x168] sm:$0xff]  ;;  %v6968_v18 = vld [vmem:[%s10181_s1 + $0x178] sm:$0xff] }
   0x7   :  { %103 = vmatpush1.msra.mxu0 %v6927_v11  ;;  %174 = vmatpush1.msra.mxu1 %v6932_v12  ;;  %v6975_v19 = vld [vmem:[%s10181_s1 + $0x160] sm:$0xff]  ;;  %v6980_v20 = vld [vmem:[%s10181_s1 + $0x170] sm:$0xff]  ;;  %v6987_v21 = vld [vmem:[%s10181_s1 + $0x148] sm:$0xff] }
   0x8   :  { %104 = vmatprep.subr.mxu0 %v6939_v13  ;;  %175 = vmatprep.subr.mxu1 %v6944_v14  ;;  %v6992_v22 = vld [vmem:[%s10181_s1 + $0x158] sm:$0xff]  ;;  %v6999_v23 = vld [vmem:[%s10181_s1 + $0x140] sm:$0xff]  ;;  %v7004_v24 = vld [vmem:[%s10181_s1 + $0x150] sm:$0xff] }
   0x9   :  { %105 = vmatpush1.msra.mxu0 %v6951_v15  ;;  %176 = vmatpush1.msra.mxu1 %v6956_v16  ;;  %v7011_v25 = vld [vmem:[%s10181_s1 + $0x128] sm:$0xff]  ;;  %v7016_v26 = vld [vmem:[%s10181_s1 + $0x138] sm:$0xff]  ;;  %v7023_v27 = vld [vmem:[%s10181_s1 + $0x120] sm:$0xff] }
   0xa   :  { %106 = vmatprep.subr.mxu0 %v6963_v17  ;;  %177 = vmatprep.subr.mxu1 %v6968_v18  ;;  %v7028_v28 = vld [vmem:[%s10181_s1 + $0x130] sm:$0xff]  ;;  %v7035_v29 = vld [vmem:[%s10181_s1 + $0x108] sm:$0xff]  ;;  %v7040_v30 = vld [vmem:[%s10181_s1 + $0x118] sm:$0xff] }
   0xb   :  { %107 = vmatpush1.msra.mxu0 %v6975_v19  ;;  %178 = vmatpush1.msra.mxu1 %v6980_v20  ;;  %v7047_v31 = vld [vmem:[%s10181_s1 + $0x100] sm:$0xff]  ;;  %v7052_v32 = vld [vmem:[%s10181_s1 + $0x110] sm:$0xff]  ;;  %v7059_v33 = vld [vmem:[%s10181_s1 + $0xe8] sm:$0xff] }
   0xc   :  { %108 = vmatprep.subr.mxu0 %v6987_v21  ;;  %179 = vmatprep.subr.mxu1 %v6992_v22  ;;  %v7064_v34 = vld [vmem:[%s10181_s1 + $0xf8] sm:$0xff]  ;;  %v7071_v35 = vld [vmem:[%s10181_s1 + $0xe0] sm:$0xff]  ;;  %v7076_v36 = vld [vmem:[%s10181_s1 + $0xf0] sm:$0xff] }
   0xd   :  { %109 = vmatpush1.msra.mxu0 %v6999_v23  ;;  %180 = vmatpush1.msra.mxu1 %v7004_v24  ;;  %v7083_v37 = vld [vmem:[%s10181_s1 + $0xc8] sm:$0xff]  ;;  %v7088_v38 = vld [vmem:[%s10181_s1 + $0xd8] sm:$0xff]  ;;  %v7095_v39 = vld [vmem:[%s10181_s1 + $0xc0] sm:$0xff] }
   0xe   :  { %110 = vmatprep.subr.mxu0 %v7011_v25  ;;  %181 = vmatprep.subr.mxu1 %v7016_v26  ;;  %v7100_v40 = vld [vmem:[%s10181_s1 + $0xd0] sm:$0xff]  ;;  %v7107_v41 = vld [vmem:[%s10181_s1 + $0xa8] sm:$0xff]  ;;  %v7112_v42 = vld [vmem:[%s10181_s1 + $0xb8] sm:$0xff] }
   0xf   :  { %111 = vmatpush1.msra.mxu0 %v7023_v27  ;;  %182 = vmatpush1.msra.mxu1 %v7028_v28  ;;  %v7119_v43 = vld [vmem:[%s10181_s1 + $0xa0] sm:$0xff]  ;;  %v7124_v44 = vld [vmem:[%s10181_s1 + $0xb0] sm:$0xff]  ;;  %v7131_v45 = vld [vmem:[%s10181_s1 + $0x88] sm:$0xff] }
  0x10   :  { %112 = vmatprep.subr.mxu0 %v7035_v29  ;;  %183 = vmatprep.subr.mxu1 %v7040_v30  ;;  %v7136_v46 = vld [vmem:[%s10181_s1 + $0x98] sm:$0xff]  ;;  %v7143_v47 = vld [vmem:[%s10181_s1 + $0x80] sm:$0xff]  ;;  %v7148_v48 = vld [vmem:[%s10181_s1 + $0x90] sm:$0xff] }
  0x11   :  { %113 = vmatpush1.msra.mxu0 %v7047_v31  ;;  %184 = vmatpush1.msra.mxu1 %v7052_v32  ;;  %v7155_v49 = vld [vmem:[%s10181_s1 + $0x68] sm:$0xff]  ;;  %v7160_v50 = vld [vmem:[%s10181_s1 + $0x78] sm:$0xff]  ;;  %v7167_v51 = vld [vmem:[%s10181_s1 + $0x60] sm:$0xff] }
  0x12   :  { %114 = vmatprep.subr.mxu0 %v7059_v33  ;;  %185 = vmatprep.subr.mxu1 %v7064_v34  ;;  %v7172_v52 = vld [vmem:[%s10181_s1 + $0x70] sm:$0xff]  ;;  %v7179_v53 = vld [vmem:[%s10181_s1 + $0x48] sm:$0xff]  ;;  %v7184_v54 = vld [vmem:[%s10181_s1 + $0x58] sm:$0xff] }
  0x13   :  { %115 = vmatpush1.msra.mxu0 %v7071_v35  ;;  %186 = vmatpush1.msra.mxu1 %v7076_v36  ;;  %v7191_v55 = vld [vmem:[%s10181_s1 + $0x40] sm:$0xff]  ;;  %v7196_v56 = vld [vmem:[%s10181_s1 + $0x50] sm:$0xff]  ;;  %v7203_v57 = vld [vmem:[%s10181_s1 + $0x28] sm:$0xff] }
  0x14   :  { %116 = vmatprep.subr.mxu0 %v7083_v37  ;;  %187 = vmatprep.subr.mxu1 %v7088_v38  ;;  %v7208_v58 = vld [vmem:[%s10181_s1 + $0x38] sm:$0xff]  ;;  %v7215_v59 = vld [vmem:[%s10181_s1 + $0x20] sm:$0xff]  ;;  %v7220_v60 = vld [vmem:[%s10181_s1 + $0x30] sm:$0xff] }
  0x15   :  { %117 = vmatpush1.msra.mxu0 %v7095_v39  ;;  %188 = vmatpush1.msra.mxu1 %v7100_v40  ;;  %10248 = vst [vmem:[#allocation4_spill] sm:$0xff] %v7208_v58  ;;  %10249 = vst [vmem:[#allocation5_spill] sm:$0xff] %v7215_v59  ;;  %v7227_v61 = vld [vmem:[%s10181_s1 + $0x8] sm:$0xff]  ;;  %v7232_v62 = vld [vmem:[%s10181_s1 + $0x18] sm:$0xff] }
  0x16   :  { %118 = vmatprep.subr.mxu0 %v7107_v41  ;;  %189 = vmatprep.subr.mxu1 %v7112_v42  ;;  %10250 = vst [vmem:[#allocation6_spill] sm:$0xff] %v7220_v60  ;;  %10251 = vst [vmem:[#allocation7_spill] sm:$0xff] %v7227_v61  ;;  %v7239_v63 = vld [vmem:[%s10181_s1] sm:$0xff]  ;;  %v7244_v3 = vld [vmem:[%s10181_s1 + $0x10] sm:$0xff] }
  0x17   :  { %119 = vmatpush1.msra.mxu0 %v7119_v43  ;;  %190 = vmatpush1.msra.mxu1 %v7124_v44  ;;  %10252 = vst [vmem:[#allocation8_spill] sm:$0xff] %v7232_v62  ;;  %10253 = vst [vmem:[#allocation9_spill] sm:$0xff] %v7239_v63 }
  0x18   :  { %120 = vmatprep.subr.mxu0 %v7131_v45  ;;  %191 = vmatprep.subr.mxu1 %v7136_v46  ;;  %10254 = vst [vmem:[#allocation10_spill] sm:$0xff] %v7244_v3  ;;  %vm7462_vm2 = vmand %vm642_vm0, %vm643_vm1 }
  0x19   :  { %121 = vmatpush1.msra.mxu0 %v7143_v47  ;;  %192 = vmatpush1.msra.mxu1 %v7148_v48  ;;  %vm7890_vm4 = vmand %vm642_vm0, %vm1285_vm3  ;;  %vm4466_vm0 = vsmask.f32 3328 }
  0x1a   :  { %122 = vmatprep.subr.mxu0 %v7155_v49  ;;  %193 = vmatprep.subr.mxu1 %v7160_v50  ;;  %vm8318_vm7 = vmand %vm1911_vm5, %vm1912_vm6 }
  0x1b   :  { %123 = vmatpush1.msra.mxu0 %v7167_v51  ;;  %194 = vmatpush1.msra.mxu1 %v7172_v52  ;;  %vm8746_vm9 = vmand %vm1911_vm5, %vm2562_vm8 }
  0x1c   :  { %124 = vmatprep.subr.mxu0 %v7179_v53  ;;  %195 = vmatprep.subr.mxu1 %v7184_v54  ;;  %vm9174_vm12 = vmand %vm3188_vm10, %vm3189_vm11 }
  0x1d   :  { %125 = vmatpush1.msra.mxu0 %v7191_v55  ;;  %196 = vmatpush1.msra.mxu1 %v7196_v56  ;;  %vm9596_vm14 = vmand %vm3188_vm10, %vm3839_vm13 }
  0x1e   :  { %126 = vmatprep.subr.mxu0 %v7203_v57  ;;  %197 = vmatprep.subr.mxu1 %v7208_v58  ;;  %v10255_v58 = vmov 0.0   ;;  %vm9926_vm1 = vmand %vm4465_vm15, %vm4466_vm0 }
  0x1f   :  { %127 = vmatpush1.msra.mxu0 %v7215_v59  ;;  %198 = vmatpush1.msra.mxu1 %v7220_v60 }
  0x20   :  { %128 = vmatprep.subr.mxu0 %v7227_v61  ;;  %199 = vmatprep.subr.mxu1 %v7232_v62 }
  0x21   :  { %129 = vmatpush1.msra.mxu0 %v7239_v63  ;;  %200 = vmatpush1.msra.mxu1 %v7244_v3 }
  0x22   :  { %163 = vmatmul.mubr.f32.vlgmr.msra.gmra.mxu0 %v10255_v58  ;;  %234 = vmatmul.mubr.f32.vlgmr.msra.gmra.mxu1 %v10255_v58 }
  0x23   :  { %743 = vmatprep.subr.mxu0 %v6869_v0  ;;  %814 = vmatprep.subr.mxu1 %v6874_v1 }
  0x24   :  { %744 = vmatpush1.msra.mxu0 %v6879_v2  ;;  %815 = vmatpush1.msra.mxu1 %v6888_v4  ;;  %v10256_v2 = vld [vmem:[#allocation4_spill] sm:$0xff]  ;;  %v6850_v4 = vmov 1966171168  }
  0x25   :  { %745 = vmatprep.subr.mxu0 %v6893_v5  ;;  %816 = vmatprep.subr.mxu1 %v6898_v6  ;;  %v249_v5 = vunpack.c.l.s4 %v6850_v4  ;;  %v251_v6 = vlaneseq  ;;  %v5268_v4 = vld [vmem:[%s10182_s0 + $0xa0] ss:$8 sm:$0xf] }
  0x26   :  { %746 = vmatpush1.msra.mxu0 %v6905_v7  ;;  %817 = vmatpush1.msra.mxu1 %v6910_v8 }
  0x27   :  { %747 = vmatprep.subr.mxu0 %v6915_v9  ;;  %818 = vmatprep.subr.mxu1 %v6922_v10  ;;  %v250_v7 = vunpack.c.0.s8 %v249_v5  ;;  %v252_v8 = vshrl.u32 %v251_v6, 7  ;;  %v5269_v5 = vld [vmem:[%s10182_s0 + $0xc0] ss:$8 sm:$0xf] }
  0x28   :  { %748 = vmatpush1.msra.mxu0 %v6927_v11  ;;  %819 = vmatpush1.msra.mxu1 %v6932_v12 }
  0x29   :  { %749 = vmatprep.subr.mxu0 %v6939_v13  ;;  %820 = vmatprep.subr.mxu1 %v6944_v14  ;;  %v7322_v11 = vsub.s32 %v250_v7, %v252_v8 }
  0x2a   :  { %750 = vmatpush1.msra.mxu0 %v6951_v15  ;;  %821 = vmatpush1.msra.mxu1 %v6956_v16 }
  0x2b   :  { %751 = vmatprep.subr.mxu0 %v6963_v17  ;;  %822 = vmatprep.subr.mxu1 %v6968_v18 }
  0x2c   :  { %752 = vmatpush1.msra.mxu0 %v6975_v19  ;;  %823 = vmatpush1.msra.mxu1 %v6980_v20 }
  0x2d   :  { %753 = vmatprep.subr.mxu0 %v6987_v21  ;;  %824 = vmatprep.subr.mxu1 %v6992_v22 }
  0x2e   :  { %754 = vmatpush1.msra.mxu0 %v6999_v23  ;;  %825 = vmatpush1.msra.mxu1 %v7004_v24  ;;  %v83_v24 = vld [vmem:[%s10182_s0] ss:$8 sm:$0xf] }
  0x2f   :  { %755 = vmatprep.subr.mxu0 %v7011_v25  ;;  %826 = vmatprep.subr.mxu1 %v7016_v26  ;;  %v5264_v25 = vld [vmem:[%s10182_s0 + $0x20] ss:$8 sm:$0xf] }
  0x30   :  { %756 = vmatpush1.msra.mxu0 %v7023_v27  ;;  %827 = vmatpush1.msra.mxu1 %v7028_v28  ;;  %v5265_v26 = vld [vmem:[%s10182_s0 + $0x40] ss:$8 sm:$0xf] }
  0x31   :  { %757 = vmatprep.subr.mxu0 %v7035_v29  ;;  %828 = vmatprep.subr.mxu1 %v7040_v30  ;;  %v5267_v27 = vld [vmem:[%s10182_s0 + $0x80] ss:$8 sm:$0xf] }
  0x32   :  { %758 = vmatpush1.msra.mxu0 %v7047_v31  ;;  %829 = vmatpush1.msra.mxu1 %v7052_v32  ;;  %v5266_v32 = vld [vmem:[%s10182_s0 + $0x60] ss:$8 sm:$0xf] }
  0x33   :  { %759 = vmatprep.subr.mxu0 %v7059_v33  ;;  %830 = vmatprep.subr.mxu1 %v7064_v34 }
  0x34   :  { %760 = vmatpush1.msra.mxu0 %v7071_v35  ;;  %831 = vmatpush1.msra.mxu1 %v7076_v36 }
  0x35   :  { %761 = vmatprep.subr.mxu0 %v7083_v37  ;;  %832 = vmatprep.subr.mxu1 %v7088_v38 }
  0x36   :  { %762 = vmatpush1.msra.mxu0 %v7095_v39  ;;  %833 = vmatpush1.msra.mxu1 %v7100_v40 }
  0x37   :  { %763 = vmatprep.subr.mxu0 %v7107_v41  ;;  %834 = vmatprep.subr.mxu1 %v7112_v42 }
  0x38   :  { %764 = vmatpush1.msra.mxu0 %v7119_v43  ;;  %835 = vmatpush1.msra.mxu1 %v7124_v44 }
  0x39   :  { %765 = vmatprep.subr.mxu0 %v7131_v45  ;;  %836 = vmatprep.subr.mxu1 %v7136_v46 }
  0x3a   :  { %766 = vmatpush1.msra.mxu0 %v7143_v47  ;;  %837 = vmatpush1.msra.mxu1 %v7148_v48 }
  0x3b   :  { %767 = vmatprep.subr.mxu0 %v7155_v49  ;;  %838 = vmatprep.subr.mxu1 %v7160_v50 }
  0x3c   :  { %768 = vmatpush1.msra.mxu0 %v7167_v51  ;;  %839 = vmatpush1.msra.mxu1 %v7172_v52 }
  0x3d   :  { %769 = vmatprep.subr.mxu0 %v7179_v53  ;;  %840 = vmatprep.subr.mxu1 %v7184_v54 }
  0x3e   :  { %770 = vmatpush1.msra.mxu0 %v7191_v55  ;;  %841 = vmatpush1.msra.mxu1 %v7196_v56 }
  0x3f   :  { %771 = vmatprep.subr.mxu0 %v7203_v57  ;;  %842 = vmatprep.subr.mxu1 %v10256_v2 }
  0x40   :  { %772 = vmatpush1.msra.mxu0 %v7215_v59  ;;  %843 = vmatpush1.msra.mxu1 %v7220_v60 }
  0x41   :  { %773 = vmatprep.subr.mxu0 %v7227_v61  ;;  %844 = vmatprep.subr.mxu1 %v7232_v62 }
  0x42   :  { %774 = vmatpush1.msra.mxu0 %v7239_v63  ;;  %807 = vmatprep.mubr.f32.mxu0 %v10255_v58 }
  0x43   :  { %845 = vmatpush1.msra.mxu1 %v7244_v3  ;;  %878 = vmatprep.mubr.f32.mxu1 %v10255_v58 }
  0x44   :  { %1385 = vmatprep.subr.mxu0 %v6869_v0  ;;  %1456 = vmatprep.subr.mxu1 %v6874_v1 }
  0xe2   :  { %v164_v9 = vpop.f32.mrf.mxu0  ;;  %v235_v10 = vpop.f32.mrf.mxu1 }
  0xe4   :  { %v166_v12 = vpop.f32.mrf.mxu0  ;;  %v237_v13 = vpop.f32.mrf.mxu1 }
  0xe5   :  { %v244_v14 = vcombine.low %v164_v9, %v166_v12  ;;  %v245_v15 = vcombine.high %v164_v9, %v166_v12  ;;  %v246_v16 = vcombine.low %v235_v10, %v237_v13  ;;  %v247_v17 = vcombine.high %v235_v10, %v237_v13  ;;  %v5270_v10 = vld [vmem:[%s10182_s0 + $0xe0] ss:$8 sm:$0xf] }
  0xe7   :  { %v254_v18 = vrot.slane %v244_v14, %v7322_v11  ;;  %v261_v0 = vrot.slane %v245_v15, %v7322_v11  ;;  %v268_v1 = vrot.slane %v246_v16, %v7322_v11  ;;  %v275_v19 = vrot.slane %v247_v17, %v7322_v11 }
  0xe9   :  { %v276_v20 = vcombine.low %v254_v18, %v268_v1  ;;  %v277_v21 = vcombine.high %v254_v18, %v268_v1  ;;  %v278_v22 = vcombine.low %v261_v0, %v275_v19  ;;  %v279_v23 = vcombine.high %v261_v0, %v275_v19 }
  0xeb   :  { %v286_v28 = vrot.slane %v276_v20, %v7322_v11  ;;  %v293_v29 = vrot.slane %v278_v22, %v7322_v11  ;;  %v300_v30 = vrot.slane %v277_v21, %v7322_v11  ;;  %v307_v31 = vrot.slane %v279_v23, %v7322_v11 }
  0xed   :  { %v308_v6 = vcombine.high %v286_v28, %v286_v28  ;;  %v309_v7 = vcombine.high %v293_v29, %v293_v29  ;;  %v310_v8 = vcombine.high %v300_v30, %v300_v30  ;;  %v311_v9 = vcombine.high %v307_v31, %v307_v31 }
  0xee   :  { %v7356_v12 = vadd.f32 %v286_v28, %v83_v24  ;;  %v7358_v13 = vadd.f32 %v5264_v25, %v300_v30  ;;  %v7360_v14 = vadd.f32 %v5267_v27, %v293_v29  ;;  %v7366_v17 = vadd.f32 %v5268_v4, %v307_v31 }
  0xef   :  { %v7362_v15 = vadd.f32 %v5265_v26, %v308_v6  ;;  %v7364_v16 = vadd.f32 %v5266_v32, %v310_v8  ;;  %v7368_v18 = vadd.f32 %v5269_v5, %v309_v7  ;;  %v7372_v19 = vadd.f32 %v5270_v10, %v311_v9 }
  0xf0   :  { %v5271_v0 = vmul.f32 -1.442695, %v7356_v12  ;;  %v5272_v1 = vmul.f32 -1.442695, %v7358_v13  ;;  %v5275_v22 = vmul.f32 -1.442695, %v7360_v14 }
  0xf1   :  { %v5273_v20 = vmul.f32 -1.442695, %v7362_v15  ;;  %v5274_v21 = vmul.f32 -1.442695, %v7364_v16  ;;  %v384_v23 = vrot.slane %v7356_v12, 1  ;;  %v385_v25 = vrot.slane %v7358_v13, 1 }
  0xf2   :  { %5633 = vpow2.f32 %v5271_v0  ;;  %v5276_v24 = vmul.f32 -1.442695, %v7366_v17  ;;  %v5277_v26 = vmul.f32 -1.442695, %v7368_v18  ;;  %v386_v27 = vrot.slane %v7362_v15, 1 }
  0xf3   :  { %5635 = vpow2.f32 %v5272_v1  ;;  %v5278_v28 = vmul.f32 -1.442695, %v7372_v19  ;;  %v387_v29 = vrot.slane %v7364_v16, 1  ;;  %v388_v30 = vrot.slane %v7360_v14, 1 }
  0xf4   :  { %5637 = vpow2.f32 %v5273_v20  ;;  %v5279_v31 = vmul.f32 -1.442695, %v384_v23  ;;  %v389_v32 = vrot.slane %v7366_v17, 1  ;;  %v5280_v4 = vmul.f32 -1.442695, %v385_v25 }
  0xf5   :  { %5639 = vpow2.f32 %v5274_v21  ;;  %v390_v5 = vrot.slane %v7368_v18, 1  ;;  %v5281_v6 = vmul.f32 -1.442695, %v386_v27  ;;  %v391_v7 = vrot.slane %v7372_v19, 1 }
  0xf6   :  { %5641 = vpow2.f32 %v5275_v22  ;;  %v5282_v8 = vmul.f32 -1.442695, %v387_v29  ;;  %v5283_v9 = vmul.f32 -1.442695, %v388_v30  ;;  %v5284_v10 = vmul.f32 -1.442695, %v389_v32 }
  0xf7   :  { %5643 = vpow2.f32 %v5276_v24  ;;  %v5285_v0 = vmul.f32 -1.442695, %v390_v5  ;;  %v5286_v1 = vmul.f32 -1.442695, %v391_v7 }
  0xf8   :  { %5645 = vpow2.f32 %v5277_v26 }
  0xf9   :  { %5647 = vpow2.f32 %v5278_v28 }
  0xfa   :  { %5649 = vpow2.f32 %v5279_v31 }
  0xfb   :  { %5651 = vpow2.f32 %v5280_v4 }
  0xfc   :  { %5653 = vpow2.f32 %v5281_v6 }
  0xfd   :  { %5655 = vpow2.f32 %v5282_v8 }
  0xfe   :  { %5657 = vpow2.f32 %v5283_v9 }
  0xff   :  { %v5634_v20 = vpop.eup %5633  ;;  %5659 = vpow2.f32 %v5284_v10 }
 0x100   :  { %v5636_v21 = vpop.eup %5635  ;;  %v352_v22 = vadd.f32 1.0, %v5634_v20  ;;  %5661 = vpow2.f32 %v5285_v0 }
 0x101   :  { %v5638_v23 = vpop.eup %5637  ;;  %v353_v24 = vadd.f32 1.0, %v5636_v21  ;;  %5663 = vpow2.f32 %v5286_v1 }
 0x102   :  { %v5640_v25 = vpop.eup %5639  ;;  %v354_v26 = vadd.f32 1.0, %v5638_v23  ;;  %5665 = vrcp.f32 %v352_v22 }
 0x103   :  { %v5642_v27 = vpop.eup %5641  ;;  %v355_v28 = vadd.f32 1.0, %v5640_v25  ;;  %5667 = vrcp.f32 %v353_v24 }
 0x104   :  { %v5644_v29 = vpop.eup %5643  ;;  %v356_v30 = vadd.f32 1.0, %v5642_v27  ;;  %5669 = vrcp.f32 %v354_v26 }
 0x105   :  { %v5646_v31 = vpop.eup %5645  ;;  %v357_v32 = vadd.f32 1.0, %v5644_v29  ;;  %5671 = vrcp.f32 %v355_v28  ;;  %v448_v29 = vrot.slane %v7356_v12, 2 }
 0x106   :  { %v5648_v4 = vpop.eup %5647  ;;  %v358_v5 = vadd.f32 1.0, %v5646_v31  ;;  %5673 = vrcp.f32 %v356_v30 }
 0x107   :  { %v5650_v6 = vpop.eup %5649  ;;  %v359_v7 = vadd.f32 1.0, %v5648_v4  ;;  %5675 = vrcp.f32 %v357_v32  ;;  %v449_v32 = vrot.slane %v7358_v13, 2 }
 0x108   :  { %v5652_v8 = vpop.eup %5651  ;;  %5677 = vrcp.f32 %v358_v5  ;;  %v424_v9 = vadd.f32 1.0, %v5650_v6  ;;  %v450_v5 = vrot.slane %v7362_v15, 2 }
 0x109   :  { %v5654_v10 = vpop.eup %5653  ;;  %5679 = vrcp.f32 %v359_v7  ;;  %v425_v0 = vadd.f32 1.0, %v5652_v8  ;;  %v451_v7 = vrot.slane %v7364_v16, 2  ;;  %v544_v8 = vrot.slane %v10255_v58, %v7322_v11 }
 0x10a   :  { %v5656_v1 = vpop.eup %5655  ;;  %v426_v20 = vadd.f32 1.0, %v5654_v10  ;;  %5681 = vrcp.f32 %v424_v9  ;;  %v452_v10 = vrot.slane %v7360_v14, 2 }
 0x10b   :  { %v5658_v21 = vpop.eup %5657  ;;  %v427_v22 = vadd.f32 1.0, %v5656_v1  ;;  %5683 = vrcp.f32 %v425_v0  ;;  %v472_v0 = vrot.slane %v7356_v12, 3  ;;  %v455_v12 = vrot.slane %v7372_v19, 2 }
 0x10c   :  { %v5660_v23 = vpop.eup %5659  ;;  %v428_v24 = vadd.f32 1.0, %v5658_v21  ;;  %5685 = vrcp.f32 %v426_v20  ;;  %v453_v20 = vrot.slane %v7366_v17, 2  ;;  %v473_v21 = vrot.slane %v7358_v13, 3 }
 0x10d   :  { %v5662_v25 = vpop.eup %5661  ;;  %v429_v26 = vadd.f32 1.0, %v5660_v23  ;;  %5687 = vrcp.f32 %v427_v22  ;;  %v537_v22 = vcombine.high %v10255_v58, %v10255_v58  ;;  %v476_v13 = vrot.slane %v7360_v14, 3 }
 0x10e   :  { %v5664_v27 = vpop.eup %5663  ;;  %v430_v28 = vadd.f32 1.0, %v5662_v25  ;;  %5689 = vrcp.f32 %v428_v24  ;;  %v454_v24 = vrot.slane %v7368_v18, 2  ;;  %v474_v25 = vrot.slane %v7362_v15, 3 }
 0x10f   :  { %v7389_v30 = vpop.eup %5665  ;;  %v431_v31 = vadd.f32 1.0, %v5664_v27  ;;  %5691 = vrcp.f32 %v429_v26  ;;  %v475_v27 = vrot.slane %v7364_v16, 3  ;;  %v5288_v3 = vmul.f32 -1.442695, %v473_v21 }
 0x110   :  { %v7392_v4 = vpop.eup %5667  ;;  %5693 = vrcp.f32 %v430_v28  ;;  %v552_v28 = vcombine.high %v544_v8, %v544_v8  ;;  %v551_v15 = vrot.slane %v537_v22, %v7322_v11  ;;  %v5289_v63 = vmul.f32 -1.442695, %v474_v25 }
 0x111   :  { %v7395_v6 = vpop.eup %5669  ;;  %5695 = vrcp.f32 %v431_v31  ;;  %v5287_v31 = vmul.f32 -1.442695, %v472_v0  ;;  %v560_v16 = vrot.slane %v544_v8, %v7322_v11  ;;  %v5290_v14 = vmul.f32 -1.442695, %v475_v27 }
 0x112   :  { %v7400_v9 = vpop.eup %5671  ;;  %5697 = vtanh.f32 %v448_v29  ;;  %v574_v0 = vrot.slane %v552_v28, %v7322_v11  ;;  %v553_v61 = vcombine.high %v551_v15, %v551_v15 }
 0x113   :  { %v7404_v1 = vpop.eup %5673  ;;  %5699 = vtanh.f32 %v449_v32  ;;  %v582_v25 = vcombine.high %v560_v16, %v560_v16 }
 0x114   :  { %v7410_v23 = vpop.eup %5675  ;;  %5701 = vtanh.f32 %v450_v5  ;;  %v477_v5 = vrot.slane %v7366_v17, 3  ;;  %v5291_v17 = vmul.f32 -1.442695, %v476_v13  ;;  %v581_v13 = vrot.slane %v553_v61, %v7322_v11 }
 0x115   :  { %v7414_v26 = vpop.eup %5677  ;;  %5703 = vtanh.f32 %v451_v7  ;;  %v478_v7 = vrot.slane %v7368_v18, 3 }
 0x116   :  { %v7418_v29 = vpop.eup %5679  ;;  %5705 = vtanh.f32 %v452_v10  ;;  %v479_v10 = vrot.slane %v7372_v19, 3  ;;  %v5292_v22 = vmul.f32 -1.442695, %v477_v5  ;;  %v567_v19 = vrot.slane %v551_v15, %v7322_v11 }
 0x117   :  { %v5682_v32 = vpop.eup %5681  ;;  %5707 = vtanh.f32 %v453_v20  ;;  %v5293_v18 = vmul.f32 -1.442695, %v478_v7 }
 0x118   :  { %v5684_v58 = vpop.eup %5683  ;;  %5709 = vtanh.f32 %v454_v24  ;;  %v5294_v8 = vmul.f32 -1.442695, %v479_v10  ;;  %v594_v27 = vmul.f32 %v5682_v32, %v560_v16 }
 0x119   :  { %v5686_v62 = vpop.eup %5685  ;;  %5711 = vtanh.f32 %v455_v12  ;;  %v584_v12 = vcombine.high %v574_v0, %v574_v0 }
 0x11a   :  { %v5688_v20 = vpop.eup %5687  ;;  %5713 = vpow2.f32 %v5287_v31  ;;  %v596_v5 = vmul.f32 %v5686_v62, %v582_v25 }
 0x11b   :  { %v5690_v21 = vpop.eup %5689  ;;  %5715 = vpow2.f32 %v5288_v3  ;;  %v595_v3 = vmul.f32 %v5684_v58, %v574_v0 }
 0x11c   :  { %v5692_v24 = vpop.eup %5691  ;;  %5717 = vpow2.f32 %v5289_v63  ;;  %v598_v15 = vmul.f32 %v5690_v21, %v567_v19 }
 0x11d   :  { %v5694_v60 = vpop.eup %5693  ;;  %5719 = vpow2.f32 %v5290_v14  ;;  %v597_v14 = vmul.f32 %v5688_v20, %v584_v12  ;;  %v599_v58 = vmul.f32 %v5692_v24, %v581_v13  ;;  %v585_v24 = vcombine.high %v581_v13, %v581_v13 }
 0x11e   :  { %v5696_v59 = vpop.eup %5695  ;;  %5721 = vpow2.f32 %v5291_v17 }
 0x11f   :  { %v5698_v28 = vpop.eup %5697  ;;  %5723 = vpow2.f32 %v5292_v22  ;;  %v601_v13 = vmul.f32 %v5696_v59, %v585_v24 }
 0x120   :  { %v5700_v31 = vpop.eup %5699  ;;  %5725 = vpow2.f32 %v5293_v18  ;;  %v602_v63 = vmul.f32 %v5698_v28, %v7389_v30  ;;  %v583_v18 = vcombine.high %v567_v19, %v567_v19 }
 0x121   :  { %v5702_v7 = vpop.eup %5701  ;;  %5727 = vpow2.f32 %v5294_v8  ;;  %v603_v10 = vmul.f32 %v5700_v31, %v7392_v4 }
 0x122   :  { %v5704_v2 = vpop.eup %5703  ;;  %v604_v17 = vmul.f32 %v5702_v7, %v7395_v6  ;;  %v7432_v32 = vadd.f32 %v602_v63, %v594_v27  ;;  %v600_v28 = vmul.f32 %v5694_v60, %v583_v18 }
 0x123   :  { %v5706_v16 = vpop.eup %5705  ;;  %v605_v61 = vmul.f32 %v5704_v2, %v7400_v9  ;;  %v7435_v0 = vadd.f32 %v603_v10, %v595_v3 }
 0x124   :  { %v5708_v22 = vpop.eup %5707  ;;  %v606_v62 = vmul.f32 %v5706_v16, %v7404_v1  ;;  %v7438_v30 = vadd.f32 %v604_v17, %v596_v5  ;;  %5729 = vtanh.f32 %v7432_v32 }
 0x125   :  { %v5710_v4 = vpop.eup %5709  ;;  %v607_v20 = vmul.f32 %v5708_v22, %v7410_v23  ;;  %v7442_v6 = vadd.f32 %v605_v61, %v597_v14  ;;  %5731 = vtanh.f32 %v7435_v0 }
 0x126   :  { %v5712_v21 = vpop.eup %5711  ;;  %v7445_v2 = vadd.f32 %v606_v62, %v598_v15  ;;  %5733 = vtanh.f32 %v7438_v30  ;;  %v608_v7 = vmul.f32 %v5710_v4, %v7414_v26 }
 0x127   :  { %v5714_v9 = vpop.eup %5713  ;;  %v7448_v1 = vadd.f32 %v607_v20, %v599_v58  ;;  %5735 = vtanh.f32 %v7442_v6  ;;  %v609_v17 = vmul.f32 %v5712_v21, %v7418_v29 }
 0x128   :  { %v5716_v25 = vpop.eup %5715  ;;  %v512_v8 = vadd.f32 1.0, %v5714_v9  ;;  %5737 = vtanh.f32 %v7445_v2  ;;  %v7455_v61 = vadd.f32 %v608_v7, %v600_v28 }
 0x129   :  { %v5718_v23 = vpop.eup %5717  ;;  %v513_v12 = vadd.f32 1.0, %v5716_v25  ;;  %5739 = vtanh.f32 %v7448_v1  ;;  %v7457_v58 = vadd.f32 %v609_v17, %v601_v13  ;;  %v651_v13 = vld [vmem:[%s10183_s2 + $0x8] sm:$0x1]  ;;  %v7539_v25 = vld [vmem:[%s10181_s1 + $0x1e0] sm:$0xff] }
 0x12a   :  { %v5720_v27 = vpop.eup %5719  ;;  %v514_v19 = vadd.f32 1.0, %v5718_v23  ;;  %5741 = vrcp.f32 %v512_v8  ;;  %v645_v8 = vld [vmem:[%s10183_s2] sm:$0x1] }
 0x12b   :  { %v5722_v3 = vpop.eup %5721  ;;  %v515_v31 = vadd.f32 1.0, %v5720_v27  ;;  %5743 = vrcp.f32 %v513_v12 }
 0x12c   :  { %v5724_v63 = vpop.eup %5723  ;;  %v516_v5 = vadd.f32 1.0, %v5722_v3  ;;  %5745 = vrcp.f32 %v514_v19  ;;  %v648_v19 = vld [vmem:[%s10183_s2 + $0x4] sm:$0x1] }
 0x12d   :  { %v5726_v10 = vpop.eup %5725  ;;  %v517_v14 = vadd.f32 1.0, %v5724_v63  ;;  %5747 = vrcp.f32 %v515_v31 }
 0x12e   :  { %v5728_v15 = vpop.eup %5727  ;;  %v518_v16 = vadd.f32 1.0, %v5726_v10  ;;  %5749 = vrcp.f32 %v516_v5 }
 0x12f   :  { %v519_v60 = vadd.f32 1.0, %v5728_v15  ;;  %5751 = vrcp.f32 %v517_v14  ;;  %v654_v14 = vld [vmem:[%s10183_s2 + $0xc] sm:$0x1] }
 0x130   :  { %5753 = vrcp.f32 %v518_v16 }
 0x131   :  { %v5730_v59 = vpop.eup %5729  ;;  %5755 = vrcp.f32 %v519_v60 }
 0x132   :  { %v5732_v22 = vpop.eup %5731  ;;  %5757 = vtanh.f32 %v7455_v61 }
 0x133   :  { %v5734_v26 = vpop.eup %5733  ;;  %5759 = vtanh.f32 %v7457_v58 }
 0x134   :  { %v5736_v62 = vpop.eup %5735 }
 0x135   :  { %v5738_v29 = vpop.eup %5737 }
 0x136   :  { %v5740_v4 = vpop.eup %5739 }
 0x137   :  { %v5742_v20 = vpop.eup %5741 }
 0x138   :  { %v5744_v21 = vpop.eup %5743  ;;  %v626_v18 = vmul.f32 %v5742_v20, %v5730_v59  ;;  %v660_v20 = vld [vmem:[%s10183_s2 + $0x14] sm:$0x1] }
 0x139   :  { %v5746_v9 = vpop.eup %5745  ;;  %v627_v24 = vmul.f32 %v5744_v21, %v5732_v22  ;;  %v657_v22 = vld [vmem:[%s10183_s2 + $0x10] sm:$0x1] }
 0x13a   :  { %v5748_v23 = vpop.eup %5747  ;;  %v628_v12 = vmul.f32 %v5746_v9, %v5734_v26  ;;  %v634_v27 = vpack.c.bf16 %v626_v18, %v626_v18 }
 0x13b   :  { %v5750_v28 = vpop.eup %5749  ;;  %v629_v3 = vmul.f32 %v5748_v23, %v5736_v62  ;;  %v635_v31 = vpack.c.bf16 %v627_v24, %v627_v24  ;;  %v693_v17 = vcombine.low %v626_v18, %v627_v24 }
 0x13c   :  { %v5752_v63 = vpop.eup %5751  ;;  %v630_v5 = vmul.f32 %v5750_v28, %v5738_v29  ;;  %v636_v7 = vpack.c.bf16 %v628_v12, %v628_v12  ;;  %v646_v10 = vsel %vm7462_vm2, %v634_v27, %v645_v8  ;;  %v663_v28 = vld [vmem:[%s10183_s2 + $0x18] sm:$0x1] }
 0x13d   :  { %v5754_v15 = vpop.eup %5753  ;;  %v631_v16 = vmul.f32 %v5752_v63, %v5740_v4  ;;  %v637_v60 = vpack.c.bf16 %v629_v3, %v629_v3  ;;  %647 = vst [vmem:[%s10183_s2] sm:$0x1] %v646_v10  ;;  %v649_v59 = vsel %vm7462_vm2, %v635_v31, %v648_v19  ;;  %v694_v26 = vcombine.low %v628_v12, %v629_v3  ;;  %v666_v63 = vld [vmem:[%s10183_s2 + $0x1c] sm:$0x1] }
 0x13e   :  { %v5756_v62 = vpop.eup %5755  ;;  %v638_v29 = vpack.c.bf16 %v630_v5, %v630_v5  ;;  %650 = vst [vmem:[%s10183_s2 + $0x4] sm:$0x1] %v649_v59  ;;  %v652_v4 = vsel %vm7462_vm2, %v636_v7, %v651_v13  ;;  %v703_v31 = vrot.slane %v693_v17, %v7322_v11 }
 0x13f   :  { %v5758_v21 = vpop.eup %5757  ;;  %v639_v18 = vpack.c.bf16 %v631_v16, %v631_v16  ;;  %653 = vst [vmem:[%s10183_s2 + $0x8] sm:$0x1] %v652_v4  ;;  %v655_v9 = vsel %vm7462_vm2, %v637_v60, %v654_v14  ;;  %v710_v24 = vrot.slane %v694_v26, %v7322_v11  ;;  %v695_v3 = vcombine.low %v630_v5, %v631_v16  ;;  %v7557_v4 = vld [vmem:[%s10181_s1 + $0x1d8] sm:$0xff] }
 0x140   :  { %v5760_v8 = vpop.eup %5759  ;;  %v632_v23 = vmul.f32 %v5758_v21, %v5754_v15  ;;  %656 = vst [vmem:[%s10183_s2 + $0xc] sm:$0x1] %v655_v9  ;;  %v658_v12 = vsel %vm7462_vm2, %v638_v29, %v657_v22  ;;  %v7551_v29 = vld [vmem:[%s10181_s1 + $0x1c8] sm:$0xff]  ;;  %v7569_v21 = vld [vmem:[%s10181_s1 + $0x1d0] sm:$0xff]  ;;  %v7581_v9 = vld [vmem:[%s10181_s1 + $0x1b8] sm:$0xff] }
 0x141   :  { %v633_v27 = vmul.f32 %v5760_v8, %v5756_v62  ;;  %659 = vst [vmem:[%s10183_s2 + $0x10] sm:$0x1] %v658_v12  ;;  %v661_v19 = vsel %vm7462_vm2, %v639_v18, %v660_v20  ;;  %v725_v14 = vcombine.low %v703_v31, %v710_v24  ;;  %v717_v17 = vrot.slane %v695_v3, %v7322_v11  ;;  %v7545_v62 = vld [vmem:[%s10181_s1 + $0x1f0] sm:$0xff]  ;;  %v7563_v20 = vld [vmem:[%s10181_s1 + $0x1c0] sm:$0xff]  ;;  %v7575_v18 = vld [vmem:[%s10181_s1 + $0x1a8] sm:$0xff] }
 0x142   :  { %v640_v13 = vpack.c.bf16 %v632_v23, %v632_v23  ;;  %662 = vst [vmem:[%s10183_s2 + $0x14] sm:$0x1] %v661_v19  ;;  %v7587_v24 = vld [vmem:[%s10181_s1 + $0x1a0] sm:$0xff]  ;;  %v7593_v8 = vld [vmem:[%s10181_s1 + $0x1b0] sm:$0xff]  ;;  %v7605_v12 = vld [vmem:[%s10181_s1 + $0x198] sm:$0xff] }
 0x143   :  { %v641_v7 = vpack.c.bf16 %v633_v27, %v633_v27  ;;  %v696_v10 = vcombine.low %v632_v23, %v633_v27  ;;  %v733_v59 = vrot.slane %v725_v14, %v7322_v11  ;;  %v7599_v23 = vld [vmem:[%s10181_s1 + $0x188] sm:$0xff]  ;;  %v7611_v27 = vld [vmem:[%s10181_s1 + $0x180] sm:$0xff]  ;;  %v7617_v19 = vld [vmem:[%s10181_s1 + $0x190] sm:$0xff] }
 0x144   :  { %v664_v15 = vsel %vm7462_vm2, %v640_v13, %v663_v28  ;;  %v7623_v28 = vld [vmem:[%s10181_s1 + $0x168] sm:$0xff]  ;;  %v7629_v3 = vld [vmem:[%s10181_s1 + $0x178] sm:$0xff]  ;;  %v7635_v31 = vld [vmem:[%s10181_s1 + $0x160] sm:$0xff] }
 0x145   :  { %665 = vst [vmem:[%s10183_s2 + $0x18] sm:$0x1] %v664_v15  ;;  %v667_v5 = vsel %vm7462_vm2, %v641_v7, %v666_v63  ;;  %v724_v16 = vrot.slane %v696_v10, %v7322_v11  ;;  %v7641_v13 = vld [vmem:[%s10181_s1 + $0x170] sm:$0xff]  ;;  %v7647_v63 = vld [vmem:[%s10181_s1 + $0x148] sm:$0xff]  ;;  %v7653_v7 = vld [vmem:[%s10181_s1 + $0x158] sm:$0xff] }
 0x146   :  { %668 = vst [vmem:[%s10183_s2 + $0x1c] sm:$0x1] %v667_v5  ;;  %v7659_v10 = vld [vmem:[%s10181_s1 + $0x140] sm:$0xff]  ;;  %v7665_v14 = vld [vmem:[%s10181_s1 + $0x150] sm:$0xff]  ;;  %v7671_v15 = vld [vmem:[%s10181_s1 + $0x128] sm:$0xff] }
 0x147   :  { %v726_v60 = vcombine.low %v717_v17, %v724_v16  ;;  %10259 = vst [vmem:[#allocation11_spill] sm:$0xff] %v7671_v15  ;;  %v7677_v5 = vld [vmem:[%s10181_s1 + $0x138] sm:$0xff]  ;;  %v7683_v17 = vld [vmem:[%s10181_s1 + $0x120] sm:$0xff]  ;;  %v7689_v16 = vld [vmem:[%s10181_s1 + $0x130] sm:$0xff]  ;;  %vm5116_vm2 = vsmask.f32 7950 }
 0x148   :  { %10260 = vst [vmem:[#allocation12_spill] sm:$0xff] %v7677_v5  ;;  %10261 = vst [vmem:[#allocation13_spill] sm:$0xff] %v7683_v17 }
 0x149   :  { %v740_v22 = vrot.slane %v726_v60, %v7322_v11  ;;  %10262 = vst [vmem:[#allocation14_spill] sm:$0xff] %v7689_v16  ;;  %v7695_v60 = vld [vmem:[%s10181_s1 + $0x108] sm:$0xff]  ;;  %vm10113_vm3 = vmand %vm4465_vm15, %vm5116_vm2 }
 0x14a   :  { %10263 = vst [vmem:[#allocation15_spill] sm:$0xff] %v7695_v60 }
 0x14b   :  { %v741_v26 = vcombine.low %v733_v59, %v740_v22  ;;  %v7701_v59 = vld [vmem:[%s10181_s1 + $0x118] sm:$0xff]  ;;  %v7707_v22 = vld [vmem:[%s10181_s1 + $0x100] sm:$0xff] }
 0x14c   :  { %10264 = vst [vmem:[#allocation16_spill] sm:$0xff] %v7701_v59  ;;  %10265 = vst [vmem:[#allocation17_spill] sm:$0xff] %v7707_v22 }
 0x14d   :  { %808 = vmatmul.mubr.f32.vlgmr.msra.gmra.mxu0 %v741_v26  ;;  %879 = vmatmul.mubr.f32.vlgmr.msra.gmra.mxu1 %v741_v26  ;;  %v7713_v26 = vld [vmem:[%s10181_s1 + $0x110] sm:$0xff] }
 0x14e   :  { %1386 = vmatpush1.msra.mxu0 %v7539_v25  ;;  %1457 = vmatpush1.msra.mxu1 %v7545_v62  ;;  %10266 = vst [vmem:[#allocation18_spill] sm:$0xff] %v7713_v26 }
 0x14f   :  { %1387 = vmatprep.subr.mxu0 %v7551_v29  ;;  %1458 = vmatprep.subr.mxu1 %v7557_v4 }
 0x150   :  { %1388 = vmatpush1.msra.mxu0 %v7563_v20  ;;  %1459 = vmatpush1.msra.mxu1 %v7569_v21 }
 0x151   :  { %1389 = vmatprep.subr.mxu0 %v7575_v18  ;;  %1460 = vmatprep.subr.mxu1 %v7581_v9 }
 0x152   :  { %1390 = vmatpush1.msra.mxu0 %v7587_v24  ;;  %1461 = vmatpush1.msra.mxu1 %v7593_v8 }
 0x153   :  { %1391 = vmatprep.subr.mxu0 %v7599_v23  ;;  %1462 = vmatprep.subr.mxu1 %v7605_v12 }
 0x154   :  { %1392 = vmatpush1.msra.mxu0 %v7611_v27  ;;  %1463 = vmatpush1.msra.mxu1 %v7617_v19 }
 0x155   :  { %1393 = vmatprep.subr.mxu0 %v7623_v28  ;;  %1464 = vmatprep.subr.mxu1 %v7629_v3 }
 0x156   :  { %1394 = vmatpush1.msra.mxu0 %v7635_v31  ;;  %1465 = vmatpush1.msra.mxu1 %v7641_v13 }
 0x157   :  { %1395 = vmatprep.subr.mxu0 %v7647_v63  ;;  %1466 = vmatprep.subr.mxu1 %v7653_v7 }
 0x158   :  { %1396 = vmatpush1.msra.mxu0 %v7659_v10  ;;  %1467 = vmatpush1.msra.mxu1 %v7665_v14 }
 0x159   :  { %1397 = vmatprep.subr.mxu0 %v7671_v15  ;;  %1468 = vmatprep.subr.mxu1 %v7677_v5 }
 0x15a   :  { %1398 = vmatpush1.msra.mxu0 %v7683_v17  ;;  %1469 = vmatpush1.msra.mxu1 %v7689_v16 }
 0x15b   :  { %1399 = vmatprep.subr.mxu0 %v7695_v60  ;;  %1470 = vmatprep.subr.mxu1 %v7701_v59 }
 0x15c   :  { %1400 = vmatpush1.msra.mxu0 %v7707_v22  ;;  %1471 = vmatpush1.msra.mxu1 %v7713_v26 }
 0x15d   :  { %1401 = vmatprep.subr.mxu0 %v7059_v33  ;;  %1472 = vmatprep.subr.mxu1 %v7064_v34  ;;  %v10267_v33 = vld [vmem:[#allocation4_spill] sm:$0xff]  ;;  %v10268_v34 = vld [vmem:[#allocation5_spill] sm:$0xff] }
 0x15e   :  { %1402 = vmatpush1.msra.mxu0 %v7071_v35  ;;  %1473 = vmatpush1.msra.mxu1 %v7076_v36  ;;  %v10269_v35 = vld [vmem:[#allocation6_spill] sm:$0xff]  ;;  %v10270_v36 = vld [vmem:[#allocation7_spill] sm:$0xff] }
 0x15f   :  { %1403 = vmatprep.subr.mxu0 %v7083_v37  ;;  %1474 = vmatprep.subr.mxu1 %v7088_v38  ;;  %v10271_v37 = vld [vmem:[#allocation8_spill] sm:$0xff]  ;;  %v10272_v38 = vld [vmem:[#allocation9_spill] sm:$0xff] }
 0x160   :  { %1404 = vmatpush1.msra.mxu0 %v7095_v39  ;;  %1475 = vmatpush1.msra.mxu1 %v7100_v40  ;;  %v10273_v39 = vmov 0.0   ;;  %v10274_v40 = vld [vmem:[#allocation10_spill] sm:$0xff] }
 0x161   :  { %1405 = vmatprep.subr.mxu0 %v7107_v41  ;;  %1476 = vmatprep.subr.mxu1 %v7112_v42  ;;  %v7753_v41 = vld [vmem:[%s10181_s1 + $0x1e8] sm:$0xff]  ;;  %v7759_v42 = vld [vmem:[%s10181_s1 + $0x1f8] sm:$0xff] }
 0x162   :  { %1406 = vmatpush1.msra.mxu0 %v7119_v43  ;;  %1477 = vmatpush1.msra.mxu1 %v7124_v44  ;;  %10275 = vst [vmem:[#allocation4_spill] sm:$0xff] %v7753_v41  ;;  %10276 = vst [vmem:[#allocation5_spill] sm:$0xff] %v7759_v42 }
 0x163   :  { %1407 = vmatprep.subr.mxu0 %v7131_v45  ;;  %1478 = vmatprep.subr.mxu1 %v7136_v46 }
 0x164   :  { %1408 = vmatpush1.msra.mxu0 %v7143_v47  ;;  %1479 = vmatpush1.msra.mxu1 %v7148_v48 }
 0x165   :  { %1409 = vmatprep.subr.mxu0 %v7155_v49  ;;  %1480 = vmatprep.subr.mxu1 %v7160_v50 }
 0x166   :  { %1410 = vmatpush1.msra.mxu0 %v7167_v51  ;;  %1481 = vmatpush1.msra.mxu1 %v7172_v52 }
 0x167   :  { %1411 = vmatprep.subr.mxu0 %v7179_v53  ;;  %1482 = vmatprep.subr.mxu1 %v7184_v54 }
 0x168   :  { %1412 = vmatpush1.msra.mxu0 %v7191_v55  ;;  %1483 = vmatpush1.msra.mxu1 %v7196_v56 }
 0x169   :  { %1413 = vmatprep.subr.mxu0 %v7203_v57  ;;  %1484 = vmatprep.subr.mxu1 %v10267_v33 }
 0x16a   :  { %1414 = vmatpush1.msra.mxu0 %v10268_v34  ;;  %1485 = vmatpush1.msra.mxu1 %v10269_v35  ;;  %v5295_v34 = vld [vmem:[%s10182_s0 + $0x1] ss:$8 sm:$0xf] }
 0x16b   :  { %1415 = vmatprep.subr.mxu0 %v10270_v36  ;;  %1486 = vmatprep.subr.mxu1 %v10271_v37  ;;  %v5296_v35 = vld [vmem:[%s10182_s0 + $0x21] ss:$8 sm:$0xf] }
 0x16c   :  { %1416 = vmatpush1.msra.mxu0 %v10272_v38  ;;  %1449 = vmatprep.mubr.f32.mxu0 %v10273_v39  ;;  %v5297_v36 = vld [vmem:[%s10182_s0 + $0x41] ss:$8 sm:$0xf] }
 0x16d   :  { %1487 = vmatpush1.msra.mxu1 %v10274_v40  ;;  %1520 = vmatprep.mubr.f32.mxu1 %v10273_v39  ;;  %v5299_v37 = vld [vmem:[%s10182_s0 + $0x81] ss:$8 sm:$0xf] }
 0x16e   :  { %2012 = vmatprep.subr.mxu0 %v7753_v41  ;;  %2083 = vmatprep.subr.mxu1 %v7759_v42 }
 0x20d   :  { %v809_v43 = vpop.f32.mrf.mxu0  ;;  %v880_v44 = vpop.f32.mrf.mxu1 }
 0x20f   :  { %v811_v45 = vpop.f32.mrf.mxu0  ;;  %v882_v46 = vpop.f32.mrf.mxu1 }
 0x210   :  { %v889_v47 = vcombine.low %v809_v43, %v811_v45  ;;  %v890_v48 = vcombine.high %v809_v43, %v811_v45  ;;  %v891_v49 = vcombine.low %v880_v44, %v882_v46  ;;  %v892_v50 = vcombine.high %v880_v44, %v882_v46  ;;  %v5298_v45 = vld [vmem:[%s10182_s0 + $0x61] ss:$8 sm:$0xf] }
 0x211   :  { %v5300_v46 = vld [vmem:[%s10182_s0 + $0xa1] ss:$8 sm:$0xf] }
 0x212   :  { %v899_v51 = vrot.slane %v889_v47, %v7322_v11  ;;  %v906_v52 = vrot.slane %v890_v48, %v7322_v11  ;;  %v913_v53 = vrot.slane %v891_v49, %v7322_v11  ;;  %v920_v54 = vrot.slane %v892_v50, %v7322_v11  ;;  %v5301_v47 = vld [vmem:[%s10182_s0 + $0xc1] ss:$8 sm:$0xf] }
 0x214   :  { %v921_v55 = vcombine.low %v899_v51, %v913_v53  ;;  %v922_v56 = vcombine.high %v899_v51, %v913_v53  ;;  %v923_v57 = vcombine.low %v906_v52, %v920_v54  ;;  %v924_v33 = vcombine.high %v906_v52, %v920_v54  ;;  %v5302_v52 = vld [vmem:[%s10182_s0 + $0xe1] ss:$8 sm:$0xf] }
 0x216   :  { %v931_v38 = vrot.slane %v921_v55, %v7322_v11  ;;  %v938_v40 = vrot.slane %v923_v57, %v7322_v11  ;;  %v945_v43 = vrot.slane %v922_v56, %v7322_v11  ;;  %v952_v44 = vrot.slane %v924_v33, %v7322_v11 }
 0x218   :  { %v953_v48 = vcombine.high %v931_v38, %v931_v38  ;;  %v954_v49 = vcombine.high %v938_v40, %v938_v40  ;;  %v955_v50 = vcombine.high %v945_v43, %v945_v43  ;;  %v956_v51 = vcombine.high %v952_v44, %v952_v44 }
 0x219   :  { %v7794_v53 = vadd.f32 %v5295_v34, %v931_v38  ;;  %v7796_v54 = vadd.f32 %v5296_v35, %v945_v43  ;;  %v7798_v55 = vadd.f32 %v5299_v37, %v938_v40  ;;  %v7804_v33 = vadd.f32 %v5300_v46, %v952_v44 }
 0x21a   :  { %v7800_v56 = vadd.f32 %v5297_v36, %v953_v48  ;;  %v7802_v57 = vadd.f32 %v5298_v45, %v955_v50  ;;  %v7806_v42 = vadd.f32 %v5301_v47, %v954_v49  ;;  %v7810_v26 = vadd.f32 %v5302_v52, %v956_v51 }
 0x21b   :  { %v5303_v41 = vmul.f32 -1.442695, %v7794_v53  ;;  %v5304_v39 = vmul.f32 -1.442695, %v7796_v54  ;;  %v5307_v36 = vmul.f32 -1.442695, %v7798_v55 }
 0x21c   :  { %v5305_v34 = vmul.f32 -1.442695, %v7800_v56  ;;  %v5306_v35 = vmul.f32 -1.442695, %v7802_v57  ;;  %v1029_v37 = vrot.slane %v7794_v53, 1  ;;  %v1030_v40 = vrot.slane %v7796_v54, 1 }
 0x21d   :  { %5761 = vpow2.f32 %v5303_v41  ;;  %v5308_v38 = vmul.f32 -1.442695, %v7804_v33  ;;  %v5309_v43 = vmul.f32 -1.442695, %v7806_v42  ;;  %v1031_v44 = vrot.slane %v7800_v56, 1 }
 0x21e   :  { %5763 = vpow2.f32 %v5304_v39  ;;  %v5310_v45 = vmul.f32 -1.442695, %v7810_v26  ;;  %v1032_v46 = vrot.slane %v7802_v57, 1  ;;  %v1033_v41 = vrot.slane %v7798_v55, 1 }
 0x21f   :  { %5765 = vpow2.f32 %v5305_v34  ;;  %v5311_v47 = vmul.f32 -1.442695, %v1029_v37  ;;  %v1034_v39 = vrot.slane %v7804_v33, 1  ;;  %v5312_v48 = vmul.f32 -1.442695, %v1030_v40 }
 0x220   :  { %5767 = vpow2.f32 %v5306_v35  ;;  %v1035_v49 = vrot.slane %v7806_v42, 1  ;;  %v5313_v50 = vmul.f32 -1.442695, %v1031_v44  ;;  %v1036_v51 = vrot.slane %v7810_v26, 1 }
 0x221   :  { %5769 = vpow2.f32 %v5307_v36  ;;  %v5314_v52 = vmul.f32 -1.442695, %v1032_v46  ;;  %v5315_v34 = vmul.f32 -1.442695, %v1033_v41  ;;  %v5316_v35 = vmul.f32 -1.442695, %v1034_v39 }
 0x222   :  { %5771 = vpow2.f32 %v5308_v38  ;;  %v5317_v36 = vmul.f32 -1.442695, %v1035_v49  ;;  %v5318_v37 = vmul.f32 -1.442695, %v1036_v51 }
 0x223   :  { %5773 = vpow2.f32 %v5309_v43 }
 0x224   :  { %5775 = vpow2.f32 %v5310_v45 }
 0x225   :  { %5777 = vpow2.f32 %v5311_v47 }
 0x226   :  { %5779 = vpow2.f32 %v5312_v48 }
 0x227   :  { %5781 = vpow2.f32 %v5313_v50 }
 0x228   :  { %5783 = vpow2.f32 %v5314_v52 }
 0x229   :  { %5785 = vpow2.f32 %v5315_v34 }
 0x22a   :  { %v5762_v38 = vpop.eup %5761  ;;  %5787 = vpow2.f32 %v5316_v35 }
 0x22b   :  { %v5764_v40 = vpop.eup %5763  ;;  %v997_v43 = vadd.f32 1.0, %v5762_v38  ;;  %5789 = vpow2.f32 %v5317_v36 }
 0x22c   :  { %v5766_v22 = vpop.eup %5765  ;;  %v998_v44 = vadd.f32 1.0, %v5764_v40  ;;  %5791 = vpow2.f32 %v5318_v37 }
 0x22d   :  { %v5768_v45 = vpop.eup %5767  ;;  %v999_v59 = vadd.f32 1.0, %v5766_v22  ;;  %5793 = vrcp.f32 %v997_v43 }
 0x22e   :  { %v5770_v46 = vpop.eup %5769  ;;  %v1000_v41 = vadd.f32 1.0, %v5768_v45  ;;  %5795 = vrcp.f32 %v998_v44 }
 0x22f   :  { %v5772_v47 = vpop.eup %5771  ;;  %v1001_v39 = vadd.f32 1.0, %v5770_v46  ;;  %5797 = vrcp.f32 %v999_v59 }
 0x230   :  { %v5774_v48 = vpop.eup %5773  ;;  %v1002_v49 = vadd.f32 1.0, %v5772_v47  ;;  %5799 = vrcp.f32 %v1000_v41 }
 0x231   :  { %v5776_v50 = vpop.eup %5775  ;;  %v1003_v51 = vadd.f32 1.0, %v5774_v48  ;;  %5801 = vrcp.f32 %v1001_v39  ;;  %v1093_v48 = vrot.slane %v7794_v53, 2 }
 0x232   :  { %v5778_v52 = vpop.eup %5777  ;;  %v1004_v34 = vadd.f32 1.0, %v5776_v50  ;;  %5803 = vrcp.f32 %v1002_v49 }
 0x233   :  { %v5780_v35 = vpop.eup %5779  ;;  %5805 = vrcp.f32 %v1003_v51  ;;  %v1069_v36 = vadd.f32 1.0, %v5778_v52  ;;  %v1094_v51 = vrot.slane %v7796_v54, 2 }
 0x234   :  { %v5782_v22 = vpop.eup %5781  ;;  %5807 = vrcp.f32 %v1004_v34  ;;  %v1070_v37 = vadd.f32 1.0, %v5780_v35  ;;  %v1095_v34 = vrot.slane %v7800_v56, 2 }
 0x235   :  { %v5784_v38 = vpop.eup %5783  ;;  %v1071_v40 = vadd.f32 1.0, %v5782_v22  ;;  %5809 = vrcp.f32 %v1069_v36  ;;  %v1096_v36 = vrot.slane %v7802_v57, 2 }
 0x236   :  { %v5786_v43 = vpop.eup %5785  ;;  %v1072_v59 = vadd.f32 1.0, %v5784_v38  ;;  %5811 = vrcp.f32 %v1070_v37  ;;  %v1097_v37 = vrot.slane %v7798_v55, 2  ;;  %v1117_v38 = vrot.slane %v7794_v53, 3 }
 0x237   :  { %v5788_v44 = vpop.eup %5787  ;;  %v1073_v45 = vadd.f32 1.0, %v5786_v43  ;;  %5813 = vrcp.f32 %v1071_v40  ;;  %v1098_v43 = vrot.slane %v7804_v33, 2  ;;  %v1120_v53 = vrot.slane %v7802_v57, 3 }
 0x238   :  { %v5790_v46 = vpop.eup %5789  ;;  %v1074_v41 = vadd.f32 1.0, %v5788_v44  ;;  %5815 = vrcp.f32 %v1072_v59  ;;  %v1118_v59 = vrot.slane %v7796_v54, 3  ;;  %v5319_v54 = vmul.f32 -1.442695, %v1117_v38 }
 0x239   :  { %v5792_v47 = vpop.eup %5791  ;;  %v1075_v39 = vadd.f32 1.0, %v5790_v46  ;;  %5817 = vrcp.f32 %v1073_v45  ;;  %v1099_v45 = vrot.slane %v7806_v42, 2  ;;  %v1119_v46 = vrot.slane %v7800_v56, 3 }
 0x23a   :  { %v5794_v49 = vpop.eup %5793  ;;  %v1076_v50 = vadd.f32 1.0, %v5792_v47  ;;  %5819 = vrcp.f32 %v1074_v41  ;;  %v1100_v47 = vrot.slane %v7810_v26, 2  ;;  %v1123_v56 = vrot.slane %v7806_v42, 3 }
 0x23b   :  { %v5796_v52 = vpop.eup %5795  ;;  %5821 = vrcp.f32 %v1075_v39  ;;  %v5321_v16 = vmul.f32 -1.442695, %v1119_v46  ;;  %v1124_v57 = vrot.slane %v7810_v26, 3 }
 0x23c   :  { %v5798_v35 = vpop.eup %5797  ;;  %5823 = vrcp.f32 %v1076_v50 }
 0x23d   :  { %v7830_v22 = vpop.eup %5799  ;;  %5825 = vtanh.f32 %v1093_v48  ;;  %v1121_v48 = vrot.slane %v7798_v55, 3 }
 0x23e   :  { %v7834_v40 = vpop.eup %5801  ;;  %5827 = vtanh.f32 %v1094_v51  ;;  %v1122_v51 = vrot.slane %v7804_v33, 3  ;;  %v5325_v33 = vmul.f32 -1.442695, %v1123_v56 }
 0x23f   :  { %v7838_v44 = vpop.eup %5803  ;;  %5829 = vtanh.f32 %v1095_v34  ;;  %v5320_v34 = vmul.f32 -1.442695, %v1118_v59 }
 0x240   :  { %v7842_v41 = vpop.eup %5805  ;;  %5831 = vtanh.f32 %v1096_v36  ;;  %v5322_v36 = vmul.f32 -1.442695, %v1120_v53  ;;  %v5324_v38 = vmul.f32 -1.442695, %v1122_v51 }
 0x241   :  { %v7846_v39 = vpop.eup %5807  ;;  %5833 = vtanh.f32 %v1097_v37  ;;  %v5323_v37 = vmul.f32 -1.442695, %v1121_v48 }
 0x242   :  { %v5810_v50 = vpop.eup %5809  ;;  %5835 = vtanh.f32 %v1098_v43 }
 0x243   :  { %v5812_v60 = vpop.eup %5811  ;;  %5837 = vtanh.f32 %v1099_v45  ;;  %v5326_v45 = vmul.f32 -1.442695, %v1124_v57  ;;  %v1181_v42 = vmul.f32 %v5810_v50, %v7432_v32 }
 0x244   :  { %v5814_v17 = vpop.eup %5813  ;;  %5839 = vtanh.f32 %v1100_v47  ;;  %v1182_v26 = vmul.f32 %v5812_v60, %v7435_v0 }
 0x245   :  { %v5816_v5 = vpop.eup %5815  ;;  %5841 = vpow2.f32 %v5319_v54  ;;  %v1183_v48 = vmul.f32 %v5814_v17, %v7438_v30 }
 0x246   :  { %v5818_v55 = vpop.eup %5817  ;;  %5843 = vpow2.f32 %v5320_v34  ;;  %v1184_v51 = vmul.f32 %v5816_v5, %v7442_v6 }
 0x247   :  { %v5820_v43 = vpop.eup %5819  ;;  %5845 = vpow2.f32 %v5321_v16  ;;  %v1185_v57 = vmul.f32 %v5818_v55, %v7445_v2 }
 0x248   :  { %v5822_v59 = vpop.eup %5821  ;;  %5847 = vpow2.f32 %v5322_v36  ;;  %v1186_v0 = vmul.f32 %v5820_v43, %v7448_v1 }
 0x249   :  { %v5824_v15 = vpop.eup %5823  ;;  %5849 = vpow2.f32 %v5323_v37 }
 0x24a   :  { %v5826_v46 = vpop.eup %5825  ;;  %5851 = vpow2.f32 %v5324_v38 }
 0x24b   :  { %v5828_v47 = vpop.eup %5827  ;;  %5853 = vpow2.f32 %v5325_v33  ;;  %v1189_v53 = vmul.f32 %v5826_v46, %v5794_v49  ;;  %v1187_v33 = vmul.f32 %v5822_v59, %v7455_v61  ;;  %v1188_v46 = vmul.f32 %v5824_v15, %v7457_v58 }
 0x24c   :  { %v5830_v54 = vpop.eup %5829  ;;  %5855 = vpow2.f32 %v5326_v45  ;;  %v1190_v16 = vmul.f32 %v5828_v47, %v5796_v52 }
 0x24d   :  { %v5832_v34 = vpop.eup %5831  ;;  %v1191_v56 = vmul.f32 %v5830_v54, %v5798_v35  ;;  %v7857_v36 = vadd.f32 %v1189_v53, %v1181_v42 }
 0x24e   :  { %v5834_v32 = vpop.eup %5833  ;;  %v1192_v50 = vmul.f32 %v5832_v34, %v7830_v22  ;;  %v7861_v60 = vadd.f32 %v1190_v16, %v1182_v26 }
 0x24f   :  { %v5836_v49 = vpop.eup %5835  ;;  %v1193_v30 = vmul.f32 %v5834_v32, %v7834_v40  ;;  %v7864_v17 = vadd.f32 %v1191_v56, %v1183_v48  ;;  %5857 = vtanh.f32 %v7857_v36 }
 0x250   :  { %v5838_v6 = vpop.eup %5837  ;;  %v1194_v5 = vmul.f32 %v5836_v49, %v7838_v44  ;;  %v7868_v2 = vadd.f32 %v1192_v50, %v1184_v51  ;;  %5859 = vtanh.f32 %v7861_v60 }
 0x251   :  { %v5840_v52 = vpop.eup %5839  ;;  %v7871_v35 = vadd.f32 %v1193_v30, %v1185_v57  ;;  %5861 = vtanh.f32 %v7864_v17  ;;  %v1195_v53 = vmul.f32 %v5838_v6, %v7842_v41 }
 0x252   :  { %v5842_v1 = vpop.eup %5841  ;;  %v7874_v22 = vadd.f32 %v1194_v5, %v1186_v0  ;;  %5863 = vtanh.f32 %v7868_v2  ;;  %v1196_v16 = vmul.f32 %v5840_v52, %v7846_v39 }
 0x253   :  { %v5844_v40 = vpop.eup %5843  ;;  %v1157_v37 = vadd.f32 1.0, %v5842_v1  ;;  %5865 = vtanh.f32 %v7871_v35  ;;  %v7883_v56 = vadd.f32 %v1195_v53, %v1187_v33 }
 0x254   :  { %v5846_v55 = vpop.eup %5845  ;;  %v1158_v44 = vadd.f32 1.0, %v5844_v40  ;;  %5867 = vtanh.f32 %v7874_v22  ;;  %v7885_v59 = vadd.f32 %v1196_v16, %v1188_v46 }
 0x255   :  { %v5848_v38 = vpop.eup %5847  ;;  %v1159_v43 = vadd.f32 1.0, %v5846_v55  ;;  %5869 = vrcp.f32 %v1157_v37 }
 0x256   :  { %v5850_v45 = vpop.eup %5849  ;;  %v1160_v42 = vadd.f32 1.0, %v5848_v38  ;;  %5871 = vrcp.f32 %v1158_v44  ;;  %v8081_v44 = vld [vmem:[%s10181_s1 + $0x80] sm:$0xff] }
 0x257   :  { %v5852_v26 = vpop.eup %5851  ;;  %v1161_v47 = vadd.f32 1.0, %v5850_v45  ;;  %5873 = vrcp.f32 %v1159_v43 }
 0x258   :  { %v5854_v48 = vpop.eup %5853  ;;  %v1162_v54 = vadd.f32 1.0, %v5852_v26  ;;  %5875 = vrcp.f32 %v1160_v42 }
 0x259   :  { %v5856_v51 = vpop.eup %5855  ;;  %v1163_v34 = vadd.f32 1.0, %v5854_v48  ;;  %5877 = vrcp.f32 %v1161_v47  ;;  %v1287_v48 = vld [vmem:[%s10183_s2] sm:$0x1] }
 0x25a   :  { %v1164_v61 = vadd.f32 1.0, %v5856_v51  ;;  %5879 = vrcp.f32 %v1162_v54 }
 0x25b   :  { %5881 = vrcp.f32 %v1163_v34 }
 0x25c   :  { %v5858_v58 = vpop.eup %5857  ;;  %5883 = vrcp.f32 %v1164_v61 }
 0x25d   :  { %v5860_v15 = vpop.eup %5859  ;;  %5885 = vtanh.f32 %v7883_v56 }
 0x25e   :  { %v5862_v41 = vpop.eup %5861  ;;  %5887 = vtanh.f32 %v7885_v59 }
 0x25f   :  { %v5864_v57 = vpop.eup %5863 }
 0x260   :  { %v5866_v39 = vpop.eup %5865 }
 0x261   :  { %v5868_v32 = vpop.eup %5867 }
 0x262   :  { %v5870_v50 = vpop.eup %5869 }
 0x263   :  { %v5872_v0 = vpop.eup %5871  ;;  %v1213_v49 = vmul.f32 %v5870_v50, %v5858_v58  ;;  %v1290_v58 = vld [vmem:[%s10183_s2 + $0x4] sm:$0x1] }
 0x264   :  { %v5874_v30 = vpop.eup %5873  ;;  %v1214_v6 = vmul.f32 %v5872_v0, %v5860_v15 }
 0x265   :  { %v5876_v5 = vpop.eup %5875  ;;  %v1215_v52 = vmul.f32 %v5874_v30, %v5862_v41  ;;  %v5575_v1 = vpack.c.bf16 %v1213_v49, %v1213_v49 }
 0x266   :  { %v5878_v40 = vpop.eup %5877  ;;  %v1216_v37 = vmul.f32 %v5876_v5, %v5864_v57  ;;  %v5576_v55 = vpack.c.bf16 %v1214_v6, %v1214_v6  ;;  %v1335_v38 = vcombine.low %v1213_v49, %v1214_v6  ;;  %v1296_v5 = vld [vmem:[%s10183_s2 + $0xc] sm:$0x1] }
 0x267   :  { %v5880_v43 = vpop.eup %5879  ;;  %v1217_v33 = vmul.f32 %v5878_v40, %v5866_v39  ;;  %v5577_v45 = vpack.c.bf16 %v1215_v52, %v1215_v52  ;;  %v1254_v42 = vshll.u32 %v5575_v1, 16 }
 0x268   :  { %v5882_v46 = vpop.eup %5881  ;;  %v1218_v26 = vmul.f32 %v5880_v43, %v5868_v32  ;;  %v5578_v47 = vpack.c.bf16 %v1216_v37, %v1216_v37  ;;  %v1257_v53 = vshll.u32 %v5576_v55, 16  ;;  %v1336_v54 = vcombine.low %v1215_v52, %v1216_v37  ;;  %v1293_v32 = vld [vmem:[%s10183_s2 + $0x8] sm:$0x1]  ;;  %v1299_v55 = vld [vmem:[%s10183_s2 + $0x10] sm:$0x1] }
 0x269   :  { %v5884_v16 = vpop.eup %5883  ;;  %v5579_v51 = vpack.c.bf16 %v1217_v33, %v1217_v33  ;;  %v1260_v34 = vshll.u32 %v5577_v45, 16  ;;  %v1288_v61 = vsel %vm7890_vm4, %v1254_v42, %v1287_v48  ;;  %v1345_v50 = vrot.slane %v1335_v38, %v7322_v11  ;;  %v1302_v42 = vld [vmem:[%s10183_s2 + $0x14] sm:$0x1] }
 0x26a   :  { %v5886_v15 = vpop.eup %5885  ;;  %v5580_v41 = vpack.c.bf16 %v1218_v26, %v1218_v26  ;;  %v1263_v57 = vshll.u32 %v5578_v47, 16  ;;  %1289 = vst [vmem:[%s10183_s2] sm:$0x1] %v1288_v61  ;;  %v1291_v39 = vsel %vm7890_vm4, %v1257_v53, %v1290_v58  ;;  %v1352_v52 = vrot.slane %v1336_v54, %v7322_v11  ;;  %v1305_v54 = vld [vmem:[%s10183_s2 + $0x18] sm:$0x1]  ;;  %v1308_v61 = vld [vmem:[%s10183_s2 + $0x1c] sm:$0x1] }
 0x26b   :  { %v5888_v0 = vpop.eup %5887  ;;  %v1219_v49 = vmul.f32 %v5886_v15, %v5882_v46  ;;  %v1266_v30 = vshll.u32 %v5579_v51, 16  ;;  %1292 = vst [vmem:[%s10183_s2 + $0x4] sm:$0x1] %v1291_v39  ;;  %v1294_v6 = vsel %vm7890_vm4, %v1260_v34, %v1293_v32  ;;  %v1337_v38 = vcombine.low %v1217_v33, %v1218_v26  ;;  %v8087_v32 = vld [vmem:[%s10181_s1 + $0x90] sm:$0xff] }
 0x26c   :  { %v1220_v1 = vmul.f32 %v5888_v0, %v5884_v16  ;;  %v1269_v40 = vshll.u32 %v5580_v41, 16  ;;  %1295 = vst [vmem:[%s10183_s2 + $0x8] sm:$0x1] %v1294_v6  ;;  %v1297_v37 = vsel %vm7890_vm4, %v1263_v57, %v1296_v5  ;;  %v1367_v47 = vcombine.low %v1345_v50, %v1352_v52  ;;  %v8093_v50 = vld [vmem:[%s10181_s1 + $0x68] sm:$0xff]  ;;  %v8099_v0 = vld [vmem:[%s10181_s1 + $0x78] sm:$0xff]  ;;  %v8129_v52 = vld [vmem:[%s10181_s1 + $0x40] sm:$0xff] }
 0x26d   :  { %v5581_v43 = vpack.c.bf16 %v1219_v49, %v1219_v49  ;;  %1298 = vst [vmem:[%s10183_s2 + $0xc] sm:$0x1] %v1297_v37  ;;  %v1300_v45 = vsel %vm7890_vm4, %v1266_v30, %v1299_v55  ;;  %v1359_v16 = vrot.slane %v1337_v38, %v7322_v11  ;;  %v8111_v30 = vld [vmem:[%s10181_s1 + $0x70] sm:$0xff]  ;;  %v8117_v6 = vld [vmem:[%s10181_s1 + $0x48] sm:$0xff]  ;;  %v8123_v5 = vld [vmem:[%s10181_s1 + $0x58] sm:$0xff] }
 0x26e   :  { %v5582_v46 = vpack.c.bf16 %v1220_v1, %v1220_v1  ;;  %1301 = vst [vmem:[%s10183_s2 + $0x10] sm:$0x1] %v1300_v45  ;;  %v1303_v33 = vsel %vm7890_vm4, %v1269_v40, %v1302_v42  ;;  %v1338_v26 = vcombine.low %v1219_v49, %v1220_v1  ;;  %v1375_v41 = vrot.slane %v1367_v47, %v7322_v11  ;;  %v8105_v49 = vld [vmem:[%s10181_s1 + $0x60] sm:$0xff]  ;;  %v8135_v1 = vld [vmem:[%s10181_s1 + $0x50] sm:$0xff]  ;;  %v8141_v40 = vld [vmem:[%s10181_s1 + $0x28] sm:$0xff] }
 0x26f   :  { %v1272_v53 = vshll.u32 %v5581_v43, 16  ;;  %1304 = vst [vmem:[%s10183_s2 + $0x14] sm:$0x1] %v1303_v33  ;;  %10287 = vst [vmem:[#allocation6_spill] sm:$0xff] %v8129_v52  ;;  %v8147_v37 = vld [vmem:[%s10181_s1 + $0x38] sm:$0xff]  ;;  %v8153_v55 = vld [vmem:[%s10181_s1 + $0x20] sm:$0xff] }
 0x270   :  { %v1275_v48 = vshll.u32 %v5582_v46, 16  ;;  %v1366_v51 = vrot.slane %v1338_v26, %v7322_v11  ;;  %10288 = vst [vmem:[#allocation7_spill] sm:$0xff] %v8135_v1  ;;  %10289 = vst [vmem:[#allocation8_spill] sm:$0xff] %v8141_v40  ;;  %v8159_v38 = vld [vmem:[%s10181_s1 + $0x30] sm:$0xff]  ;;  %v8165_v43 = vld [vmem:[%s10181_s1 + $0x8] sm:$0xff]  ;;  %v10296_v46 = vmov 0.0  }
 0x271   :  { %v1306_v34 = vsel %vm7890_vm4, %v1272_v53, %v1305_v54  ;;  %10290 = vst [vmem:[#allocation9_spill] sm:$0xff] %v8147_v37  ;;  %10291 = vst [vmem:[#allocation10_spill] sm:$0xff] %v8153_v55  ;;  %v8171_v45 = vld [vmem:[%s10181_s1 + $0x18] sm:$0xff]  ;;  %v8177_v42 = vld [vmem:[%s10181_s1] sm:$0xff] }
 0x272   :  { %1307 = vst [vmem:[%s10183_s2 + $0x18] sm:$0x1] %v1306_v34  ;;  %v1309_v58 = vsel %vm7890_vm4, %v1275_v48, %v1308_v61  ;;  %v1368_v15 = vcombine.low %v1359_v16, %v1366_v51  ;;  %v8184_v33 = vld [vmem:[%s10181_s1 + $0x10] sm:$0xff]  ;;  %v10298_v26 = vld [vmem:[#allocation4_spill] sm:$0xff]  ;;  %v10299_v47 = vld [vmem:[#allocation5_spill] sm:$0xff] }
 0x273   :  { %1310 = vst [vmem:[%s10183_s2 + $0x1c] sm:$0x1] %v1309_v58 }
 0x274   :  { %v1382_v57 = vrot.slane %v1368_v15, %v7322_v11 }
 0x276   :  { %v1383_v39 = vcombine.low %v1375_v41, %v1382_v57 }
 0x278   :  { %1450 = vmatmul.mubr.f32.vlgmr.msra.gmra.mxu0 %v1383_v39  ;;  %1521 = vmatmul.mubr.f32.vlgmr.msra.gmra.mxu1 %v1383_v39 }
 0x279   :  { %2013 = vmatpush1.msra.mxu0 %v7539_v25  ;;  %2084 = vmatpush1.msra.mxu1 %v7545_v62  ;;  %v10279_v25 = vld [vmem:[#allocation11_spill] sm:$0xff]  ;;  %v10280_v62 = vld [vmem:[#allocation12_spill] sm:$0xff] }
 0x27a   :  { %2014 = vmatprep.subr.mxu0 %v7551_v29  ;;  %2085 = vmatprep.subr.mxu1 %v7557_v4  ;;  %v10281_v29 = vld [vmem:[#allocation13_spill] sm:$0xff]  ;;  %v10282_v4 = vld [vmem:[#allocation14_spill] sm:$0xff]  ;;  %10292 = vst [vmem:[#allocation11_spill] sm:$0xff] %v8159_v38  ;;  %10293 = vst [vmem:[#allocation12_spill] sm:$0xff] %v8165_v43 }
 0x27b   :  { %2015 = vmatpush1.msra.mxu0 %v7563_v20  ;;  %2086 = vmatpush1.msra.mxu1 %v7569_v21  ;;  %v10283_v20 = vld [vmem:[#allocation15_spill] sm:$0xff]  ;;  %v10284_v21 = vld [vmem:[#allocation16_spill] sm:$0xff]  ;;  %10294 = vst [vmem:[#allocation13_spill] sm:$0xff] %v8171_v45  ;;  %10295 = vst [vmem:[#allocation14_spill] sm:$0xff] %v8177_v42 }
 0x27c   :  { %2016 = vmatprep.subr.mxu0 %v7575_v18  ;;  %2087 = vmatprep.subr.mxu1 %v7581_v9  ;;  %v10285_v18 = vld [vmem:[#allocation17_spill] sm:$0xff]  ;;  %v10286_v9 = vld [vmem:[#allocation18_spill] sm:$0xff]  ;;  %10297 = vst [vmem:[#allocation15_spill] sm:$0xff] %v8184_v33 }
 0x27d   :  { %2017 = vmatpush1.msra.mxu0 %v7587_v24  ;;  %2088 = vmatpush1.msra.mxu1 %v7593_v8  ;;  %v7997_v24 = vld [vmem:[%s10181_s1 + $0xe8] sm:$0xff]  ;;  %v8003_v8 = vld [vmem:[%s10181_s1 + $0xf8] sm:$0xff] }
 0x27e   :  { %2018 = vmatprep.subr.mxu0 %v7599_v23  ;;  %2089 = vmatprep.subr.mxu1 %v7605_v12  ;;  %v8009_v23 = vld [vmem:[%s10181_s1 + $0xe0] sm:$0xff]  ;;  %v8015_v12 = vld [vmem:[%s10181_s1 + $0xf0] sm:$0xff] }
 0x27f   :  { %2019 = vmatpush1.msra.mxu0 %v7611_v27  ;;  %2090 = vmatpush1.msra.mxu1 %v7617_v19  ;;  %v8021_v27 = vld [vmem:[%s10181_s1 + $0xc8] sm:$0xff]  ;;  %v8027_v19 = vld [vmem:[%s10181_s1 + $0xd8] sm:$0xff] }
 0x280   :  { %2020 = vmatprep.subr.mxu0 %v7623_v28  ;;  %2091 = vmatprep.subr.mxu1 %v7629_v3  ;;  %v8033_v28 = vld [vmem:[%s10181_s1 + $0xc0] sm:$0xff]  ;;  %v8039_v3 = vld [vmem:[%s10181_s1 + $0xd0] sm:$0xff] }
 0x281   :  { %2021 = vmatpush1.msra.mxu0 %v7635_v31  ;;  %2092 = vmatpush1.msra.mxu1 %v7641_v13  ;;  %v8045_v31 = vld [vmem:[%s10181_s1 + $0xa8] sm:$0xff]  ;;  %v8051_v13 = vld [vmem:[%s10181_s1 + $0xb8] sm:$0xff] }
 0x282   :  { %2022 = vmatprep.subr.mxu0 %v7647_v63  ;;  %2093 = vmatprep.subr.mxu1 %v7653_v7  ;;  %v8057_v63 = vld [vmem:[%s10181_s1 + $0xa0] sm:$0xff]  ;;  %v8063_v7 = vld [vmem:[%s10181_s1 + $0xb0] sm:$0xff] }
 0x283   :  { %2023 = vmatpush1.msra.mxu0 %v7659_v10  ;;  %2094 = vmatpush1.msra.mxu1 %v7665_v14  ;;  %v8069_v10 = vld [vmem:[%s10181_s1 + $0x88] sm:$0xff]  ;;  %v8075_v14 = vld [vmem:[%s10181_s1 + $0x98] sm:$0xff] }
 0x284   :  { %2024 = vmatprep.subr.mxu0 %v10279_v25  ;;  %2095 = vmatprep.subr.mxu1 %v10280_v62 }
 0x285   :  { %2025 = vmatpush1.msra.mxu0 %v10281_v29  ;;  %2096 = vmatpush1.msra.mxu1 %v10282_v4 }
 0x286   :  { %2026 = vmatprep.subr.mxu0 %v10283_v20  ;;  %2097 = vmatprep.subr.mxu1 %v10284_v21  ;;  %v5335_v20 = vld [vmem:[%s10182_s0 + $0x2] ss:$8 sm:$0xf] }
 0x287   :  { %2027 = vmatpush1.msra.mxu0 %v10285_v18  ;;  %2098 = vmatpush1.msra.mxu1 %v10286_v9  ;;  %v5336_v21 = vld [vmem:[%s10182_s0 + $0x22] ss:$8 sm:$0xf] }
 0x288   :  { %2028 = vmatprep.subr.mxu0 %v7997_v24  ;;  %2099 = vmatprep.subr.mxu1 %v8003_v8  ;;  %v5337_v18 = vld [vmem:[%s10182_s0 + $0x42] ss:$8 sm:$0xf] }
 0x289   :  { %2029 = vmatpush1.msra.mxu0 %v8009_v23  ;;  %2100 = vmatpush1.msra.mxu1 %v8015_v12  ;;  %v5339_v9 = vld [vmem:[%s10182_s0 + $0x82] ss:$8 sm:$0xf] }
 0x28a   :  { %2030 = vmatprep.subr.mxu0 %v8021_v27  ;;  %2101 = vmatprep.subr.mxu1 %v8027_v19 }
 0x28b   :  { %2031 = vmatpush1.msra.mxu0 %v8033_v28  ;;  %2102 = vmatpush1.msra.mxu1 %v8039_v3 }
 0x28c   :  { %2032 = vmatprep.subr.mxu0 %v8045_v31  ;;  %2103 = vmatprep.subr.mxu1 %v8051_v13 }
 0x28d   :  { %2033 = vmatpush1.msra.mxu0 %v8057_v63  ;;  %2104 = vmatpush1.msra.mxu1 %v8063_v7 }
 0x28e   :  { %2034 = vmatprep.subr.mxu0 %v8069_v10  ;;  %2105 = vmatprep.subr.mxu1 %v8075_v14 }
 0x28f   :  { %2035 = vmatpush1.msra.mxu0 %v8081_v44  ;;  %2106 = vmatpush1.msra.mxu1 %v8087_v32 }
 0x290   :  { %2036 = vmatprep.subr.mxu0 %v8093_v50  ;;  %2107 = vmatprep.subr.mxu1 %v8099_v0 }
 0x291   :  { %2037 = vmatpush1.msra.mxu0 %v8105_v49  ;;  %2108 = vmatpush1.msra.mxu1 %v8111_v30 }
 0x292   :  { %2038 = vmatprep.subr.mxu0 %v8117_v6  ;;  %2109 = vmatprep.subr.mxu1 %v8123_v5 }
 0x293   :  { %2039 = vmatpush1.msra.mxu0 %v8129_v52  ;;  %2110 = vmatpush1.msra.mxu1 %v8135_v1 }
 0x294   :  { %2040 = vmatprep.subr.mxu0 %v8141_v40  ;;  %2111 = vmatprep.subr.mxu1 %v8147_v37 }
 0x295   :  { %2041 = vmatpush1.msra.mxu0 %v8153_v55  ;;  %2112 = vmatpush1.msra.mxu1 %v8159_v38 }
 0x296   :  { %2042 = vmatprep.subr.mxu0 %v8165_v43  ;;  %2113 = vmatprep.subr.mxu1 %v8171_v45 }
 0x297   :  { %2043 = vmatpush1.msra.mxu0 %v8177_v42  ;;  %2076 = vmatprep.mubr.f32.mxu0 %v10296_v46 }
 0x298   :  { %2114 = vmatpush1.msra.mxu1 %v8184_v33  ;;  %2147 = vmatprep.mubr.f32.mxu1 %v10296_v46 }
 0x299   :  { %2662 = vmatprep.subr.mxu0 %v10298_v26  ;;  %2733 = vmatprep.subr.mxu1 %v10299_v47 }
 0x338   :  { %v1451_v53 = vpop.f32.mrf.mxu0  ;;  %v1522_v48 = vpop.f32.mrf.mxu1 }
 0x33a   :  { %v1453_v54 = vpop.f32.mrf.mxu0  ;;  %v1524_v16 = vpop.f32.mrf.mxu1 }
 0x33b   :  { %v1531_v51 = vcombine.low %v1451_v53, %v1453_v54  ;;  %v1532_v34 = vcombine.high %v1451_v53, %v1453_v54  ;;  %v1533_v61 = vcombine.low %v1522_v48, %v1524_v16  ;;  %v1534_v58 = vcombine.high %v1522_v48, %v1524_v16  ;;  %v5338_v54 = vld [vmem:[%s10182_s0 + $0x62] ss:$8 sm:$0xf] }
 0x33c   :  { %v5340_v16 = vld [vmem:[%s10182_s0 + $0xa2] ss:$8 sm:$0xf] }
 0x33d   :  { %v1541_v15 = vrot.slane %v1531_v51, %v7322_v11  ;;  %v1548_v41 = vrot.slane %v1532_v34, %v7322_v11  ;;  %v1555_v57 = vrot.slane %v1533_v61, %v7322_v11  ;;  %v1562_v39 = vrot.slane %v1534_v58, %v7322_v11  ;;  %v5341_v51 = vld [vmem:[%s10182_s0 + $0xc2] ss:$8 sm:$0xf] }
 0x33f   :  { %v1563_v25 = vcombine.low %v1541_v15, %v1555_v57  ;;  %v1564_v62 = vcombine.high %v1541_v15, %v1555_v57  ;;  %v1565_v29 = vcombine.low %v1548_v41, %v1562_v39  ;;  %v1566_v4 = vcombine.high %v1548_v41, %v1562_v39  ;;  %v5342_v41 = vld [vmem:[%s10182_s0 + $0xe2] ss:$8 sm:$0xf] }
 0x341   :  { %v1573_v26 = vrot.slane %v1563_v25, %v7322_v11  ;;  %v1580_v47 = vrot.slane %v1565_v29, %v7322_v11  ;;  %v1587_v53 = vrot.slane %v1564_v62, %v7322_v11  ;;  %v1594_v48 = vrot.slane %v1566_v4, %v7322_v11 }
 0x343   :  { %v1595_v34 = vcombine.high %v1573_v26, %v1573_v26  ;;  %v1596_v61 = vcombine.high %v1580_v47, %v1580_v47  ;;  %v1597_v58 = vcombine.high %v1587_v53, %v1587_v53  ;;  %v1598_v15 = vcombine.high %v1594_v48, %v1594_v48 }
 0x344   :  { %v8222_v57 = vadd.f32 %v5335_v20, %v1573_v26  ;;  %v8224_v39 = vadd.f32 %v5336_v21, %v1587_v53  ;;  %v8226_v25 = vadd.f32 %v5339_v9, %v1580_v47  ;;  %v8232_v4 = vadd.f32 %v5340_v16, %v1594_v48 }
 0x345   :  { %v8228_v62 = vadd.f32 %v5337_v18, %v1595_v34  ;;  %v8230_v29 = vadd.f32 %v5338_v54, %v1597_v58  ;;  %v8234_v33 = vadd.f32 %v5341_v51, %v1596_v61  ;;  %v8238_v45 = vadd.f32 %v5342_v41, %v1598_v15 }
 0x346   :  { %v5343_v46 = vmul.f32 -1.442695, %v8222_v57  ;;  %v5344_v42 = vmul.f32 -1.442695, %v8224_v39  ;;  %v5347_v18 = vmul.f32 -1.442695, %v8226_v25 }
 0x347   :  { %v5345_v20 = vmul.f32 -1.442695, %v8228_v62  ;;  %v5346_v21 = vmul.f32 -1.442695, %v8230_v29  ;;  %v1671_v9 = vrot.slane %v8222_v57, 1  ;;  %v1672_v47 = vrot.slane %v8224_v39, 1 }
 0x348   :  { %5889 = vpow2.f32 %v5343_v46  ;;  %v5348_v26 = vmul.f32 -1.442695, %v8232_v4  ;;  %v5349_v53 = vmul.f32 -1.442695, %v8234_v33  ;;  %v1673_v48 = vrot.slane %v8228_v62, 1 }
 0x349   :  { %5891 = vpow2.f32 %v5344_v42  ;;  %v5350_v54 = vmul.f32 -1.442695, %v8238_v45  ;;  %v1674_v16 = vrot.slane %v8230_v29, 1  ;;  %v1675_v46 = vrot.slane %v8226_v25, 1 }
 0x34a   :  { %5893 = vpow2.f32 %v5345_v20  ;;  %v5351_v51 = vmul.f32 -1.442695, %v1671_v9  ;;  %v1676_v42 = vrot.slane %v8232_v4, 1  ;;  %v5352_v34 = vmul.f32 -1.442695, %v1672_v47 }
 0x34b   :  { %5895 = vpow2.f32 %v5346_v21  ;;  %v1677_v61 = vrot.slane %v8234_v33, 1  ;;  %v5353_v58 = vmul.f32 -1.442695, %v1673_v48  ;;  %v1678_v15 = vrot.slane %v8238_v45, 1 }
 0x34c   :  { %5897 = vpow2.f32 %v5347_v18  ;;  %v5354_v41 = vmul.f32 -1.442695, %v1674_v16  ;;  %v5355_v20 = vmul.f32 -1.442695, %v1675_v46  ;;  %v5356_v21 = vmul.f32 -1.442695, %v1676_v42 }
 0x34d   :  { %5899 = vpow2.f32 %v5348_v26  ;;  %v5357_v18 = vmul.f32 -1.442695, %v1677_v61  ;;  %v5358_v9 = vmul.f32 -1.442695, %v1678_v15 }
 0x34e   :  { %5901 = vpow2.f32 %v5349_v53 }
 0x34f   :  { %5903 = vpow2.f32 %v5350_v54 }
 0x350   :  { %5905 = vpow2.f32 %v5351_v51 }
 0x351   :  { %5907 = vpow2.f32 %v5352_v34 }
 0x352   :  { %5909 = vpow2.f32 %v5353_v58 }
 0x353   :  { %5911 = vpow2.f32 %v5354_v41 }
 0x354   :  { %5913 = vpow2.f32 %v5355_v20 }
 0x355   :  { %v5890_v26 = vpop.eup %5889  ;;  %5915 = vpow2.f32 %v5356_v21 }
 0x356   :  { %v5892_v47 = vpop.eup %5891  ;;  %v1639_v53 = vadd.f32 1.0, %v5890_v26  ;;  %5917 = vpow2.f32 %v5357_v18 }
 0x357   :  { %v5894_v43 = vpop.eup %5893  ;;  %v1640_v48 = vadd.f32 1.0, %v5892_v47  ;;  %5919 = vpow2.f32 %v5358_v9 }
 0x358   :  { %v5896_v54 = vpop.eup %5895  ;;  %v1641_v38 = vadd.f32 1.0, %v5894_v43  ;;  %5921 = vrcp.f32 %v1639_v53 }
 0x359   :  { %v5898_v16 = vpop.eup %5897  ;;  %v1642_v46 = vadd.f32 1.0, %v5896_v54  ;;  %5923 = vrcp.f32 %v1640_v48 }
 0x35a   :  { %v5900_v51 = vpop.eup %5899  ;;  %v1643_v42 = vadd.f32 1.0, %v5898_v16  ;;  %5925 = vrcp.f32 %v1641_v38 }
 0x35b   :  { %v5902_v34 = vpop.eup %5901  ;;  %v1644_v61 = vadd.f32 1.0, %v5900_v51  ;;  %5927 = vrcp.f32 %v1642_v46 }
 0x35c   :  { %v5904_v58 = vpop.eup %5903  ;;  %v1645_v15 = vadd.f32 1.0, %v5902_v34  ;;  %5929 = vrcp.f32 %v1643_v42  ;;  %v1735_v34 = vrot.slane %v8222_v57, 2 }
 0x35d   :  { %v5906_v41 = vpop.eup %5905  ;;  %v1646_v20 = vadd.f32 1.0, %v5904_v58  ;;  %5931 = vrcp.f32 %v1644_v61 }
 0x35e   :  { %v5908_v21 = vpop.eup %5907  ;;  %5933 = vrcp.f32 %v1645_v15  ;;  %v1711_v18 = vadd.f32 1.0, %v5906_v41  ;;  %v1736_v15 = vrot.slane %v8224_v39, 2 }
 0x35f   :  { %v5910_v43 = vpop.eup %5909  ;;  %5935 = vrcp.f32 %v1646_v20  ;;  %v1712_v9 = vadd.f32 1.0, %v5908_v21  ;;  %v1737_v20 = vrot.slane %v8228_v62, 2 }
 0x360   :  { %v5912_v26 = vpop.eup %5911  ;;  %v1713_v47 = vadd.f32 1.0, %v5910_v43  ;;  %5937 = vrcp.f32 %v1711_v18  ;;  %v1738_v18 = vrot.slane %v8230_v29, 2 }
 0x361   :  { %v5914_v53 = vpop.eup %5913  ;;  %v1714_v38 = vadd.f32 1.0, %v5912_v26  ;;  %5939 = vrcp.f32 %v1712_v9  ;;  %v1739_v9 = vrot.slane %v8226_v25, 2  ;;  %v1759_v26 = vrot.slane %v8222_v57, 3 }
 0x362   :  { %v5916_v48 = vpop.eup %5915  ;;  %v1715_v54 = vadd.f32 1.0, %v5914_v53  ;;  %5941 = vrcp.f32 %v1713_v47  ;;  %v1740_v53 = vrot.slane %v8232_v4, 2  ;;  %v1762_v57 = vrot.slane %v8230_v29, 3 }
 0x363   :  { %v5918_v16 = vpop.eup %5917  ;;  %v1716_v46 = vadd.f32 1.0, %v5916_v48  ;;  %5943 = vrcp.f32 %v1714_v38  ;;  %v1760_v38 = vrot.slane %v8224_v39, 3  ;;  %v5359_v39 = vmul.f32 -1.442695, %v1759_v26 }
 0x364   :  { %v5920_v51 = vpop.eup %5919  ;;  %v1717_v42 = vadd.f32 1.0, %v5918_v16  ;;  %5945 = vrcp.f32 %v1715_v54  ;;  %v1741_v54 = vrot.slane %v8234_v33, 2  ;;  %v1761_v16 = vrot.slane %v8228_v62, 3 }
 0x365   :  { %v5922_v61 = vpop.eup %5921  ;;  %v1718_v58 = vadd.f32 1.0, %v5920_v51  ;;  %5947 = vrcp.f32 %v1716_v46  ;;  %v1742_v51 = vrot.slane %v8238_v45, 2  ;;  %v1765_v62 = vrot.slane %v8234_v33, 3 }
 0x366   :  { %v5924_v41 = vpop.eup %5923  ;;  %5949 = vrcp.f32 %v1717_v42  ;;  %v5361_v37 = vmul.f32 -1.442695, %v1761_v16  ;;  %v1766_v29 = vrot.slane %v8238_v45, 3 }
 0x367   :  { %v5926_v21 = vpop.eup %5925  ;;  %5951 = vrcp.f32 %v1718_v58 }
 0x368   :  { %v8258_v43 = vpop.eup %5927  ;;  %5953 = vtanh.f32 %v1735_v34  ;;  %v1763_v34 = vrot.slane %v8226_v25, 3 }
 0x369   :  { %v8262_v47 = vpop.eup %5929  ;;  %5955 = vtanh.f32 %v1736_v15  ;;  %v1764_v15 = vrot.slane %v8232_v4, 3  ;;  %v5365_v4 = vmul.f32 -1.442695, %v1765_v62 }
 0x36a   :  { %v8266_v48 = vpop.eup %5931  ;;  %5957 = vtanh.f32 %v1737_v20  ;;  %v5360_v20 = vmul.f32 -1.442695, %v1760_v38 }
 0x36b   :  { %v8270_v46 = vpop.eup %5933  ;;  %5959 = vtanh.f32 %v1738_v18  ;;  %v5362_v18 = vmul.f32 -1.442695, %v1762_v57  ;;  %v5364_v26 = vmul.f32 -1.442695, %v1764_v15 }
 0x36c   :  { %v8274_v42 = vpop.eup %5935  ;;  %5961 = vtanh.f32 %v1739_v9  ;;  %v5363_v9 = vmul.f32 -1.442695, %v1763_v34 }
 0x36d   :  { %v5938_v58 = vpop.eup %5937  ;;  %5963 = vtanh.f32 %v1740_v53 }
 0x36e   :  { %v5940_v55 = vpop.eup %5939  ;;  %5965 = vtanh.f32 %v1741_v54  ;;  %v5366_v54 = vmul.f32 -1.442695, %v1766_v29  ;;  %v1823_v33 = vmul.f32 %v5938_v58, %v7857_v36 }
 0x36f   :  { %v5942_v40 = vpop.eup %5941  ;;  %5967 = vtanh.f32 %v1742_v51  ;;  %v1824_v45 = vmul.f32 %v5940_v55, %v7861_v60 }
 0x370   :  { %v5944_v1 = vpop.eup %5943  ;;  %5969 = vpow2.f32 %v5359_v39  ;;  %v1825_v34 = vmul.f32 %v5942_v40, %v7864_v17 }
 0x371   :  { %v5946_v25 = vpop.eup %5945  ;;  %5971 = vpow2.f32 %v5360_v20  ;;  %v1826_v15 = vmul.f32 %v5944_v1, %v7868_v2 }
 0x372   :  { %v5948_v53 = vpop.eup %5947  ;;  %5973 = vpow2.f32 %v5361_v37  ;;  %v1827_v29 = vmul.f32 %v5946_v25, %v7871_v35 }
 0x373   :  { %v5950_v38 = vpop.eup %5949  ;;  %5975 = vpow2.f32 %v5362_v18  ;;  %v1828_v60 = vmul.f32 %v5948_v53, %v7874_v22 }
 0x374   :  { %v5952_v52 = vpop.eup %5951  ;;  %5977 = vpow2.f32 %v5363_v9 }
 0x375   :  { %v5954_v16 = vpop.eup %5953  ;;  %5979 = vpow2.f32 %v5364_v26 }
 0x376   :  { %v5956_v51 = vpop.eup %5955  ;;  %5981 = vpow2.f32 %v5365_v4  ;;  %v1831_v57 = vmul.f32 %v5954_v16, %v5922_v61  ;;  %v1829_v4 = vmul.f32 %v5950_v38, %v7883_v56  ;;  %v1830_v16 = vmul.f32 %v5952_v52, %v7885_v59 }
 0x377   :  { %v5958_v39 = vpop.eup %5957  ;;  %5983 = vpow2.f32 %v5366_v54  ;;  %v1832_v37 = vmul.f32 %v5956_v51, %v5924_v41 }
 0x378   :  { %v5960_v20 = vpop.eup %5959  ;;  %v1833_v62 = vmul.f32 %v5958_v39, %v5926_v21  ;;  %v8285_v18 = vadd.f32 %v1831_v57, %v1823_v33 }
 0x379   :  { %v5962_v36 = vpop.eup %5961  ;;  %v1834_v58 = vmul.f32 %v5960_v20, %v8258_v43  ;;  %v8289_v55 = vadd.f32 %v1832_v37, %v1824_v45 }
 0x37a   :  { %v5964_v61 = vpop.eup %5963  ;;  %v1835_v17 = vmul.f32 %v5962_v36, %v8262_v47  ;;  %v8292_v40 = vadd.f32 %v1833_v62, %v1825_v34  ;;  %5985 = vtanh.f32 %v8285_v18 }
 0x37b   :  { %v5966_v2 = vpop.eup %5965  ;;  %v1836_v1 = vmul.f32 %v5964_v61, %v8266_v48  ;;  %v8296_v35 = vadd.f32 %v1834_v58, %v1826_v15  ;;  %5987 = vtanh.f32 %v8289_v55 }
 0x37c   :  { %v5968_v41 = vpop.eup %5967  ;;  %v8299_v21 = vadd.f32 %v1835_v17, %v1827_v29  ;;  %5989 = vtanh.f32 %v8292_v40  ;;  %v1837_v57 = vmul.f32 %v5966_v2, %v8270_v46 }
 0x37d   :  { %v5970_v22 = vpop.eup %5969  ;;  %v8302_v43 = vadd.f32 %v1836_v1, %v1828_v60  ;;  %5991 = vtanh.f32 %v8296_v35  ;;  %v1838_v37 = vmul.f32 %v5968_v41, %v8274_v42 }
 0x37e   :  { %v5972_v47 = vpop.eup %5971  ;;  %v1799_v9 = vadd.f32 1.0, %v5970_v22  ;;  %5993 = vtanh.f32 %v8299_v21  ;;  %v8311_v62 = vadd.f32 %v1837_v57, %v1829_v4 }
 0x37f   :  { %v5974_v25 = vpop.eup %5973  ;;  %v1800_v48 = vadd.f32 1.0, %v5972_v47  ;;  %5995 = vtanh.f32 %v8302_v43  ;;  %v8313_v38 = vadd.f32 %v1838_v37, %v1830_v16  ;;  %v1920_v37 = vld [vmem:[%s10183_s2 + $0x8] sm:$0x2] }
 0x380   :  { %v5976_v26 = vpop.eup %5975  ;;  %v1801_v53 = vadd.f32 1.0, %v5974_v25  ;;  %5997 = vrcp.f32 %v1799_v9 }
 0x381   :  { %v5978_v54 = vpop.eup %5977  ;;  %v1802_v33 = vadd.f32 1.0, %v5976_v26  ;;  %5999 = vrcp.f32 %v1800_v48  ;;  %v1914_v26 = vld [vmem:[%s10183_s2] sm:$0x2]  ;;  %v8401_v48 = vld [vmem:[%s10181_s1 + $0x1f0] sm:$0xff] }
 0x382   :  { %v5980_v45 = vpop.eup %5979  ;;  %v1803_v51 = vadd.f32 1.0, %v5978_v54  ;;  %6001 = vrcp.f32 %v1801_v53 }
 0x383   :  { %v5982_v34 = vpop.eup %5981  ;;  %v1804_v39 = vadd.f32 1.0, %v5980_v45  ;;  %6003 = vrcp.f32 %v1802_v33  ;;  %v1917_v45 = vld [vmem:[%s10183_s2 + $0x4] sm:$0x2] }
 0x384   :  { %v5984_v15 = vpop.eup %5983  ;;  %v1805_v20 = vadd.f32 1.0, %v5982_v34  ;;  %6005 = vrcp.f32 %v1803_v51 }
 0x385   :  { %v1806_v56 = vadd.f32 1.0, %v5984_v15  ;;  %6007 = vrcp.f32 %v1804_v39 }
 0x386   :  { %6009 = vrcp.f32 %v1805_v20 }
 0x387   :  { %v5986_v59 = vpop.eup %5985  ;;  %6011 = vrcp.f32 %v1806_v56 }
 0x388   :  { %v5988_v52 = vpop.eup %5987  ;;  %6013 = vtanh.f32 %v8311_v62 }
 0x389   :  { %v5990_v46 = vpop.eup %5989  ;;  %6015 = vtanh.f32 %v8313_v38 }
 0x38a   :  { %v5992_v29 = vpop.eup %5991 }
 0x38b   :  { %v5994_v42 = vpop.eup %5993 }
 0x38c   :  { %v5996_v36 = vpop.eup %5995 }
 0x38d   :  { %v5998_v58 = vpop.eup %5997 }
 0x38e   :  { %v6000_v60 = vpop.eup %5999  ;;  %v1855_v61 = vmul.f32 %v5998_v58, %v5986_v59 }
 0x38f   :  { %v6002_v17 = vpop.eup %6001  ;;  %v1856_v2 = vmul.f32 %v6000_v60, %v5988_v52  ;;  %v1926_v60 = vld [vmem:[%s10183_s2 + $0x10] sm:$0x2] }
 0x390   :  { %v6004_v1 = vpop.eup %6003  ;;  %v1857_v41 = vmul.f32 %v6002_v17, %v5990_v46  ;;  %v5583_v22 = vpack.c.bf16 %v1855_v61, %v1855_v61  ;;  %v1923_v46 = vld [vmem:[%s10183_s2 + $0xc] sm:$0x2] }
 0x391   :  { %v6006_v47 = vpop.eup %6005  ;;  %v1858_v9 = vmul.f32 %v6004_v1, %v5992_v29  ;;  %v5584_v25 = vpack.c.bf16 %v1856_v2, %v1856_v2  ;;  %v1962_v53 = vcombine.low %v1855_v61, %v1856_v2 }
 0x392   :  { %v6008_v4 = vpop.eup %6007  ;;  %v1859_v54 = vmul.f32 %v6006_v47, %v5994_v42  ;;  %v5585_v33 = vpack.c.bf16 %v1857_v41, %v1857_v41  ;;  %v1895_v16 = vrot.slane %v5583_v22, 7  ;;  %v1929_v22 = vld [vmem:[%s10183_s2 + $0x14] sm:$0x2] }
 0x393   :  { %v6010_v51 = vpop.eup %6009  ;;  %v1860_v57 = vmul.f32 %v6008_v4, %v5996_v36  ;;  %v5586_v34 = vpack.c.bf16 %v1858_v9, %v1858_v9  ;;  %v1896_v39 = vrot.slane %v5584_v25, 7  ;;  %v1963_v15 = vcombine.low %v1857_v41, %v1858_v9 }
 0x394   :  { %v6012_v20 = vpop.eup %6011  ;;  %v5587_v56 = vpack.c.bf16 %v1859_v54, %v1859_v54  ;;  %v1897_v59 = vrot.slane %v5585_v33, 7  ;;  %v1915_v52 = vsel %vm8318_vm7, %v1895_v16, %v1914_v26  ;;  %v1972_v61 = vrot.slane %v1962_v53, %v7322_v11 }
 0x395   :  { %v6014_v29 = vpop.eup %6013  ;;  %v5588_v42 = vpack.c.bf16 %v1860_v57, %v1860_v57  ;;  %v1898_v36 = vrot.slane %v5586_v34, 7  ;;  %1916 = vst [vmem:[%s10183_s2] sm:$0x2] %v1915_v52  ;;  %v1918_v58 = vsel %vm8318_vm7, %v1896_v39, %v1917_v45  ;;  %v1979_v47 = vrot.slane %v1963_v15, %v7322_v11  ;;  %v1935_v39 = vld [vmem:[%s10183_s2 + $0x1c] sm:$0x2] }
 0x396   :  { %v6016_v17 = vpop.eup %6015  ;;  %v1861_v2 = vmul.f32 %v6014_v29, %v6010_v51  ;;  %v1899_v1 = vrot.slane %v5587_v56, 7  ;;  %1919 = vst [vmem:[%s10183_s2 + $0x4] sm:$0x2] %v1918_v58  ;;  %v1921_v41 = vsel %vm8318_vm7, %v1897_v59, %v1920_v37  ;;  %v1964_v53 = vcombine.low %v1859_v54, %v1860_v57  ;;  %v1932_v54 = vld [vmem:[%s10183_s2 + $0x18] sm:$0x2]  ;;  %v8407_v58 = vld [vmem:[%s10181_s1 + $0x1c8] sm:$0xff] }
 0x397   :  { %v1862_v9 = vmul.f32 %v6016_v17, %v6012_v20  ;;  %v1900_v25 = vrot.slane %v5588_v42, 7  ;;  %1922 = vst [vmem:[%s10183_s2 + $0x8] sm:$0x2] %v1921_v41  ;;  %v1924_v26 = vsel %vm8318_vm7, %v1898_v36, %v1923_v46  ;;  %v1994_v57 = vcombine.low %v1972_v61, %v1979_v47  ;;  %v8395_v36 = vld [vmem:[%s10181_s1 + $0x1e0] sm:$0xff]  ;;  %v8425_v17 = vld [vmem:[%s10181_s1 + $0x1d0] sm:$0xff]  ;;  %v8455_v47 = vld [vmem:[%s10181_s1 + $0x188] sm:$0xff] }
 0x398   :  { %v5589_v4 = vpack.c.bf16 %v1861_v2, %v1861_v2  ;;  %1925 = vst [vmem:[%s10183_s2 + $0xc] sm:$0x2] %v1924_v26  ;;  %v1927_v33 = vsel %vm8318_vm7, %v1899_v1, %v1926_v60  ;;  %v1986_v15 = vrot.slane %v1964_v53, %v7322_v11  ;;  %v8413_v60 = vld [vmem:[%s10181_s1 + $0x1d8] sm:$0xff]  ;;  %v8419_v61 = vld [vmem:[%s10181_s1 + $0x1c0] sm:$0xff]  ;;  %v8473_v26 = vld [vmem:[%s10181_s1 + $0x190] sm:$0xff] }
 0x399   :  { %v5590_v16 = vpack.c.bf16 %v1862_v9, %v1862_v9  ;;  %1928 = vst [vmem:[%s10183_s2 + $0x10] sm:$0x2] %v1927_v33  ;;  %v1930_v45 = vsel %vm8318_vm7, %v1900_v25, %v1929_v22  ;;  %v1965_v51 = vcombine.low %v1861_v2, %v1862_v9  ;;  %v2002_v46 = vrot.slane %v1994_v57, %v7322_v11  ;;  %v8431_v2 = vld [vmem:[%s10181_s1 + $0x1a8] sm:$0xff]  ;;  %v8437_v1 = vld [vmem:[%s10181_s1 + $0x1b8] sm:$0xff]  ;;  %v8443_v41 = vld [vmem:[%s10181_s1 + $0x1a0] sm:$0xff] }
 0x39a   :  { %v1901_v34 = vrot.slane %v5589_v4, 7  ;;  %1931 = vst [vmem:[%s10183_s2 + $0x14] sm:$0x2] %v1930_v45  ;;  %v8449_v22 = vld [vmem:[%s10181_s1 + $0x1b0] sm:$0xff]  ;;  %v8461_v9 = vld [vmem:[%s10181_s1 + $0x198] sm:$0xff]  ;;  %v8467_v25 = vld [vmem:[%s10181_s1 + $0x180] sm:$0xff] }
 0x39b   :  { %v1902_v37 = vrot.slane %v5590_v16, 7  ;;  %v1993_v20 = vrot.slane %v1965_v51, %v7322_v11  ;;  %v8479_v53 = vld [vmem:[%s10181_s1 + $0x168] sm:$0xff]  ;;  %v8485_v4 = vld [vmem:[%s10181_s1 + $0x178] sm:$0xff]  ;;  %v8491_v33 = vld [vmem:[%s10181_s1 + $0x160] sm:$0xff] }
 0x39c   :  { %v1933_v56 = vsel %vm8318_vm7, %v1901_v34, %v1932_v54  ;;  %v8497_v16 = vld [vmem:[%s10181_s1 + $0x170] sm:$0xff]  ;;  %v8503_v45 = vld [vmem:[%s10181_s1 + $0x148] sm:$0xff]  ;;  %v8509_v54 = vld [vmem:[%s10181_s1 + $0x158] sm:$0xff] }
 0x39d   :  { %1934 = vst [vmem:[%s10183_s2 + $0x18] sm:$0x2] %v1933_v56  ;;  %v1936_v59 = vsel %vm8318_vm7, %v1902_v37, %v1935_v39  ;;  %v1995_v52 = vcombine.low %v1986_v15, %v1993_v20  ;;  %v8515_v51 = vld [vmem:[%s10181_s1 + $0x140] sm:$0xff]  ;;  %v8521_v57 = vld [vmem:[%s10181_s1 + $0x150] sm:$0xff]  ;;  %v8527_v34 = vld [vmem:[%s10181_s1 + $0x128] sm:$0xff] }
 0x39e   :  { %1937 = vst [vmem:[%s10183_s2 + $0x1c] sm:$0x2] %v1936_v59  ;;  %10302 = vst [vmem:[#allocation16_spill] sm:$0xff] %v8527_v34  ;;  %v8533_v39 = vld [vmem:[%s10181_s1 + $0x138] sm:$0xff]  ;;  %v8539_v37 = vld [vmem:[%s10181_s1 + $0x120] sm:$0xff] }
 0x39f   :  { %v2009_v29 = vrot.slane %v1995_v52, %v7322_v11  ;;  %10303 = vst [vmem:[#allocation17_spill] sm:$0xff] %v8533_v39  ;;  %10304 = vst [vmem:[#allocation18_spill] sm:$0xff] %v8539_v37  ;;  %v8545_v15 = vld [vmem:[%s10181_s1 + $0x130] sm:$0xff]  ;;  %v8551_v20 = vld [vmem:[%s10181_s1 + $0x108] sm:$0xff] }
 0x3a0   :  { %10305 = vst [vmem:[#allocation4_spill] sm:$0xff] %v8545_v15  ;;  %10306 = vst [vmem:[#allocation5_spill] sm:$0xff] %v8551_v20  ;;  %v8557_v56 = vld [vmem:[%s10181_s1 + $0x118] sm:$0xff]  ;;  %v8563_v59 = vld [vmem:[%s10181_s1 + $0x100] sm:$0xff] }
 0x3a1   :  { %v2010_v42 = vcombine.low %v2002_v46, %v2009_v29  ;;  %10307 = vst [vmem:[#allocation19_spill] sm:$0xff] %v8557_v56  ;;  %10308 = vst [vmem:[#allocation20_spill] sm:$0xff] %v8563_v59  ;;  %v8569_v52 = vld [vmem:[%s10181_s1 + $0x110] sm:$0xff] }
 0x3a2   :  { %10309 = vst [vmem:[#allocation21_spill] sm:$0xff] %v8569_v52 }
 0x3a3   :  { %2077 = vmatmul.mubr.f32.vlgmr.msra.gmra.mxu0 %v2010_v42  ;;  %2148 = vmatmul.mubr.f32.vlgmr.msra.gmra.mxu1 %v2010_v42 }
 0x3a4   :  { %2663 = vmatpush1.msra.mxu0 %v8395_v36  ;;  %2734 = vmatpush1.msra.mxu1 %v8401_v48 }
 0x3a5   :  { %2664 = vmatprep.subr.mxu0 %v8407_v58  ;;  %2735 = vmatprep.subr.mxu1 %v8413_v60 }
 0x3a6   :  { %2665 = vmatpush1.msra.mxu0 %v8419_v61  ;;  %2736 = vmatpush1.msra.mxu1 %v8425_v17 }
 0x3a7   :  { %2666 = vmatprep.subr.mxu0 %v8431_v2  ;;  %2737 = vmatprep.subr.mxu1 %v8437_v1 }
 0x3a8   :  { %2667 = vmatpush1.msra.mxu0 %v8443_v41  ;;  %2738 = vmatpush1.msra.mxu1 %v8449_v22 }
 0x3a9   :  { %2668 = vmatprep.subr.mxu0 %v8455_v47  ;;  %2739 = vmatprep.subr.mxu1 %v8461_v9 }
 0x3aa   :  { %2669 = vmatpush1.msra.mxu0 %v8467_v25  ;;  %2740 = vmatpush1.msra.mxu1 %v8473_v26 }
 0x3ab   :  { %2670 = vmatprep.subr.mxu0 %v8479_v53  ;;  %2741 = vmatprep.subr.mxu1 %v8485_v4 }
 0x3ac   :  { %2671 = vmatpush1.msra.mxu0 %v8491_v33  ;;  %2742 = vmatpush1.msra.mxu1 %v8497_v16 }
 0x3ad   :  { %2672 = vmatprep.subr.mxu0 %v8503_v45  ;;  %2743 = vmatprep.subr.mxu1 %v8509_v54 }
 0x3ae   :  { %2673 = vmatpush1.msra.mxu0 %v8515_v51  ;;  %2744 = vmatpush1.msra.mxu1 %v8521_v57 }
 0x3af   :  { %2674 = vmatprep.subr.mxu0 %v8527_v34  ;;  %2745 = vmatprep.subr.mxu1 %v8533_v39 }
 0x3b0   :  { %2675 = vmatpush1.msra.mxu0 %v8539_v37  ;;  %2746 = vmatpush1.msra.mxu1 %v8545_v15 }
 0x3b1   :  { %2676 = vmatprep.subr.mxu0 %v8551_v20  ;;  %2747 = vmatprep.subr.mxu1 %v8557_v56 }
 0x3b2   :  { %2677 = vmatpush1.msra.mxu0 %v8563_v59  ;;  %2748 = vmatpush1.msra.mxu1 %v8569_v52 }
 0x3b3   :  { %2678 = vmatprep.subr.mxu0 %v7997_v24  ;;  %2749 = vmatprep.subr.mxu1 %v8003_v8  ;;  %v10310_v24 = vld [vmem:[#allocation6_spill] sm:$0xff]  ;;  %v10311_v8 = vld [vmem:[#allocation7_spill] sm:$0xff] }
 0x3b4   :  { %2679 = vmatpush1.msra.mxu0 %v8009_v23  ;;  %2750 = vmatpush1.msra.mxu1 %v8015_v12  ;;  %v10312_v23 = vld [vmem:[#allocation8_spill] sm:$0xff]  ;;  %v10313_v12 = vld [vmem:[#allocation9_spill] sm:$0xff] }
 0x3b5   :  { %2680 = vmatprep.subr.mxu0 %v8021_v27  ;;  %2751 = vmatprep.subr.mxu1 %v8027_v19  ;;  %v10314_v27 = vld [vmem:[#allocation10_spill] sm:$0xff]  ;;  %v10315_v19 = vld [vmem:[#allocation11_spill] sm:$0xff] }
 0x3b6   :  { %2681 = vmatpush1.msra.mxu0 %v8033_v28  ;;  %2752 = vmatpush1.msra.mxu1 %v8039_v3  ;;  %v10316_v28 = vld [vmem:[#allocation12_spill] sm:$0xff]  ;;  %v10317_v3 = vld [vmem:[#allocation13_spill] sm:$0xff] }
 0x3b7   :  { %2682 = vmatprep.subr.mxu0 %v8045_v31  ;;  %2753 = vmatprep.subr.mxu1 %v8051_v13  ;;  %v10318_v31 = vld [vmem:[#allocation14_spill] sm:$0xff]  ;;  %v10319_v13 = vmov 0.0  }
 0x3b8   :  { %2683 = vmatpush1.msra.mxu0 %v8057_v63  ;;  %2754 = vmatpush1.msra.mxu1 %v8063_v7  ;;  %v10320_v63 = vld [vmem:[#allocation15_spill] sm:$0xff]  ;;  %v8609_v7 = vld [vmem:[%s10181_s1 + $0x1e8] sm:$0xff] }
 0x3b9   :  { %2684 = vmatprep.subr.mxu0 %v8069_v10  ;;  %2755 = vmatprep.subr.mxu1 %v8075_v14  ;;  %10321 = vst [vmem:[#allocation6_spill] sm:$0xff] %v8609_v7  ;;  %v8615_v10 = vld [vmem:[%s10181_s1 + $0x1f8] sm:$0xff] }
 0x3ba   :  { %2685 = vmatpush1.msra.mxu0 %v8081_v44  ;;  %2756 = vmatpush1.msra.mxu1 %v8087_v32  ;;  %10322 = vst [vmem:[#allocation7_spill] sm:$0xff] %v8615_v10 }
 0x3bb   :  { %2686 = vmatprep.subr.mxu0 %v8093_v50  ;;  %2757 = vmatprep.subr.mxu1 %v8099_v0 }
 0x3bc   :  { %2687 = vmatpush1.msra.mxu0 %v8105_v49  ;;  %2758 = vmatpush1.msra.mxu1 %v8111_v30 }
 0x3bd   :  { %2688 = vmatprep.subr.mxu0 %v8117_v6  ;;  %2759 = vmatprep.subr.mxu1 %v8123_v5 }
 0x3be   :  { %2689 = vmatpush1.msra.mxu0 %v10310_v24  ;;  %2760 = vmatpush1.msra.mxu1 %v10311_v8 }
 0x3bf   :  { %2690 = vmatprep.subr.mxu0 %v10312_v23  ;;  %2761 = vmatprep.subr.mxu1 %v10313_v12 }
 0x3c0   :  { %2691 = vmatpush1.msra.mxu0 %v10314_v27  ;;  %2762 = vmatpush1.msra.mxu1 %v10315_v19  ;;  %v5375_v27 = vld [vmem:[%s10182_s0 + $0x3] ss:$8 sm:$0xf] }
 0x3c1   :  { %2692 = vmatprep.subr.mxu0 %v10316_v28  ;;  %2763 = vmatprep.subr.mxu1 %v10317_v3  ;;  %v5376_v19 = vld [vmem:[%s10182_s0 + $0x23] ss:$8 sm:$0xf] }
 0x3c2   :  { %2693 = vmatpush1.msra.mxu0 %v10318_v31  ;;  %2726 = vmatprep.mubr.f32.mxu0 %v10319_v13  ;;  %v5377_v28 = vld [vmem:[%s10182_s0 + $0x43] ss:$8 sm:$0xf] }
 0x3c3   :  { %2764 = vmatpush1.msra.mxu1 %v10320_v63  ;;  %2797 = vmatprep.mubr.f32.mxu1 %v10319_v13  ;;  %v5379_v3 = vld [vmem:[%s10182_s0 + $0x83] ss:$8 sm:$0xf] }
 0x3c4   :  { %3289 = vmatprep.subr.mxu0 %v8609_v7  ;;  %3360 = vmatprep.subr.mxu1 %v8615_v10 }
 0x463   :  { %v2078_v14 = vpop.f32.mrf.mxu0  ;;  %v2149_v44 = vpop.f32.mrf.mxu1 }
 0x465   :  { %v2080_v32 = vpop.f32.mrf.mxu0  ;;  %v2151_v50 = vpop.f32.mrf.mxu1 }
 0x466   :  { %v2158_v0 = vcombine.low %v2078_v14, %v2080_v32  ;;  %v2159_v49 = vcombine.high %v2078_v14, %v2080_v32  ;;  %v2160_v30 = vcombine.low %v2149_v44, %v2151_v50  ;;  %v2161_v6 = vcombine.high %v2149_v44, %v2151_v50  ;;  %v5378_v32 = vld [vmem:[%s10182_s0 + $0x63] ss:$8 sm:$0xf] }
 0x467   :  { %v5380_v50 = vld [vmem:[%s10182_s0 + $0xa3] ss:$8 sm:$0xf] }
 0x468   :  { %v2168_v5 = vrot.slane %v2158_v0, %v7322_v11  ;;  %v2175_v46 = vrot.slane %v2159_v49, %v7322_v11  ;;  %v2182_v29 = vrot.slane %v2160_v30, %v7322_v11  ;;  %v2189_v42 = vrot.slane %v2161_v6, %v7322_v11  ;;  %v5381_v0 = vld [vmem:[%s10182_s0 + $0xc3] ss:$8 sm:$0xf] }
 0x46a   :  { %v2190_v24 = vcombine.low %v2168_v5, %v2182_v29  ;;  %v2191_v8 = vcombine.high %v2168_v5, %v2182_v29  ;;  %v2192_v23 = vcombine.low %v2175_v46, %v2189_v42  ;;  %v2193_v12 = vcombine.high %v2175_v46, %v2189_v42  ;;  %v5382_v46 = vld [vmem:[%s10182_s0 + $0xe3] ss:$8 sm:$0xf] }
 0x46c   :  { %v2200_v31 = vrot.slane %v2190_v24, %v7322_v11  ;;  %v2207_v63 = vrot.slane %v2192_v23, %v7322_v11  ;;  %v2214_v14 = vrot.slane %v2191_v8, %v7322_v11  ;;  %v2221_v44 = vrot.slane %v2193_v12, %v7322_v11 }
 0x46e   :  { %v2222_v49 = vcombine.high %v2200_v31, %v2200_v31  ;;  %v2223_v30 = vcombine.high %v2207_v63, %v2207_v63  ;;  %v2224_v6 = vcombine.high %v2214_v14, %v2214_v14  ;;  %v2225_v5 = vcombine.high %v2221_v44, %v2221_v44 }
 0x46f   :  { %v8650_v29 = vadd.f32 %v5375_v27, %v2200_v31  ;;  %v8652_v42 = vadd.f32 %v5376_v19, %v2214_v14  ;;  %v8654_v24 = vadd.f32 %v5379_v3, %v2207_v63  ;;  %v8660_v12 = vadd.f32 %v5380_v50, %v2221_v44 }
 0x470   :  { %v8656_v8 = vadd.f32 %v5377_v28, %v2222_v49  ;;  %v8658_v23 = vadd.f32 %v5378_v32, %v2224_v6  ;;  %v8662_v10 = vadd.f32 %v5381_v0, %v2223_v30  ;;  %v8666_v52 = vadd.f32 %v5382_v46, %v2225_v5 }
 0x471   :  { %v5383_v7 = vmul.f32 -1.442695, %v8650_v29  ;;  %v5384_v13 = vmul.f32 -1.442695, %v8652_v42  ;;  %v5387_v28 = vmul.f32 -1.442695, %v8654_v24 }
 0x472   :  { %v5385_v27 = vmul.f32 -1.442695, %v8656_v8  ;;  %v5386_v19 = vmul.f32 -1.442695, %v8658_v23  ;;  %v2298_v3 = vrot.slane %v8650_v29, 1  ;;  %v2299_v63 = vrot.slane %v8652_v42, 1 }
 0x473   :  { %6017 = vpow2.f32 %v5383_v7  ;;  %v5388_v31 = vmul.f32 -1.442695, %v8660_v12  ;;  %v5389_v14 = vmul.f32 -1.442695, %v8662_v10  ;;  %v2300_v44 = vrot.slane %v8656_v8, 1 }
 0x474   :  { %6019 = vpow2.f32 %v5384_v13  ;;  %v5390_v32 = vmul.f32 -1.442695, %v8666_v52  ;;  %v2301_v50 = vrot.slane %v8658_v23, 1  ;;  %v2302_v7 = vrot.slane %v8654_v24, 1 }
 0x475   :  { %6021 = vpow2.f32 %v5385_v27  ;;  %v5391_v0 = vmul.f32 -1.442695, %v2298_v3  ;;  %v2303_v13 = vrot.slane %v8660_v12, 1  ;;  %v5392_v49 = vmul.f32 -1.442695, %v2299_v63 }
 0x476   :  { %6023 = vpow2.f32 %v5386_v19  ;;  %v2304_v30 = vrot.slane %v8662_v10, 1  ;;  %v5393_v6 = vmul.f32 -1.442695, %v2300_v44  ;;  %v2305_v5 = vrot.slane %v8666_v52, 1 }
 0x477   :  { %6025 = vpow2.f32 %v5387_v28  ;;  %v5394_v46 = vmul.f32 -1.442695, %v2301_v50  ;;  %v5395_v27 = vmul.f32 -1.442695, %v2302_v7  ;;  %v5396_v19 = vmul.f32 -1.442695, %v2303_v13 }
 0x478   :  { %6027 = vpow2.f32 %v5388_v31  ;;  %v5397_v28 = vmul.f32 -1.442695, %v2304_v30  ;;  %v5398_v3 = vmul.f32 -1.442695, %v2305_v5 }
 0x479   :  { %6029 = vpow2.f32 %v5389_v14 }
 0x47a   :  { %6031 = vpow2.f32 %v5390_v32 }
 0x47b   :  { %6033 = vpow2.f32 %v5391_v0 }
 0x47c   :  { %6035 = vpow2.f32 %v5392_v49 }
 0x47d   :  { %6037 = vpow2.f32 %v5393_v6 }
 0x47e   :  { %6039 = vpow2.f32 %v5394_v46 }
 0x47f   :  { %6041 = vpow2.f32 %v5395_v27 }
 0x480   :  { %v6018_v31 = vpop.eup %6017  ;;  %6043 = vpow2.f32 %v5396_v19 }
 0x481   :  { %v6020_v63 = vpop.eup %6019  ;;  %v2266_v14 = vadd.f32 1.0, %v6018_v31  ;;  %6045 = vpow2.f32 %v5397_v28 }
 0x482   :  { %v6022_v59 = vpop.eup %6021  ;;  %v2267_v44 = vadd.f32 1.0, %v6020_v63  ;;  %6047 = vpow2.f32 %v5398_v3 }
 0x483   :  { %v6024_v32 = vpop.eup %6023  ;;  %v2268_v56 = vadd.f32 1.0, %v6022_v59  ;;  %6049 = vrcp.f32 %v2266_v14 }
 0x484   :  { %v6026_v50 = vpop.eup %6025  ;;  %v2269_v7 = vadd.f32 1.0, %v6024_v32  ;;  %6051 = vrcp.f32 %v2267_v44 }
 0x485   :  { %v6028_v0 = vpop.eup %6027  ;;  %v2270_v13 = vadd.f32 1.0, %v6026_v50  ;;  %6053 = vrcp.f32 %v2268_v56 }
 0x486   :  { %v6030_v49 = vpop.eup %6029  ;;  %v2271_v30 = vadd.f32 1.0, %v6028_v0  ;;  %6055 = vrcp.f32 %v2269_v7 }
 0x487   :  { %v6032_v6 = vpop.eup %6031  ;;  %v2272_v5 = vadd.f32 1.0, %v6030_v49  ;;  %6057 = vrcp.f32 %v2270_v13  ;;  %v2362_v49 = vrot.slane %v8650_v29, 2 }
 0x488   :  { %v6034_v46 = vpop.eup %6033  ;;  %v2273_v27 = vadd.f32 1.0, %v6032_v6  ;;  %6059 = vrcp.f32 %v2271_v30 }
 0x489   :  { %v6036_v19 = vpop.eup %6035  ;;  %6061 = vrcp.f32 %v2272_v5  ;;  %v2338_v28 = vadd.f32 1.0, %v6034_v46  ;;  %v2363_v5 = vrot.slane %v8652_v42, 2 }
 0x48a   :  { %v6038_v59 = vpop.eup %6037  ;;  %6063 = vrcp.f32 %v2273_v27  ;;  %v2339_v3 = vadd.f32 1.0, %v6036_v19  ;;  %v2364_v27 = vrot.slane %v8656_v8, 2 }
 0x48b   :  { %v6040_v31 = vpop.eup %6039  ;;  %v2340_v63 = vadd.f32 1.0, %v6038_v59  ;;  %6065 = vrcp.f32 %v2338_v28  ;;  %v2365_v28 = vrot.slane %v8658_v23, 2 }
 0x48c   :  { %v6042_v14 = vpop.eup %6041  ;;  %v2341_v56 = vadd.f32 1.0, %v6040_v31  ;;  %6067 = vrcp.f32 %v2339_v3  ;;  %v2366_v3 = vrot.slane %v8654_v24, 2  ;;  %v2386_v31 = vrot.slane %v8650_v29, 3 }
 0x48d   :  { %v6044_v44 = vpop.eup %6043  ;;  %v2342_v32 = vadd.f32 1.0, %v6042_v14  ;;  %6069 = vrcp.f32 %v2340_v63  ;;  %v2367_v14 = vrot.slane %v8660_v12, 2  ;;  %v2389_v29 = vrot.slane %v8658_v23, 3 }
 0x48e   :  { %v6046_v50 = vpop.eup %6045  ;;  %v2343_v7 = vadd.f32 1.0, %v6044_v44  ;;  %6071 = vrcp.f32 %v2341_v56  ;;  %v2387_v56 = vrot.slane %v8652_v42, 3  ;;  %v5399_v42 = vmul.f32 -1.442695, %v2386_v31 }
 0x48f   :  { %v6048_v0 = vpop.eup %6047  ;;  %v2344_v13 = vadd.f32 1.0, %v6046_v50  ;;  %6073 = vrcp.f32 %v2342_v32  ;;  %v2368_v32 = vrot.slane %v8662_v10, 2  ;;  %v2388_v50 = vrot.slane %v8656_v8, 3 }
 0x490   :  { %v6050_v30 = vpop.eup %6049  ;;  %v2345_v6 = vadd.f32 1.0, %v6048_v0  ;;  %6075 = vrcp.f32 %v2343_v7  ;;  %v2369_v0 = vrot.slane %v8666_v52, 2  ;;  %v2392_v8 = vrot.slane %v8662_v10, 3 }
 0x491   :  { %v6052_v46 = vpop.eup %6051  ;;  %6077 = vrcp.f32 %v2344_v13  ;;  %v5401_v15 = vmul.f32 -1.442695, %v2388_v50  ;;  %v2393_v23 = vrot.slane %v8666_v52, 3 }
 0x492   :  { %v6054_v19 = vpop.eup %6053  ;;  %6079 = vrcp.f32 %v2345_v6 }
 0x493   :  { %v8686_v59 = vpop.eup %6055  ;;  %6081 = vtanh.f32 %v2362_v49  ;;  %v2390_v49 = vrot.slane %v8654_v24, 3 }
 0x494   :  { %v8690_v63 = vpop.eup %6057  ;;  %6083 = vtanh.f32 %v2363_v5  ;;  %v2391_v5 = vrot.slane %v8660_v12, 3  ;;  %v5405_v12 = vmul.f32 -1.442695, %v2392_v8 }
 0x495   :  { %v8694_v44 = vpop.eup %6059  ;;  %6085 = vtanh.f32 %v2364_v27  ;;  %v5400_v27 = vmul.f32 -1.442695, %v2387_v56 }
 0x496   :  { %v8698_v7 = vpop.eup %6061  ;;  %6087 = vtanh.f32 %v2365_v28  ;;  %v5402_v28 = vmul.f32 -1.442695, %v2389_v29  ;;  %v5404_v31 = vmul.f32 -1.442695, %v2391_v5 }
 0x497   :  { %v8702_v13 = vpop.eup %6063  ;;  %6089 = vtanh.f32 %v2366_v3  ;;  %v5403_v3 = vmul.f32 -1.442695, %v2390_v49 }
 0x498   :  { %v6066_v6 = vpop.eup %6065  ;;  %6091 = vtanh.f32 %v2367_v14 }
 0x499   :  { %v6068_v20 = vpop.eup %6067  ;;  %6093 = vtanh.f32 %v2368_v32  ;;  %v5406_v32 = vmul.f32 -1.442695, %v2393_v23  ;;  %v2450_v10 = vmul.f32 %v6066_v6, %v8285_v18 }
 0x49a   :  { %v6070_v37 = vpop.eup %6069  ;;  %6095 = vtanh.f32 %v2369_v0  ;;  %v2451_v52 = vmul.f32 %v6068_v20, %v8289_v55 }
 0x49b   :  { %v6072_v39 = vpop.eup %6071  ;;  %6097 = vpow2.f32 %v5399_v42  ;;  %v2452_v49 = vmul.f32 %v6070_v37, %v8292_v40 }
 0x49c   :  { %v6074_v24 = vpop.eup %6073  ;;  %6099 = vpow2.f32 %v5400_v27  ;;  %v2453_v5 = vmul.f32 %v6072_v39, %v8296_v35 }
 0x49d   :  { %v6076_v14 = vpop.eup %6075  ;;  %6101 = vpow2.f32 %v5401_v15  ;;  %v2454_v23 = vmul.f32 %v6074_v24, %v8299_v21 }
 0x49e   :  { %v6078_v56 = vpop.eup %6077  ;;  %6103 = vpow2.f32 %v5402_v28  ;;  %v2455_v55 = vmul.f32 %v6076_v14, %v8302_v43 }
 0x49f   :  { %v6080_v34 = vpop.eup %6079  ;;  %6105 = vpow2.f32 %v5403_v3 }
 0x4a0   :  { %v6082_v50 = vpop.eup %6081  ;;  %6107 = vpow2.f32 %v5404_v31 }
 0x4a1   :  { %v6084_v0 = vpop.eup %6083  ;;  %6109 = vpow2.f32 %v5405_v12  ;;  %v2458_v29 = vmul.f32 %v6082_v50, %v6050_v30  ;;  %v2456_v12 = vmul.f32 %v6078_v56, %v8311_v62  ;;  %v2457_v50 = vmul.f32 %v6080_v34, %v8313_v38 }
 0x4a2   :  { %v6086_v42 = vpop.eup %6085  ;;  %6111 = vpow2.f32 %v5406_v32  ;;  %v2459_v15 = vmul.f32 %v6084_v0, %v6052_v46 }
 0x4a3   :  { %v6088_v27 = vpop.eup %6087  ;;  %v2460_v8 = vmul.f32 %v6086_v42, %v6054_v19  ;;  %v8713_v28 = vadd.f32 %v2458_v29, %v2450_v10 }
 0x4a4   :  { %v6090_v18 = vpop.eup %6089  ;;  %v2461_v6 = vmul.f32 %v6088_v27, %v8686_v59  ;;  %v8717_v20 = vadd.f32 %v2459_v15, %v2451_v52 }
 0x4a5   :  { %v6092_v30 = vpop.eup %6091  ;;  %v2462_v40 = vmul.f32 %v6090_v18, %v8690_v63  ;;  %v8720_v37 = vadd.f32 %v2460_v8, %v2452_v49  ;;  %6113 = vtanh.f32 %v8713_v28 }
 0x4a6   :  { %v6094_v35 = vpop.eup %6093  ;;  %v2463_v39 = vmul.f32 %v6092_v30, %v8694_v44  ;;  %v8724_v21 = vadd.f32 %v2461_v6, %v2453_v5  ;;  %6115 = vtanh.f32 %v8717_v20 }
 0x4a7   :  { %v6096_v46 = vpop.eup %6095  ;;  %v8727_v19 = vadd.f32 %v2462_v40, %v2454_v23  ;;  %6117 = vtanh.f32 %v8720_v37  ;;  %v2464_v29 = vmul.f32 %v6094_v35, %v8698_v7 }
 0x4a8   :  { %v6098_v43 = vpop.eup %6097  ;;  %v8730_v59 = vadd.f32 %v2463_v39, %v2455_v55  ;;  %6119 = vtanh.f32 %v8724_v21  ;;  %v2465_v15 = vmul.f32 %v6096_v46, %v8702_v13 }
 0x4a9   :  { %v6100_v63 = vpop.eup %6099  ;;  %v2426_v3 = vadd.f32 1.0, %v6098_v43  ;;  %6121 = vtanh.f32 %v8727_v19  ;;  %v8739_v8 = vadd.f32 %v2464_v29, %v2456_v12  ;;  %v8937_v29 = vld [vmem:[%s10181_s1 + $0x80] sm:$0xff] }
 0x4aa   :  { %v6102_v24 = vpop.eup %6101  ;;  %v2427_v44 = vadd.f32 1.0, %v6100_v63  ;;  %6123 = vtanh.f32 %v8730_v59  ;;  %v8741_v56 = vadd.f32 %v2465_v15, %v2457_v50 }
 0x4ab   :  { %v6104_v31 = vpop.eup %6103  ;;  %v2428_v14 = vadd.f32 1.0, %v6102_v24  ;;  %6125 = vrcp.f32 %v2426_v3 }
 0x4ac   :  { %v6106_v32 = vpop.eup %6105  ;;  %v2429_v10 = vadd.f32 1.0, %v6104_v31  ;;  %6127 = vrcp.f32 %v2427_v44 }
 0x4ad   :  { %v6108_v52 = vpop.eup %6107  ;;  %v2430_v0 = vadd.f32 1.0, %v6106_v32  ;;  %6129 = vrcp.f32 %v2428_v14 }
 0x4ae   :  { %v6110_v49 = vpop.eup %6109  ;;  %v2431_v42 = vadd.f32 1.0, %v6108_v52  ;;  %6131 = vrcp.f32 %v2429_v10 }
 0x4af   :  { %v6112_v5 = vpop.eup %6111  ;;  %v2432_v27 = vadd.f32 1.0, %v6110_v49  ;;  %6133 = vrcp.f32 %v2430_v0 }
 0x4b0   :  { %v2433_v62 = vadd.f32 1.0, %v6112_v5  ;;  %6135 = vrcp.f32 %v2431_v42 }
 0x4b1   :  { %6137 = vrcp.f32 %v2432_v27 }
 0x4b2   :  { %v6114_v38 = vpop.eup %6113  ;;  %6139 = vrcp.f32 %v2433_v62 }
 0x4b3   :  { %v6116_v34 = vpop.eup %6115  ;;  %6141 = vtanh.f32 %v8739_v8 }
 0x4b4   :  { %v6118_v7 = vpop.eup %6117  ;;  %6143 = vtanh.f32 %v8741_v56 }
 0x4b5   :  { %v6120_v23 = vpop.eup %6119 }
 0x4b6   :  { %v6122_v13 = vpop.eup %6121 }
 0x4b7   :  { %v6124_v18 = vpop.eup %6123 }
 0x4b8   :  { %v6126_v6 = vpop.eup %6125 }
 0x4b9   :  { %v6128_v55 = vpop.eup %6127  ;;  %v2482_v30 = vmul.f32 %v6126_v6, %v6114_v38 }
 0x4ba   :  { %v6130_v40 = vpop.eup %6129  ;;  %v2483_v35 = vmul.f32 %v6128_v55, %v6116_v34 }
 0x4bb   :  { %v6132_v39 = vpop.eup %6131  ;;  %v2484_v46 = vmul.f32 %v6130_v40, %v6118_v7  ;;  %v5591_v43 = vpack.c.bf16 %v2482_v30, %v2482_v30 }
 0x4bc   :  { %v6134_v63 = vpop.eup %6133  ;;  %v2485_v3 = vmul.f32 %v6132_v39, %v6120_v23  ;;  %v5592_v24 = vpack.c.bf16 %v2483_v35, %v2483_v35  ;;  %v2612_v44 = vcombine.low %v2482_v30, %v2483_v35  ;;  %v2567_v39 = vld [vmem:[%s10183_s2 + $0x4] sm:$0x2] }
 0x4bd   :  { %v6136_v31 = vpop.eup %6135  ;;  %v2486_v14 = vmul.f32 %v6134_v63, %v6122_v13  ;;  %v5593_v12 = vpack.c.bf16 %v2484_v46, %v2484_v46  ;;  %v2523_v32 = vshll.u32 %v5591_v43, 16  ;;  %v2564_v13 = vld [vmem:[%s10183_s2] sm:$0x2] }
 0x4be   :  { %v6138_v10 = vpop.eup %6137  ;;  %v2487_v50 = vmul.f32 %v6136_v31, %v6124_v18  ;;  %v5594_v52 = vpack.c.bf16 %v2485_v3, %v2485_v3  ;;  %v2527_v0 = vshll.u32 %v5592_v24, 16  ;;  %v2613_v49 = vcombine.low %v2484_v46, %v2485_v3  ;;  %v2570_v24 = vld [vmem:[%s10183_s2 + $0x8] sm:$0x2] }
 0x4bf   :  { %v6140_v42 = vpop.eup %6139  ;;  %v5595_v15 = vpack.c.bf16 %v2486_v14, %v2486_v14  ;;  %v2525_v5 = vrot.slane %v2523_v32, 7  ;;  %v2531_v27 = vshll.u32 %v5593_v12, 16  ;;  %v2622_v62 = vrot.slane %v2612_v44, %v7322_v11  ;;  %v2573_v12 = vld [vmem:[%s10183_s2 + $0xc] sm:$0x2] }
 0x4c0   :  { %v6142_v38 = vpop.eup %6141  ;;  %v5596_v34 = vpack.c.bf16 %v2487_v50, %v2487_v50  ;;  %v2529_v7 = vrot.slane %v2527_v0, 7  ;;  %v2535_v23 = vshll.u32 %v5594_v52, 16  ;;  %v2614_v18 = vcombine.low %v2486_v14, %v2487_v50  ;;  %v2576_v0 = vld [vmem:[%s10183_s2 + $0x10] sm:$0x2] }
 0x4c1   :  { %v6144_v6 = vpop.eup %6143  ;;  %v2488_v55 = vmul.f32 %v6142_v38, %v6138_v10  ;;  %v2533_v30 = vrot.slane %v2531_v27, 7  ;;  %v2539_v40 = vshll.u32 %v5595_v15, 16  ;;  %v2565_v35 = vsel %vm8746_vm9, %v2525_v5, %v2564_v13  ;;  %v2579_v5 = vld [vmem:[%s10183_s2 + $0x14] sm:$0x2] }
 0x4c2   :  { %v2489_v46 = vmul.f32 %v6144_v6, %v6140_v42  ;;  %v2537_v43 = vrot.slane %v2535_v23, 7  ;;  %v2543_v63 = vshll.u32 %v5596_v34, 16  ;;  %2566 = vst [vmem:[%s10183_s2] sm:$0x2] %v2565_v35  ;;  %v2568_v3 = vsel %vm8746_vm9, %v2529_v7, %v2567_v39 }
 0x4c3   :  { %v5597_v44 = vpack.c.bf16 %v2488_v55, %v2488_v55  ;;  %v2541_v31 = vrot.slane %v2539_v40, 7  ;;  %2569 = vst [vmem:[%s10183_s2 + $0x4] sm:$0x2] %v2568_v3  ;;  %v2571_v14 = vsel %vm8746_vm9, %v2533_v30, %v2570_v24  ;;  %v2629_v32 = vrot.slane %v2613_v49, %v7322_v11  ;;  %v8955_v3 = vld [vmem:[%s10181_s1 + $0x78] sm:$0xff]  ;;  %v8961_v24 = vld [vmem:[%s10181_s1 + $0x60] sm:$0xff] }
 0x4c4   :  { %v5598_v10 = vpack.c.bf16 %v2489_v46, %v2489_v46  ;;  %v2545_v50 = vrot.slane %v2543_v63, 7  ;;  %2572 = vst [vmem:[%s10183_s2 + $0x8] sm:$0x2] %v2571_v14  ;;  %v2574_v52 = vsel %vm8746_vm9, %v2537_v43, %v2573_v12  ;;  %v2615_v42 = vcombine.low %v2488_v55, %v2489_v46  ;;  %v8943_v43 = vld [vmem:[%s10181_s1 + $0x90] sm:$0xff]  ;;  %v8949_v63 = vld [vmem:[%s10181_s1 + $0x68] sm:$0xff]  ;;  %v8979_v14 = vld [vmem:[%s10181_s1 + $0x58] sm:$0xff] }
 0x4c5   :  { %v2547_v15 = vshll.u32 %v5597_v44, 16  ;;  %2575 = vst [vmem:[%s10183_s2 + $0xc] sm:$0x2] %v2574_v52  ;;  %v2577_v49 = vsel %vm8746_vm9, %v2541_v31, %v2576_v0  ;;  %v2644_v27 = vcombine.low %v2622_v62, %v2629_v32  ;;  %v2636_v7 = vrot.slane %v2614_v18, %v7322_v11  ;;  %v2582_v62 = vld [vmem:[%s10183_s2 + $0x18] sm:$0x2]  ;;  %v8967_v44 = vld [vmem:[%s10181_s1 + $0x70] sm:$0xff] }
 0x4c6   :  { %v2551_v38 = vshll.u32 %v5598_v10, 16  ;;  %2578 = vst [vmem:[%s10183_s2 + $0x10] sm:$0x2] %v2577_v49  ;;  %v2580_v34 = vsel %vm8746_vm9, %v2545_v50, %v2579_v5  ;;  %v2643_v23 = vrot.slane %v2615_v42, %v7322_v11  ;;  %v2585_v18 = vld [vmem:[%s10183_s2 + $0x1c] sm:$0x2]  ;;  %v8973_v31 = vld [vmem:[%s10181_s1 + $0x48] sm:$0xff] }
 0x4c7   :  { %v2549_v13 = vrot.slane %v2547_v15, 7  ;;  %2581 = vst [vmem:[%s10183_s2 + $0x14] sm:$0x2] %v2580_v34  ;;  %v2652_v30 = vrot.slane %v2644_v27, %v7322_v11  ;;  %v8985_v12 = vld [vmem:[%s10181_s1 + $0x40] sm:$0xff]  ;;  %v8991_v32 = vld [vmem:[%s10181_s1 + $0x50] sm:$0xff]  ;;  %v8997_v10 = vld [vmem:[%s10181_s1 + $0x28] sm:$0xff] }
 0x4c8   :  { %v2553_v6 = vrot.slane %v2551_v38, 7  ;;  %v2645_v55 = vcombine.low %v2636_v7, %v2643_v23  ;;  %10333 = vst [vmem:[#allocation8_spill] sm:$0xff] %v8985_v12  ;;  %10334 = vst [vmem:[#allocation9_spill] sm:$0xff] %v8991_v32  ;;  %v9003_v50 = vld [vmem:[%s10181_s1 + $0x38] sm:$0xff]  ;;  %v9009_v52 = vld [vmem:[%s10181_s1 + $0x20] sm:$0xff]  ;;  %v10342_v5 = vmov 0.0  }
 0x4c9   :  { %v2583_v40 = vsel %vm8746_vm9, %v2549_v13, %v2582_v62  ;;  %10335 = vst [vmem:[#allocation10_spill] sm:$0xff] %v8997_v10  ;;  %10336 = vst [vmem:[#allocation11_spill] sm:$0xff] %v9003_v50  ;;  %v9015_v0 = vld [vmem:[%s10181_s1 + $0x30] sm:$0xff]  ;;  %v9021_v42 = vld [vmem:[%s10181_s1 + $0x8] sm:$0xff] }
 0x4ca   :  { %2584 = vst [vmem:[%s10183_s2 + $0x18] sm:$0x2] %v2583_v40  ;;  %v2586_v35 = vsel %vm8746_vm9, %v2553_v6, %v2585_v18  ;;  %v2659_v39 = vrot.slane %v2645_v55, %v7322_v11  ;;  %10337 = vst [vmem:[#allocation12_spill] sm:$0xff] %v9009_v52  ;;  %v9027_v15 = vld [vmem:[%s10181_s1 + $0x18] sm:$0xff]  ;;  %v9033_v49 = vld [vmem:[%s10181_s1] sm:$0xff] }
 0x4cb   :  { %2587 = vst [vmem:[%s10183_s2 + $0x1c] sm:$0x2] %v2586_v35  ;;  %10338 = vst [vmem:[#allocation13_spill] sm:$0xff] %v9015_v0  ;;  %v9040_v27 = vld [vmem:[%s10181_s1 + $0x10] sm:$0xff]  ;;  %v10345_v34 = vld [vmem:[#allocation7_spill] sm:$0xff] }
 0x4cc   :  { %v2660_v46 = vcombine.low %v2652_v30, %v2659_v39  ;;  %10339 = vst [vmem:[#allocation14_spill] sm:$0xff] %v9021_v42  ;;  %10340 = vst [vmem:[#allocation15_spill] sm:$0xff] %v9027_v15  ;;  %v10344_v38 = vld [vmem:[#allocation6_spill] sm:$0xff] }
 0x4ce   :  { %2727 = vmatmul.mubr.f32.vlgmr.msra.gmra.mxu0 %v2660_v46  ;;  %2798 = vmatmul.mubr.f32.vlgmr.msra.gmra.mxu1 %v2660_v46 }
 0x4cf   :  { %3290 = vmatpush1.msra.mxu0 %v8395_v36  ;;  %3361 = vmatpush1.msra.mxu1 %v8401_v48  ;;  %v10325_v36 = vld [vmem:[#allocation16_spill] sm:$0xff]  ;;  %v10326_v48 = vld [vmem:[#allocation17_spill] sm:$0xff] }
 0x4d0   :  { %3291 = vmatprep.subr.mxu0 %v8407_v58  ;;  %3362 = vmatprep.subr.mxu1 %v8413_v60  ;;  %v10327_v58 = vld [vmem:[#allocation18_spill] sm:$0xff]  ;;  %v10328_v60 = vld [vmem:[#allocation4_spill] sm:$0xff]  ;;  %10341 = vst [vmem:[#allocation16_spill] sm:$0xff] %v9033_v49  ;;  %10343 = vst [vmem:[#allocation17_spill] sm:$0xff] %v9040_v27 }
 0x4d1   :  { %3292 = vmatpush1.msra.mxu0 %v8419_v61  ;;  %3363 = vmatpush1.msra.mxu1 %v8425_v17  ;;  %v10329_v61 = vld [vmem:[#allocation5_spill] sm:$0xff]  ;;  %v10330_v17 = vld [vmem:[#allocation19_spill] sm:$0xff] }
 0x4d2   :  { %3293 = vmatprep.subr.mxu0 %v8431_v2  ;;  %3364 = vmatprep.subr.mxu1 %v8437_v1  ;;  %v10331_v2 = vld [vmem:[#allocation20_spill] sm:$0xff]  ;;  %v10332_v1 = vld [vmem:[#allocation21_spill] sm:$0xff] }
 0x4d3   :  { %3294 = vmatpush1.msra.mxu0 %v8443_v41  ;;  %3365 = vmatpush1.msra.mxu1 %v8449_v22  ;;  %v8853_v41 = vld [vmem:[%s10181_s1 + $0xe8] sm:$0xff]  ;;  %v8859_v22 = vld [vmem:[%s10181_s1 + $0xf8] sm:$0xff] }
 0x4d4   :  { %3295 = vmatprep.subr.mxu0 %v8455_v47  ;;  %3366 = vmatprep.subr.mxu1 %v8461_v9  ;;  %v8865_v47 = vld [vmem:[%s10181_s1 + $0xe0] sm:$0xff]  ;;  %v8871_v9 = vld [vmem:[%s10181_s1 + $0xf0] sm:$0xff] }
 0x4d5   :  { %3296 = vmatpush1.msra.mxu0 %v8467_v25  ;;  %3367 = vmatpush1.msra.mxu1 %v8473_v26  ;;  %v8877_v25 = vld [vmem:[%s10181_s1 + $0xc8] sm:$0xff]  ;;  %v8883_v26 = vld [vmem:[%s10181_s1 + $0xd8] sm:$0xff] }
 0x4d6   :  { %3297 = vmatprep.subr.mxu0 %v8479_v53  ;;  %3368 = vmatprep.subr.mxu1 %v8485_v4  ;;  %v8889_v53 = vld [vmem:[%s10181_s1 + $0xc0] sm:$0xff]  ;;  %v8895_v4 = vld [vmem:[%s10181_s1 + $0xd0] sm:$0xff] }
 0x4d7   :  { %3298 = vmatpush1.msra.mxu0 %v8491_v33  ;;  %3369 = vmatpush1.msra.mxu1 %v8497_v16  ;;  %v8901_v33 = vld [vmem:[%s10181_s1 + $0xa8] sm:$0xff]  ;;  %v8907_v16 = vld [vmem:[%s10181_s1 + $0xb8] sm:$0xff] }
 0x4d8   :  { %3299 = vmatprep.subr.mxu0 %v8503_v45  ;;  %3370 = vmatprep.subr.mxu1 %v8509_v54  ;;  %v8913_v45 = vld [vmem:[%s10181_s1 + $0xa0] sm:$0xff]  ;;  %v8919_v54 = vld [vmem:[%s10181_s1 + $0xb0] sm:$0xff] }
 0x4d9   :  { %3300 = vmatpush1.msra.mxu0 %v8515_v51  ;;  %3371 = vmatpush1.msra.mxu1 %v8521_v57  ;;  %v8925_v51 = vld [vmem:[%s10181_s1 + $0x88] sm:$0xff]  ;;  %v8931_v57 = vld [vmem:[%s10181_s1 + $0x98] sm:$0xff] }
 0x4da   :  { %3301 = vmatprep.subr.mxu0 %v10325_v36  ;;  %3372 = vmatprep.subr.mxu1 %v10326_v48 }
 0x4db   :  { %3302 = vmatpush1.msra.mxu0 %v10327_v58  ;;  %3373 = vmatpush1.msra.mxu1 %v10328_v60 }
 0x4dc   :  { %3303 = vmatprep.subr.mxu0 %v10329_v61  ;;  %3374 = vmatprep.subr.mxu1 %v10330_v17  ;;  %v5415_v61 = vld [vmem:[%s10182_s0 + $0x4] ss:$8 sm:$0xf] }
 0x4dd   :  { %3304 = vmatpush1.msra.mxu0 %v10331_v2  ;;  %3375 = vmatpush1.msra.mxu1 %v10332_v1  ;;  %v5416_v17 = vld [vmem:[%s10182_s0 + $0x24] ss:$8 sm:$0xf] }
 0x4de   :  { %3305 = vmatprep.subr.mxu0 %v8853_v41  ;;  %3376 = vmatprep.subr.mxu1 %v8859_v22  ;;  %v5417_v2 = vld [vmem:[%s10182_s0 + $0x44] ss:$8 sm:$0xf] }
 0x4df   :  { %3306 = vmatpush1.msra.mxu0 %v8865_v47  ;;  %3377 = vmatpush1.msra.mxu1 %v8871_v9  ;;  %v5419_v1 = vld [vmem:[%s10182_s0 + $0x84] ss:$8 sm:$0xf] }
 0x4e0   :  { %3307 = vmatprep.subr.mxu0 %v8877_v25  ;;  %3378 = vmatprep.subr.mxu1 %v8883_v26 }
 0x4e1   :  { %3308 = vmatpush1.msra.mxu0 %v8889_v53  ;;  %3379 = vmatpush1.msra.mxu1 %v8895_v4 }
 0x4e2   :  { %3309 = vmatprep.subr.mxu0 %v8901_v33  ;;  %3380 = vmatprep.subr.mxu1 %v8907_v16 }
 0x4e3   :  { %3310 = vmatpush1.msra.mxu0 %v8913_v45  ;;  %3381 = vmatpush1.msra.mxu1 %v8919_v54 }
 0x4e4   :  { %3311 = vmatprep.subr.mxu0 %v8925_v51  ;;  %3382 = vmatprep.subr.mxu1 %v8931_v57 }
 0x4e5   :  { %3312 = vmatpush1.msra.mxu0 %v8937_v29  ;;  %3383 = vmatpush1.msra.mxu1 %v8943_v43 }
 0x4e6   :  { %3313 = vmatprep.subr.mxu0 %v8949_v63  ;;  %3384 = vmatprep.subr.mxu1 %v8955_v3 }
 0x4e7   :  { %3314 = vmatpush1.msra.mxu0 %v8961_v24  ;;  %3385 = vmatpush1.msra.mxu1 %v8967_v44 }
 0x4e8   :  { %3315 = vmatprep.subr.mxu0 %v8973_v31  ;;  %3386 = vmatprep.subr.mxu1 %v8979_v14 }
 0x4e9   :  { %3316 = vmatpush1.msra.mxu0 %v8985_v12  ;;  %3387 = vmatpush1.msra.mxu1 %v8991_v32 }
 0x4ea   :  { %3317 = vmatprep.subr.mxu0 %v8997_v10  ;;  %3388 = vmatprep.subr.mxu1 %v9003_v50 }
 0x4eb   :  { %3318 = vmatpush1.msra.mxu0 %v9009_v52  ;;  %3389 = vmatpush1.msra.mxu1 %v9015_v0 }
 0x4ec   :  { %3319 = vmatprep.subr.mxu0 %v9021_v42  ;;  %3390 = vmatprep.subr.mxu1 %v9027_v15 }
 0x4ed   :  { %3320 = vmatpush1.msra.mxu0 %v9033_v49  ;;  %3353 = vmatprep.mubr.f32.mxu0 %v10342_v5 }
 0x4ee   :  { %3391 = vmatpush1.msra.mxu1 %v9040_v27  ;;  %3424 = vmatprep.mubr.f32.mxu1 %v10342_v5 }
 0x4ef   :  { %3939 = vmatprep.subr.mxu0 %v10344_v38  ;;  %4010 = vmatprep.subr.mxu1 %v10345_v34 }
 0x58e   :  { %v2728_v7 = vpop.f32.mrf.mxu0  ;;  %v2799_v23 = vpop.f32.mrf.mxu1 }
 0x590   :  { %v2730_v13 = vpop.f32.mrf.mxu0  ;;  %v2801_v6 = vpop.f32.mrf.mxu1 }
 0x591   :  { %v2808_v62 = vcombine.low %v2728_v7, %v2730_v13  ;;  %v2809_v55 = vcombine.high %v2728_v7, %v2730_v13  ;;  %v2810_v30 = vcombine.low %v2799_v23, %v2801_v6  ;;  %v2811_v40 = vcombine.high %v2799_v23, %v2801_v6  ;;  %v5418_v13 = vld [vmem:[%s10182_s0 + $0x64] ss:$8 sm:$0xf] }
 0x592   :  { %v5420_v6 = vld [vmem:[%s10182_s0 + $0xa4] ss:$8 sm:$0xf] }
 0x593   :  { %v2818_v18 = vrot.slane %v2808_v62, %v7322_v11  ;;  %v2825_v35 = vrot.slane %v2809_v55, %v7322_v11  ;;  %v2832_v39 = vrot.slane %v2810_v30, %v7322_v11  ;;  %v2839_v46 = vrot.slane %v2811_v40, %v7322_v11  ;;  %v5421_v62 = vld [vmem:[%s10182_s0 + $0xc4] ss:$8 sm:$0xf] }
 0x595   :  { %v2840_v36 = vcombine.low %v2818_v18, %v2832_v39  ;;  %v2841_v48 = vcombine.high %v2818_v18, %v2832_v39  ;;  %v2842_v58 = vcombine.low %v2825_v35, %v2839_v46  ;;  %v2843_v60 = vcombine.high %v2825_v35, %v2839_v46  ;;  %v5422_v35 = vld [vmem:[%s10182_s0 + $0xe4] ss:$8 sm:$0xf] }
 0x597   :  { %v2850_v38 = vrot.slane %v2840_v36, %v7322_v11  ;;  %v2857_v34 = vrot.slane %v2842_v58, %v7322_v11  ;;  %v2864_v7 = vrot.slane %v2841_v48, %v7322_v11  ;;  %v2871_v23 = vrot.slane %v2843_v60, %v7322_v11 }
 0x599   :  { %v2872_v55 = vcombine.high %v2850_v38, %v2850_v38  ;;  %v2873_v30 = vcombine.high %v2857_v34, %v2857_v34  ;;  %v2874_v40 = vcombine.high %v2864_v7, %v2864_v7  ;;  %v2875_v18 = vcombine.high %v2871_v23, %v2871_v23 }
 0x59a   :  { %v9078_v39 = vadd.f32 %v5415_v61, %v2850_v38  ;;  %v9080_v46 = vadd.f32 %v5416_v17, %v2864_v7  ;;  %v9082_v36 = vadd.f32 %v5419_v1, %v2857_v34  ;;  %v9088_v60 = vadd.f32 %v5420_v6, %v2871_v23 }
 0x59b   :  { %v9084_v48 = vadd.f32 %v5417_v2, %v2872_v55  ;;  %v9086_v58 = vadd.f32 %v5418_v13, %v2874_v40  ;;  %v9090_v27 = vadd.f32 %v5421_v62, %v2873_v30  ;;  %v9094_v15 = vadd.f32 %v5422_v35, %v2875_v18 }
 0x59c   :  { %v5423_v5 = vmul.f32 -1.442695, %v9078_v39  ;;  %v5424_v49 = vmul.f32 -1.442695, %v9080_v46  ;;  %v5427_v2 = vmul.f32 -1.442695, %v9082_v36 }
 0x59d   :  { %v5425_v61 = vmul.f32 -1.442695, %v9084_v48  ;;  %v5426_v17 = vmul.f32 -1.442695, %v9086_v58  ;;  %v2948_v1 = vrot.slane %v9078_v39, 1  ;;  %v2949_v34 = vrot.slane %v9080_v46, 1 }
 0x59e   :  { %6145 = vpow2.f32 %v5423_v5  ;;  %v5428_v38 = vmul.f32 -1.442695, %v9088_v60  ;;  %v5429_v7 = vmul.f32 -1.442695, %v9090_v27  ;;  %v2950_v23 = vrot.slane %v9084_v48, 1 }
 0x59f   :  { %6147 = vpow2.f32 %v5424_v49  ;;  %v5430_v13 = vmul.f32 -1.442695, %v9094_v15  ;;  %v2951_v6 = vrot.slane %v9086_v58, 1  ;;  %v2952_v5 = vrot.slane %v9082_v36, 1 }
 0x5a0   :  { %6149 = vpow2.f32 %v5425_v61  ;;  %v5431_v62 = vmul.f32 -1.442695, %v2948_v1  ;;  %v2953_v49 = vrot.slane %v9088_v60, 1  ;;  %v5432_v55 = vmul.f32 -1.442695, %v2949_v34 }
 0x5a1   :  { %6151 = vpow2.f32 %v5426_v17  ;;  %v2954_v30 = vrot.slane %v9090_v27, 1  ;;  %v5433_v40 = vmul.f32 -1.442695, %v2950_v23  ;;  %v2955_v18 = vrot.slane %v9094_v15, 1 }
 0x5a2   :  { %6153 = vpow2.f32 %v5427_v2  ;;  %v5434_v35 = vmul.f32 -1.442695, %v2951_v6  ;;  %v5435_v61 = vmul.f32 -1.442695, %v2952_v5  ;;  %v5436_v17 = vmul.f32 -1.442695, %v2953_v49 }
 0x5a3   :  { %6155 = vpow2.f32 %v5428_v38  ;;  %v5437_v2 = vmul.f32 -1.442695, %v2954_v30  ;;  %v5438_v1 = vmul.f32 -1.442695, %v2955_v18 }
 0x5a4   :  { %6157 = vpow2.f32 %v5429_v7 }
 0x5a5   :  { %6159 = vpow2.f32 %v5430_v13 }
 0x5a6   :  { %6161 = vpow2.f32 %v5431_v62 }
 0x5a7   :  { %6163 = vpow2.f32 %v5432_v55 }
 0x5a8   :  { %6165 = vpow2.f32 %v5433_v40 }
 0x5a9   :  { %6167 = vpow2.f32 %v5434_v35 }
 0x5aa   :  { %6169 = vpow2.f32 %v5435_v61 }
 0x5ab   :  { %v6146_v38 = vpop.eup %6145  ;;  %6171 = vpow2.f32 %v5436_v17 }
 0x5ac   :  { %v6148_v34 = vpop.eup %6147  ;;  %v2916_v7 = vadd.f32 1.0, %v6146_v38  ;;  %6173 = vpow2.f32 %v5437_v2 }
 0x5ad   :  { %v6150_v42 = vpop.eup %6149  ;;  %v2917_v23 = vadd.f32 1.0, %v6148_v34  ;;  %6175 = vpow2.f32 %v5438_v1 }
 0x5ae   :  { %v6152_v13 = vpop.eup %6151  ;;  %v2918_v0 = vadd.f32 1.0, %v6150_v42  ;;  %6177 = vrcp.f32 %v2916_v7 }
 0x5af   :  { %v6154_v6 = vpop.eup %6153  ;;  %v2919_v5 = vadd.f32 1.0, %v6152_v13  ;;  %6179 = vrcp.f32 %v2917_v23 }
 0x5b0   :  { %v6156_v62 = vpop.eup %6155  ;;  %v2920_v49 = vadd.f32 1.0, %v6154_v6  ;;  %6181 = vrcp.f32 %v2918_v0 }
 0x5b1   :  { %v6158_v55 = vpop.eup %6157  ;;  %v2921_v30 = vadd.f32 1.0, %v6156_v62  ;;  %6183 = vrcp.f32 %v2919_v5 }
 0x5b2   :  { %v6160_v40 = vpop.eup %6159  ;;  %v2922_v18 = vadd.f32 1.0, %v6158_v55  ;;  %6185 = vrcp.f32 %v2920_v49  ;;  %v3012_v55 = vrot.slane %v9078_v39, 2 }
 0x5b3   :  { %v6162_v35 = vpop.eup %6161  ;;  %v2923_v61 = vadd.f32 1.0, %v6160_v40  ;;  %6187 = vrcp.f32 %v2921_v30 }
 0x5b4   :  { %v6164_v17 = vpop.eup %6163  ;;  %6189 = vrcp.f32 %v2922_v18  ;;  %v2988_v2 = vadd.f32 1.0, %v6162_v35  ;;  %v3013_v18 = vrot.slane %v9080_v46, 2 }
 0x5b5   :  { %v6166_v42 = vpop.eup %6165  ;;  %6191 = vrcp.f32 %v2923_v61  ;;  %v2989_v1 = vadd.f32 1.0, %v6164_v17  ;;  %v3014_v61 = vrot.slane %v9084_v48, 2 }
 0x5b6   :  { %v6168_v38 = vpop.eup %6167  ;;  %v2990_v34 = vadd.f32 1.0, %v6166_v42  ;;  %6193 = vrcp.f32 %v2988_v2  ;;  %v3015_v2 = vrot.slane %v9086_v58, 2 }
 0x5b7   :  { %v6170_v7 = vpop.eup %6169  ;;  %v2991_v0 = vadd.f32 1.0, %v6168_v38  ;;  %6195 = vrcp.f32 %v2989_v1  ;;  %v3016_v1 = vrot.slane %v9082_v36, 2  ;;  %v3036_v38 = vrot.slane %v9078_v39, 3 }
 0x5b8   :  { %v6172_v23 = vpop.eup %6171  ;;  %v2992_v13 = vadd.f32 1.0, %v6170_v7  ;;  %6197 = vrcp.f32 %v2990_v34  ;;  %v3017_v7 = vrot.slane %v9088_v60, 2  ;;  %v3039_v39 = vrot.slane %v9086_v58, 3 }
 0x5b9   :  { %v6174_v6 = vpop.eup %6173  ;;  %v2993_v5 = vadd.f32 1.0, %v6172_v23  ;;  %6199 = vrcp.f32 %v2991_v0  ;;  %v3037_v0 = vrot.slane %v9080_v46, 3  ;;  %v5439_v46 = vmul.f32 -1.442695, %v3036_v38 }
 0x5ba   :  { %v6176_v62 = vpop.eup %6175  ;;  %v2994_v49 = vadd.f32 1.0, %v6174_v6  ;;  %6201 = vrcp.f32 %v2992_v13  ;;  %v3018_v13 = vrot.slane %v9090_v27, 2  ;;  %v3038_v6 = vrot.slane %v9084_v48, 3 }
 0x5bb   :  { %v6178_v30 = vpop.eup %6177  ;;  %v2995_v40 = vadd.f32 1.0, %v6176_v62  ;;  %6203 = vrcp.f32 %v2993_v5  ;;  %v3019_v62 = vrot.slane %v9094_v15, 2  ;;  %v3042_v48 = vrot.slane %v9090_v27, 3 }
 0x5bc   :  { %v6180_v35 = vpop.eup %6179  ;;  %6205 = vrcp.f32 %v2994_v49  ;;  %v5441_v50 = vmul.f32 -1.442695, %v3038_v6  ;;  %v3043_v58 = vrot.slane %v9094_v15, 3 }
 0x5bd   :  { %v6182_v17 = vpop.eup %6181  ;;  %6207 = vrcp.f32 %v2995_v40 }
 0x5be   :  { %v9114_v42 = vpop.eup %6183  ;;  %6209 = vtanh.f32 %v3012_v55  ;;  %v3040_v55 = vrot.slane %v9082_v36, 3 }
 0x5bf   :  { %v9118_v34 = vpop.eup %6185  ;;  %6211 = vtanh.f32 %v3013_v18  ;;  %v3041_v18 = vrot.slane %v9088_v60, 3  ;;  %v5445_v60 = vmul.f32 -1.442695, %v3042_v48 }
 0x5c0   :  { %v9122_v23 = vpop.eup %6187  ;;  %6213 = vtanh.f32 %v3014_v61  ;;  %v5440_v61 = vmul.f32 -1.442695, %v3037_v0 }
 0x5c1   :  { %v9126_v5 = vpop.eup %6189  ;;  %6215 = vtanh.f32 %v3015_v2  ;;  %v5442_v2 = vmul.f32 -1.442695, %v3039_v39  ;;  %v5444_v38 = vmul.f32 -1.442695, %v3041_v18 }
 0x5c2   :  { %v9130_v49 = vpop.eup %6191  ;;  %6217 = vtanh.f32 %v3016_v1  ;;  %v5443_v1 = vmul.f32 -1.442695, %v3040_v55 }
 0x5c3   :  { %v6194_v40 = vpop.eup %6193  ;;  %6219 = vtanh.f32 %v3017_v7 }
 0x5c4   :  { %v6196_v52 = vpop.eup %6195  ;;  %6221 = vtanh.f32 %v3018_v13  ;;  %v5446_v13 = vmul.f32 -1.442695, %v3043_v58  ;;  %v3100_v27 = vmul.f32 %v6194_v40, %v8713_v28 }
 0x5c5   :  { %v6198_v10 = vpop.eup %6197  ;;  %6223 = vtanh.f32 %v3019_v62  ;;  %v3101_v15 = vmul.f32 %v6196_v52, %v8717_v20 }
 0x5c6   :  { %v6200_v32 = vpop.eup %6199  ;;  %6225 = vpow2.f32 %v5439_v46  ;;  %v3102_v55 = vmul.f32 %v6198_v10, %v8720_v37 }
 0x5c7   :  { %v6202_v36 = vpop.eup %6201  ;;  %6227 = vpow2.f32 %v5440_v61  ;;  %v3103_v18 = vmul.f32 %v6200_v32, %v8724_v21 }
 0x5c8   :  { %v6204_v7 = vpop.eup %6203  ;;  %6229 = vpow2.f32 %v5441_v50  ;;  %v3104_v58 = vmul.f32 %v6202_v36, %v8727_v19 }
 0x5c9   :  { %v6206_v0 = vpop.eup %6205  ;;  %6231 = vpow2.f32 %v5442_v2  ;;  %v3105_v20 = vmul.f32 %v6204_v7, %v8730_v59 }
 0x5ca   :  { %v6208_v12 = vpop.eup %6207  ;;  %6233 = vpow2.f32 %v5443_v1 }
 0x5cb   :  { %v6210_v6 = vpop.eup %6209  ;;  %6235 = vpow2.f32 %v5444_v38 }
 0x5cc   :  { %v6212_v62 = vpop.eup %6211  ;;  %6237 = vpow2.f32 %v5445_v60  ;;  %v3108_v39 = vmul.f32 %v6210_v6, %v6178_v30  ;;  %v3106_v60 = vmul.f32 %v6206_v0, %v8739_v8  ;;  %v3107_v6 = vmul.f32 %v6208_v12, %v8741_v56 }
 0x5cd   :  { %v6214_v46 = vpop.eup %6213  ;;  %6239 = vpow2.f32 %v5446_v13  ;;  %v3109_v50 = vmul.f32 %v6212_v62, %v6180_v35 }
 0x5ce   :  { %v6216_v61 = vpop.eup %6215  ;;  %v3110_v48 = vmul.f32 %v6214_v46, %v6182_v17  ;;  %v9141_v2 = vadd.f32 %v3108_v39, %v3100_v27 }
 0x5cf   :  { %v6218_v28 = vpop.eup %6217  ;;  %v3111_v40 = vmul.f32 %v6216_v61, %v9114_v42  ;;  %v9145_v52 = vadd.f32 %v3109_v50, %v3101_v15 }
 0x5d0   :  { %v6220_v30 = vpop.eup %6219  ;;  %v3112_v37 = vmul.f32 %v6218_v28, %v9118_v34  ;;  %v9148_v10 = vadd.f32 %v3110_v48, %v3102_v55  ;;  %6241 = vtanh.f32 %v9141_v2 }
 0x5d1   :  { %v6222_v21 = vpop.eup %6221  ;;  %v3113_v32 = vmul.f32 %v6220_v30, %v9122_v23  ;;  %v9152_v19 = vadd.f32 %v3111_v40, %v3103_v18  ;;  %6243 = vtanh.f32 %v9145_v52 }
 0x5d2   :  { %v6224_v35 = vpop.eup %6223  ;;  %v9155_v17 = vadd.f32 %v3112_v37, %v3104_v58  ;;  %6245 = vtanh.f32 %v9148_v10  ;;  %v3114_v39 = vmul.f32 %v6222_v21, %v9126_v5 }
 0x5d3   :  { %v6226_v59 = vpop.eup %6225  ;;  %v9158_v42 = vadd.f32 %v3113_v32, %v3105_v20  ;;  %6247 = vtanh.f32 %v9152_v19  ;;  %v3115_v50 = vmul.f32 %v6224_v35, %v9130_v49 }
 0x5d4   :  { %v6228_v34 = vpop.eup %6227  ;;  %v3076_v1 = vadd.f32 1.0, %v6226_v59  ;;  %6249 = vtanh.f32 %v9155_v17  ;;  %v9167_v48 = vadd.f32 %v3114_v39, %v3106_v60 }
 0x5d5   :  { %v6230_v36 = vpop.eup %6229  ;;  %v3077_v23 = vadd.f32 1.0, %v6228_v34  ;;  %6251 = vtanh.f32 %v9158_v42  ;;  %v9169_v0 = vadd.f32 %v3115_v50, %v3107_v6  ;;  %v3197_v50 = vld [vmem:[%s10183_s2 + $0x8] sm:$0x4] }
 0x5d6   :  { %v6232_v38 = vpop.eup %6231  ;;  %v3078_v7 = vadd.f32 1.0, %v6230_v36  ;;  %6253 = vrcp.f32 %v3076_v1 }
 0x5d7   :  { %v6234_v13 = vpop.eup %6233  ;;  %v3079_v27 = vadd.f32 1.0, %v6232_v38  ;;  %6255 = vrcp.f32 %v3077_v23  ;;  %v3191_v38 = vld [vmem:[%s10183_s2] sm:$0x4]  ;;  %v9257_v23 = vld [vmem:[%s10181_s1 + $0x1f0] sm:$0xff] }
 0x5d8   :  { %v6236_v15 = vpop.eup %6235  ;;  %v3080_v62 = vadd.f32 1.0, %v6234_v13  ;;  %6257 = vrcp.f32 %v3078_v7 }
 0x5d9   :  { %v6238_v55 = vpop.eup %6237  ;;  %v3081_v46 = vadd.f32 1.0, %v6236_v15  ;;  %6259 = vrcp.f32 %v3079_v27  ;;  %v3194_v15 = vld [vmem:[%s10183_s2 + $0x4] sm:$0x4] }
 0x5da   :  { %v6240_v18 = vpop.eup %6239  ;;  %v3082_v61 = vadd.f32 1.0, %v6238_v55  ;;  %6261 = vrcp.f32 %v3080_v62 }
 0x5db   :  { %v3083_v8 = vadd.f32 1.0, %v6240_v18  ;;  %6263 = vrcp.f32 %v3081_v46 }
 0x5dc   :  { %6265 = vrcp.f32 %v3082_v61 }
 0x5dd   :  { %v6242_v56 = vpop.eup %6241  ;;  %6267 = vrcp.f32 %v3083_v8 }
 0x5de   :  { %v6244_v12 = vpop.eup %6243  ;;  %6269 = vtanh.f32 %v9167_v48 }
 0x5df   :  { %v6246_v5 = vpop.eup %6245  ;;  %6271 = vtanh.f32 %v9169_v0 }
 0x5e0   :  { %v6248_v58 = vpop.eup %6247 }
 0x5e1   :  { %v6250_v49 = vpop.eup %6249 }
 0x5e2   :  { %v6252_v28 = vpop.eup %6251 }
 0x5e3   :  { %v6254_v40 = vpop.eup %6253 }
 0x5e4   :  { %v6256_v20 = vpop.eup %6255  ;;  %v3132_v30 = vmul.f32 %v6254_v40, %v6242_v56 }
 0x5e5   :  { %v6258_v37 = vpop.eup %6257  ;;  %v3133_v21 = vmul.f32 %v6256_v20, %v6244_v12  ;;  %v3203_v20 = vld [vmem:[%s10183_s2 + $0x10] sm:$0x4] }
 0x5e6   :  { %v6260_v32 = vpop.eup %6259  ;;  %v3134_v35 = vmul.f32 %v6258_v37, %v6246_v5  ;;  %v5599_v59 = vpack.c.bf16 %v3132_v30, %v3132_v30  ;;  %v3200_v5 = vld [vmem:[%s10183_s2 + $0xc] sm:$0x4] }
 0x5e7   :  { %v6262_v34 = vpop.eup %6261  ;;  %v3135_v1 = vmul.f32 %v6260_v32, %v6248_v58  ;;  %v5600_v36 = vpack.c.bf16 %v3133_v21, %v3133_v21  ;;  %v3239_v7 = vcombine.low %v3132_v30, %v3133_v21 }
 0x5e8   :  { %v6264_v60 = vpop.eup %6263  ;;  %v3136_v13 = vmul.f32 %v6262_v34, %v6250_v49  ;;  %v5601_v27 = vpack.c.bf16 %v3134_v35, %v3134_v35  ;;  %v3172_v6 = vrot.slane %v5599_v59, 6  ;;  %v3206_v59 = vld [vmem:[%s10183_s2 + $0x14] sm:$0x4] }
 0x5e9   :  { %v6266_v62 = vpop.eup %6265  ;;  %v3137_v39 = vmul.f32 %v6264_v60, %v6252_v28  ;;  %v5602_v55 = vpack.c.bf16 %v3135_v1, %v3135_v1  ;;  %v3173_v46 = vrot.slane %v5600_v36, 6  ;;  %v3240_v18 = vcombine.low %v3134_v35, %v3135_v1 }
 0x5ea   :  { %v6268_v61 = vpop.eup %6267  ;;  %v5603_v8 = vpack.c.bf16 %v3136_v13, %v3136_v13  ;;  %v3174_v56 = vrot.slane %v5601_v27, 6  ;;  %v3192_v12 = vsel %vm9174_vm12, %v3172_v6, %v3191_v38  ;;  %v3249_v30 = vrot.slane %v3239_v7, %v7322_v11 }
 0x5eb   :  { %v6270_v58 = vpop.eup %6269  ;;  %v5604_v49 = vpack.c.bf16 %v3137_v39, %v3137_v39  ;;  %v3175_v28 = vrot.slane %v5602_v55, 6  ;;  %3193 = vst [vmem:[%s10183_s2] sm:$0x4] %v3192_v12  ;;  %v3195_v40 = vsel %vm9174_vm12, %v3173_v46, %v3194_v15  ;;  %v3256_v34 = vrot.slane %v3240_v18, %v7322_v11  ;;  %v3212_v46 = vld [vmem:[%s10183_s2 + $0x1c] sm:$0x4] }
 0x5ec   :  { %v6272_v37 = vpop.eup %6271  ;;  %v3138_v21 = vmul.f32 %v6270_v58, %v6266_v62  ;;  %v3176_v32 = vrot.slane %v5603_v8, 6  ;;  %3196 = vst [vmem:[%s10183_s2 + $0x4] sm:$0x4] %v3195_v40  ;;  %v3198_v35 = vsel %vm9174_vm12, %v3174_v56, %v3197_v50  ;;  %v3241_v7 = vcombine.low %v3136_v13, %v3137_v39  ;;  %v3209_v13 = vld [vmem:[%s10183_s2 + $0x18] sm:$0x4]  ;;  %v9263_v40 = vld [vmem:[%s10181_s1 + $0x1c8] sm:$0xff] }
 0x5ed   :  { %v3139_v1 = vmul.f32 %v6272_v37, %v6268_v61  ;;  %v3177_v36 = vrot.slane %v5604_v49, 6  ;;  %3199 = vst [vmem:[%s10183_s2 + $0x8] sm:$0x4] %v3198_v35  ;;  %v3201_v38 = vsel %vm9174_vm12, %v3175_v28, %v3200_v5  ;;  %v3271_v39 = vcombine.low %v3249_v30, %v3256_v34  ;;  %v9251_v28 = vld [vmem:[%s10181_s1 + $0x1e0] sm:$0xff]  ;;  %v9281_v37 = vld [vmem:[%s10181_s1 + $0x1d0] sm:$0xff]  ;;  %v9311_v34 = vld [vmem:[%s10181_s1 + $0x188] sm:$0xff] }
 0x5ee   :  { %v5605_v60 = vpack.c.bf16 %v3138_v21, %v3138_v21  ;;  %3202 = vst [vmem:[%s10183_s2 + $0xc] sm:$0x4] %v3201_v38  ;;  %v3204_v27 = vsel %vm9174_vm12, %v3176_v32, %v3203_v20  ;;  %v3263_v18 = vrot.slane %v3241_v7, %v7322_v11  ;;  %v9269_v20 = vld [vmem:[%s10181_s1 + $0x1d8] sm:$0xff]  ;;  %v9275_v30 = vld [vmem:[%s10181_s1 + $0x1c0] sm:$0xff]  ;;  %v9329_v38 = vld [vmem:[%s10181_s1 + $0x190] sm:$0xff] }
 0x5ef   :  { %v5606_v6 = vpack.c.bf16 %v3139_v1, %v3139_v1  ;;  %3205 = vst [vmem:[%s10183_s2 + $0x10] sm:$0x4] %v3204_v27  ;;  %v3207_v15 = vsel %vm9174_vm12, %v3177_v36, %v3206_v59  ;;  %v3242_v62 = vcombine.low %v3138_v21, %v3139_v1  ;;  %v3279_v5 = vrot.slane %v3271_v39, %v7322_v11  ;;  %v9287_v21 = vld [vmem:[%s10181_s1 + $0x1a8] sm:$0xff]  ;;  %v9293_v32 = vld [vmem:[%s10181_s1 + $0x1b8] sm:$0xff]  ;;  %v9299_v35 = vld [vmem:[%s10181_s1 + $0x1a0] sm:$0xff] }
 0x5f0   :  { %v3178_v55 = vrot.slane %v5605_v60, 6  ;;  %3208 = vst [vmem:[%s10183_s2 + $0x14] sm:$0x4] %v3207_v15  ;;  %v9305_v59 = vld [vmem:[%s10181_s1 + $0x1b0] sm:$0xff]  ;;  %v9317_v1 = vld [vmem:[%s10181_s1 + $0x198] sm:$0xff]  ;;  %v9323_v36 = vld [vmem:[%s10181_s1 + $0x180] sm:$0xff] }
 0x5f1   :  { %v3179_v50 = vrot.slane %v5606_v6, 6  ;;  %v3270_v61 = vrot.slane %v3242_v62, %v7322_v11  ;;  %v9335_v7 = vld [vmem:[%s10181_s1 + $0x168] sm:$0xff]  ;;  %v9341_v60 = vld [vmem:[%s10181_s1 + $0x178] sm:$0xff]  ;;  %v9347_v27 = vld [vmem:[%s10181_s1 + $0x160] sm:$0xff] }
 0x5f2   :  { %v3210_v8 = vsel %vm9174_vm12, %v3178_v55, %v3209_v13  ;;  %v9353_v6 = vld [vmem:[%s10181_s1 + $0x170] sm:$0xff]  ;;  %v9359_v15 = vld [vmem:[%s10181_s1 + $0x148] sm:$0xff]  ;;  %v9365_v13 = vld [vmem:[%s10181_s1 + $0x158] sm:$0xff] }
 0x5f3   :  { %3211 = vst [vmem:[%s10183_s2 + $0x18] sm:$0x4] %v3210_v8  ;;  %v3213_v56 = vsel %vm9174_vm12, %v3179_v50, %v3212_v46  ;;  %v3272_v12 = vcombine.low %v3263_v18, %v3270_v61  ;;  %v9371_v62 = vld [vmem:[%s10181_s1 + $0x140] sm:$0xff]  ;;  %v9377_v39 = vld [vmem:[%s10181_s1 + $0x150] sm:$0xff]  ;;  %v9383_v55 = vld [vmem:[%s10181_s1 + $0x128] sm:$0xff] }
 0x5f4   :  { %3214 = vst [vmem:[%s10183_s2 + $0x1c] sm:$0x4] %v3213_v56  ;;  %10348 = vst [vmem:[#allocation18_spill] sm:$0xff] %v9383_v55  ;;  %v9389_v46 = vld [vmem:[%s10181_s1 + $0x138] sm:$0xff]  ;;  %v9395_v50 = vld [vmem:[%s10181_s1 + $0x120] sm:$0xff] }
 0x5f5   :  { %v3286_v58 = vrot.slane %v3272_v12, %v7322_v11  ;;  %10349 = vst [vmem:[#allocation4_spill] sm:$0xff] %v9389_v46  ;;  %10350 = vst [vmem:[#allocation5_spill] sm:$0xff] %v9395_v50  ;;  %v9401_v18 = vld [vmem:[%s10181_s1 + $0x130] sm:$0xff]  ;;  %v9407_v61 = vld [vmem:[%s10181_s1 + $0x108] sm:$0xff] }
 0x5f6   :  { %10351 = vst [vmem:[#allocation19_spill] sm:$0xff] %v9401_v18  ;;  %10352 = vst [vmem:[#allocation20_spill] sm:$0xff] %v9407_v61  ;;  %v9413_v8 = vld [vmem:[%s10181_s1 + $0x118] sm:$0xff]  ;;  %v9419_v56 = vld [vmem:[%s10181_s1 + $0x100] sm:$0xff] }
 0x5f7   :  { %v3287_v49 = vcombine.low %v3279_v5, %v3286_v58  ;;  %10353 = vst [vmem:[#allocation21_spill] sm:$0xff] %v9413_v8  ;;  %10354 = vst [vmem:[#allocation6_spill] sm:$0xff] %v9419_v56  ;;  %v9425_v12 = vld [vmem:[%s10181_s1 + $0x110] sm:$0xff] }
 0x5f8   :  { %10355 = vst [vmem:[#allocation7_spill] sm:$0xff] %v9425_v12 }
 0x5f9   :  { %3354 = vmatmul.mubr.f32.vlgmr.msra.gmra.mxu0 %v3287_v49  ;;  %3425 = vmatmul.mubr.f32.vlgmr.msra.gmra.mxu1 %v3287_v49 }
 0x5fa   :  { %3940 = vmatpush1.msra.mxu0 %v9251_v28  ;;  %4011 = vmatpush1.msra.mxu1 %v9257_v23 }
 0x5fb   :  { %3941 = vmatprep.subr.mxu0 %v9263_v40  ;;  %4012 = vmatprep.subr.mxu1 %v9269_v20 }
 0x5fc   :  { %3942 = vmatpush1.msra.mxu0 %v9275_v30  ;;  %4013 = vmatpush1.msra.mxu1 %v9281_v37 }
 0x5fd   :  { %3943 = vmatprep.subr.mxu0 %v9287_v21  ;;  %4014 = vmatprep.subr.mxu1 %v9293_v32 }
 0x5fe   :  { %3944 = vmatpush1.msra.mxu0 %v9299_v35  ;;  %4015 = vmatpush1.msra.mxu1 %v9305_v59 }
 0x5ff   :  { %3945 = vmatprep.subr.mxu0 %v9311_v34  ;;  %4016 = vmatprep.subr.mxu1 %v9317_v1 }
 0x600   :  { %3946 = vmatpush1.msra.mxu0 %v9323_v36  ;;  %4017 = vmatpush1.msra.mxu1 %v9329_v38 }
 0x601   :  { %3947 = vmatprep.subr.mxu0 %v9335_v7  ;;  %4018 = vmatprep.subr.mxu1 %v9341_v60 }
 0x602   :  { %3948 = vmatpush1.msra.mxu0 %v9347_v27  ;;  %4019 = vmatpush1.msra.mxu1 %v9353_v6 }
 0x603   :  { %3949 = vmatprep.subr.mxu0 %v9359_v15  ;;  %4020 = vmatprep.subr.mxu1 %v9365_v13 }
 0x604   :  { %3950 = vmatpush1.msra.mxu0 %v9371_v62  ;;  %4021 = vmatpush1.msra.mxu1 %v9377_v39 }
 0x605   :  { %3951 = vmatprep.subr.mxu0 %v9383_v55  ;;  %4022 = vmatprep.subr.mxu1 %v9389_v46 }
 0x606   :  { %3952 = vmatpush1.msra.mxu0 %v9395_v50  ;;  %4023 = vmatpush1.msra.mxu1 %v9401_v18 }
 0x607   :  { %3953 = vmatprep.subr.mxu0 %v9407_v61  ;;  %4024 = vmatprep.subr.mxu1 %v9413_v8 }
 0x608   :  { %3954 = vmatpush1.msra.mxu0 %v9419_v56  ;;  %4025 = vmatpush1.msra.mxu1 %v9425_v12 }
 0x609   :  { %3955 = vmatprep.subr.mxu0 %v8853_v41  ;;  %4026 = vmatprep.subr.mxu1 %v8859_v22  ;;  %v10356_v41 = vld [vmem:[#allocation8_spill] sm:$0xff]  ;;  %v10357_v22 = vld [vmem:[#allocation9_spill] sm:$0xff] }
 0x60a   :  { %3956 = vmatpush1.msra.mxu0 %v8865_v47  ;;  %4027 = vmatpush1.msra.mxu1 %v8871_v9  ;;  %v10358_v47 = vld [vmem:[#allocation10_spill] sm:$0xff]  ;;  %v10359_v9 = vld [vmem:[#allocation11_spill] sm:$0xff] }
 0x60b   :  { %3957 = vmatprep.subr.mxu0 %v8877_v25  ;;  %4028 = vmatprep.subr.mxu1 %v8883_v26  ;;  %v10360_v25 = vld [vmem:[#allocation12_spill] sm:$0xff]  ;;  %v10361_v26 = vld [vmem:[#allocation13_spill] sm:$0xff] }
 0x60c   :  { %3958 = vmatpush1.msra.mxu0 %v8889_v53  ;;  %4029 = vmatpush1.msra.mxu1 %v8895_v4  ;;  %v10362_v53 = vld [vmem:[#allocation14_spill] sm:$0xff]  ;;  %v10363_v4 = vld [vmem:[#allocation15_spill] sm:$0xff] }
 0x60d   :  { %3959 = vmatprep.subr.mxu0 %v8901_v33  ;;  %4030 = vmatprep.subr.mxu1 %v8907_v16  ;;  %v10364_v33 = vld [vmem:[#allocation16_spill] sm:$0xff]  ;;  %v10365_v16 = vmov 0.0  }
 0x60e   :  { %3960 = vmatpush1.msra.mxu0 %v8913_v45  ;;  %4031 = vmatpush1.msra.mxu1 %v8919_v54  ;;  %v10366_v45 = vld [vmem:[#allocation17_spill] sm:$0xff] }
 0x60f   :  { %3961 = vmatprep.subr.mxu0 %v8925_v51  ;;  %4032 = vmatprep.subr.mxu1 %v8931_v57  ;;  %v6815_v54 = vld [vmem:[%s10181_s1 + $0x1e8] sm:$0xff]  ;;  %v6816_v51 = vld [vmem:[%s10181_s1 + $0x1f8] sm:$0xff] }
 0x610   :  { %3962 = vmatpush1.msra.mxu0 %v8937_v29  ;;  %4033 = vmatpush1.msra.mxu1 %v8943_v43 }
 0x611   :  { %3963 = vmatprep.subr.mxu0 %v8949_v63  ;;  %4034 = vmatprep.subr.mxu1 %v8955_v3 }
 0x612   :  { %3964 = vmatpush1.msra.mxu0 %v8961_v24  ;;  %4035 = vmatpush1.msra.mxu1 %v8967_v44 }
 0x613   :  { %3965 = vmatprep.subr.mxu0 %v8973_v31  ;;  %4036 = vmatprep.subr.mxu1 %v8979_v14 }
 0x614   :  { %3966 = vmatpush1.msra.mxu0 %v10356_v41  ;;  %4037 = vmatpush1.msra.mxu1 %v10357_v22 }
 0x615   :  { %3967 = vmatprep.subr.mxu0 %v10358_v47  ;;  %4038 = vmatprep.subr.mxu1 %v10359_v9 }
 0x616   :  { %3968 = vmatpush1.msra.mxu0 %v10360_v25  ;;  %4039 = vmatpush1.msra.mxu1 %v10361_v26  ;;  %v5455_v25 = vld [vmem:[%s10182_s0 + $0x5] ss:$8 sm:$0xf] }
 0x617   :  { %3969 = vmatprep.subr.mxu0 %v10362_v53  ;;  %4040 = vmatprep.subr.mxu1 %v10363_v4  ;;  %v5456_v26 = vld [vmem:[%s10182_s0 + $0x25] ss:$8 sm:$0xf] }
 0x618   :  { %3970 = vmatpush1.msra.mxu0 %v10364_v33  ;;  %4003 = vmatprep.mubr.f32.mxu0 %v10365_v16  ;;  %v5457_v53 = vld [vmem:[%s10182_s0 + $0x45] ss:$8 sm:$0xf] }
 0x619   :  { %4041 = vmatpush1.msra.mxu1 %v10366_v45  ;;  %4074 = vmatprep.mubr.f32.mxu1 %v10365_v16  ;;  %v5459_v4 = vld [vmem:[%s10182_s0 + $0x85] ss:$8 sm:$0xf] }
 0x61a   :  { %4566 = vmatprep.subr.mxu0 %v6815_v54  ;;  %4637 = vmatprep.subr.mxu1 %v6816_v51 }
 0x6b9   :  { %v3355_v57 = vpop.f32.mrf.mxu0  ;;  %v3426_v29 = vpop.f32.mrf.mxu1 }
 0x6bb   :  { %v3357_v43 = vpop.f32.mrf.mxu0  ;;  %v3428_v63 = vpop.f32.mrf.mxu1 }
 0x6bc   :  { %v3435_v3 = vcombine.low %v3355_v57, %v3357_v43  ;;  %v3436_v24 = vcombine.high %v3355_v57, %v3357_v43  ;;  %v3437_v44 = vcombine.low %v3426_v29, %v3428_v63  ;;  %v3438_v31 = vcombine.high %v3426_v29, %v3428_v63  ;;  %v5458_v57 = vld [vmem:[%s10182_s0 + $0x65] ss:$8 sm:$0xf] }
 0x6bd   :  { %v5460_v29 = vld [vmem:[%s10182_s0 + $0xa5] ss:$8 sm:$0xf] }
 0x6be   :  { %v3445_v14 = vrot.slane %v3435_v3, %v7322_v11  ;;  %v3452_v5 = vrot.slane %v3436_v24, %v7322_v11  ;;  %v3459_v58 = vrot.slane %v3437_v44, %v7322_v11  ;;  %v3466_v49 = vrot.slane %v3438_v31, %v7322_v11  ;;  %v5461_v43 = vld [vmem:[%s10182_s0 + $0xc5] ss:$8 sm:$0xf] }
 0x6bf   :  { %v5462_v31 = vld [vmem:[%s10182_s0 + $0xe5] ss:$8 sm:$0xf] }
 0x6c0   :  { %v3467_v41 = vcombine.low %v3445_v14, %v3459_v58  ;;  %v3468_v22 = vcombine.high %v3445_v14, %v3459_v58  ;;  %v3469_v47 = vcombine.low %v3452_v5, %v3466_v49  ;;  %v3470_v9 = vcombine.high %v3452_v5, %v3466_v49 }
 0x6c2   :  { %v3477_v33 = vrot.slane %v3467_v41, %v7322_v11  ;;  %v3484_v45 = vrot.slane %v3469_v47, %v7322_v11  ;;  %v3491_v54 = vrot.slane %v3468_v22, %v7322_v11  ;;  %v3498_v51 = vrot.slane %v3470_v9, %v7322_v11 }
 0x6c4   :  { %v3499_v63 = vcombine.high %v3477_v33, %v3477_v33  ;;  %v3500_v3 = vcombine.high %v3484_v45, %v3484_v45  ;;  %v3501_v24 = vcombine.high %v3491_v54, %v3491_v54  ;;  %v3502_v44 = vcombine.high %v3498_v51, %v3498_v51 }
 0x6c5   :  { %v9500_v14 = vadd.f32 %v5455_v25, %v3477_v33  ;;  %v9502_v5 = vadd.f32 %v5456_v26, %v3491_v54  ;;  %v9504_v58 = vadd.f32 %v5459_v4, %v3484_v45  ;;  %v9510_v22 = vadd.f32 %v5460_v29, %v3498_v51 }
 0x6c6   :  { %v9506_v49 = vadd.f32 %v5457_v53, %v3499_v63  ;;  %v9508_v41 = vadd.f32 %v5458_v57, %v3501_v24  ;;  %v9512_v47 = vadd.f32 %v5461_v43, %v3500_v3  ;;  %v9516_v12 = vadd.f32 %v5462_v31, %v3502_v44 }
 0x6c7   :  { %v5463_v9 = vmul.f32 -1.442695, %v9500_v14  ;;  %v5464_v16 = vmul.f32 -1.442695, %v9502_v5  ;;  %v5467_v53 = vmul.f32 -1.442695, %v9504_v58 }
 0x6c8   :  { %v5465_v25 = vmul.f32 -1.442695, %v9506_v49  ;;  %v5466_v26 = vmul.f32 -1.442695, %v9508_v41  ;;  %v3575_v4 = vrot.slane %v9500_v14, 1  ;;  %v3576_v45 = vrot.slane %v9502_v5, 1 }
 0x6c9   :  { %6273 = vpow2.f32 %v5463_v9  ;;  %v5468_v33 = vmul.f32 -1.442695, %v9510_v22  ;;  %v5469_v54 = vmul.f32 -1.442695, %v9512_v47  ;;  %v3577_v51 = vrot.slane %v9506_v49, 1 }
 0x6ca   :  { %6275 = vpow2.f32 %v5464_v16  ;;  %v5470_v57 = vmul.f32 -1.442695, %v9516_v12  ;;  %v3578_v29 = vrot.slane %v9508_v41, 1  ;;  %v3579_v43 = vrot.slane %v9504_v58, 1 }
 0x6cb   :  { %6277 = vpow2.f32 %v5465_v25  ;;  %v5471_v63 = vmul.f32 -1.442695, %v3575_v4  ;;  %v3580_v16 = vrot.slane %v9510_v22, 1  ;;  %v5472_v3 = vmul.f32 -1.442695, %v3576_v45 }
 0x6cc   :  { %6279 = vpow2.f32 %v5466_v26  ;;  %v3581_v24 = vrot.slane %v9512_v47, 1  ;;  %v5473_v44 = vmul.f32 -1.442695, %v3577_v51  ;;  %v3582_v31 = vrot.slane %v9516_v12, 1 }
 0x6cd   :  { %6281 = vpow2.f32 %v5467_v53  ;;  %v5474_v9 = vmul.f32 -1.442695, %v3578_v29  ;;  %v5475_v25 = vmul.f32 -1.442695, %v3579_v43  ;;  %v5476_v26 = vmul.f32 -1.442695, %v3580_v16 }
 0x6ce   :  { %6283 = vpow2.f32 %v5468_v33  ;;  %v5477_v53 = vmul.f32 -1.442695, %v3581_v24  ;;  %v5478_v4 = vmul.f32 -1.442695, %v3582_v31 }
 0x6cf   :  { %6285 = vpow2.f32 %v5469_v54 }
 0x6d0   :  { %6287 = vpow2.f32 %v5470_v57 }
 0x6d1   :  { %6289 = vpow2.f32 %v5471_v63 }
 0x6d2   :  { %6291 = vpow2.f32 %v5472_v3 }
 0x6d3   :  { %6293 = vpow2.f32 %v5473_v44 }
 0x6d4   :  { %6295 = vpow2.f32 %v5474_v9 }
 0x6d5   :  { %6297 = vpow2.f32 %v5475_v25 }
 0x6d6   :  { %v6274_v33 = vpop.eup %6273  ;;  %6299 = vpow2.f32 %v5476_v26 }
 0x6d7   :  { %v6276_v45 = vpop.eup %6275  ;;  %v3543_v54 = vadd.f32 1.0, %v6274_v33  ;;  %6301 = vpow2.f32 %v5477_v53 }
 0x6d8   :  { %v6278_v56 = vpop.eup %6277  ;;  %v3544_v51 = vadd.f32 1.0, %v6276_v45  ;;  %6303 = vpow2.f32 %v5478_v4 }
 0x6d9   :  { %v6280_v57 = vpop.eup %6279  ;;  %v3545_v8 = vadd.f32 1.0, %v6278_v56  ;;  %6305 = vrcp.f32 %v3543_v54 }
 0x6da   :  { %v6282_v29 = vpop.eup %6281  ;;  %v3546_v43 = vadd.f32 1.0, %v6280_v57  ;;  %6307 = vrcp.f32 %v3544_v51 }
 0x6db   :  { %v6284_v63 = vpop.eup %6283  ;;  %v3547_v16 = vadd.f32 1.0, %v6282_v29  ;;  %6309 = vrcp.f32 %v3545_v8 }
 0x6dc   :  { %v6286_v3 = vpop.eup %6285  ;;  %v3548_v24 = vadd.f32 1.0, %v6284_v63  ;;  %6311 = vrcp.f32 %v3546_v43 }
 0x6dd   :  { %v6288_v44 = vpop.eup %6287  ;;  %v3549_v31 = vadd.f32 1.0, %v6286_v3  ;;  %6313 = vrcp.f32 %v3547_v16  ;;  %v3639_v3 = vrot.slane %v9500_v14, 2 }
 0x6de   :  { %v6290_v9 = vpop.eup %6289  ;;  %v3550_v25 = vadd.f32 1.0, %v6288_v44  ;;  %6315 = vrcp.f32 %v3548_v24 }
 0x6df   :  { %v6292_v26 = vpop.eup %6291  ;;  %6317 = vrcp.f32 %v3549_v31  ;;  %v3615_v53 = vadd.f32 1.0, %v6290_v9  ;;  %v3640_v31 = vrot.slane %v9502_v5, 2 }
 0x6e0   :  { %v6294_v56 = vpop.eup %6293  ;;  %6319 = vrcp.f32 %v3550_v25  ;;  %v3616_v4 = vadd.f32 1.0, %v6292_v26  ;;  %v3641_v25 = vrot.slane %v9506_v49, 2 }
 0x6e1   :  { %v6296_v33 = vpop.eup %6295  ;;  %v3617_v45 = vadd.f32 1.0, %v6294_v56  ;;  %6321 = vrcp.f32 %v3615_v53  ;;  %v3642_v53 = vrot.slane %v9508_v41, 2 }
 0x6e2   :  { %v6298_v54 = vpop.eup %6297  ;;  %v3618_v8 = vadd.f32 1.0, %v6296_v33  ;;  %6323 = vrcp.f32 %v3616_v4  ;;  %v3643_v4 = vrot.slane %v9504_v58, 2  ;;  %v3663_v33 = vrot.slane %v9500_v14, 3 }
 0x6e3   :  { %v6300_v51 = vpop.eup %6299  ;;  %v3619_v57 = vadd.f32 1.0, %v6298_v54  ;;  %6325 = vrcp.f32 %v3617_v45  ;;  %v3644_v54 = vrot.slane %v9510_v22, 2  ;;  %v3666_v14 = vrot.slane %v9508_v41, 3 }
 0x6e4   :  { %v6302_v29 = vpop.eup %6301  ;;  %v3620_v43 = vadd.f32 1.0, %v6300_v51  ;;  %6327 = vrcp.f32 %v3618_v8  ;;  %v3664_v8 = vrot.slane %v9502_v5, 3  ;;  %v5479_v5 = vmul.f32 -1.442695, %v3663_v33 }
 0x6e5   :  { %v6304_v63 = vpop.eup %6303  ;;  %v3621_v16 = vadd.f32 1.0, %v6302_v29  ;;  %6329 = vrcp.f32 %v3619_v57  ;;  %v3645_v57 = vrot.slane %v9512_v47, 2  ;;  %v3665_v29 = vrot.slane %v9506_v49, 3 }
 0x6e6   :  { %v6306_v24 = vpop.eup %6305  ;;  %v3622_v44 = vadd.f32 1.0, %v6304_v63  ;;  %6331 = vrcp.f32 %v3620_v43  ;;  %v3646_v63 = vrot.slane %v9516_v12, 2  ;;  %v3669_v49 = vrot.slane %v9512_v47, 3 }
 0x6e7   :  { %v6308_v9 = vpop.eup %6307  ;;  %6333 = vrcp.f32 %v3621_v16  ;;  %v5481_v18 = vmul.f32 -1.442695, %v3665_v29  ;;  %v3670_v41 = vrot.slane %v9516_v12, 3 }
 0x6e8   :  { %v6310_v26 = vpop.eup %6309  ;;  %6335 = vrcp.f32 %v3622_v44 }
 0x6e9   :  { %v9536_v56 = vpop.eup %6311  ;;  %6337 = vtanh.f32 %v3639_v3  ;;  %v3667_v3 = vrot.slane %v9504_v58, 3 }
 0x6ea   :  { %v9540_v45 = vpop.eup %6313  ;;  %6339 = vtanh.f32 %v3640_v31  ;;  %v3668_v31 = vrot.slane %v9510_v22, 3  ;;  %v5485_v22 = vmul.f32 -1.442695, %v3669_v49 }
 0x6eb   :  { %v9544_v51 = vpop.eup %6315  ;;  %6341 = vtanh.f32 %v3641_v25  ;;  %v5480_v25 = vmul.f32 -1.442695, %v3664_v8 }
 0x6ec   :  { %v9548_v43 = vpop.eup %6317  ;;  %6343 = vtanh.f32 %v3642_v53  ;;  %v5482_v53 = vmul.f32 -1.442695, %v3666_v14  ;;  %v5484_v33 = vmul.f32 -1.442695, %v3668_v31 }
 0x6ed   :  { %v9552_v16 = vpop.eup %6319  ;;  %6345 = vtanh.f32 %v3643_v4  ;;  %v5483_v4 = vmul.f32 -1.442695, %v3667_v3 }
 0x6ee   :  { %v6322_v44 = vpop.eup %6321  ;;  %6347 = vtanh.f32 %v3644_v54 }
 0x6ef   :  { %v6324_v61 = vpop.eup %6323  ;;  %6349 = vtanh.f32 %v3645_v57  ;;  %v5486_v57 = vmul.f32 -1.442695, %v3670_v41  ;;  %v3727_v47 = vmul.f32 %v6322_v44, %v9141_v2 }
 0x6f0   :  { %v6326_v50 = vpop.eup %6325  ;;  %6351 = vtanh.f32 %v3646_v63  ;;  %v3728_v12 = vmul.f32 %v6324_v61, %v9145_v52 }
 0x6f1   :  { %v6328_v46 = vpop.eup %6327  ;;  %6353 = vpow2.f32 %v5479_v5  ;;  %v3729_v3 = vmul.f32 %v6326_v50, %v9148_v10 }
 0x6f2   :  { %v6330_v58 = vpop.eup %6329  ;;  %6355 = vpow2.f32 %v5480_v25  ;;  %v3730_v31 = vmul.f32 %v6328_v46, %v9152_v19 }
 0x6f3   :  { %v6332_v54 = vpop.eup %6331  ;;  %6357 = vpow2.f32 %v5481_v18  ;;  %v3731_v41 = vmul.f32 %v6330_v58, %v9155_v17 }
 0x6f4   :  { %v6334_v8 = vpop.eup %6333  ;;  %6359 = vpow2.f32 %v5482_v53  ;;  %v3732_v52 = vmul.f32 %v6332_v54, %v9158_v42 }
 0x6f5   :  { %v6336_v55 = vpop.eup %6335  ;;  %6361 = vpow2.f32 %v5483_v4 }
 0x6f6   :  { %v6338_v29 = vpop.eup %6337  ;;  %6363 = vpow2.f32 %v5484_v33 }
 0x6f7   :  { %v6340_v63 = vpop.eup %6339  ;;  %6365 = vpow2.f32 %v5485_v22  ;;  %v3735_v14 = vmul.f32 %v6338_v29, %v6306_v24  ;;  %v3733_v22 = vmul.f32 %v6334_v8, %v9167_v48  ;;  %v3734_v29 = vmul.f32 %v6336_v55, %v9169_v0 }
 0x6f8   :  { %v6342_v5 = vpop.eup %6341  ;;  %6367 = vpow2.f32 %v5486_v57  ;;  %v3736_v18 = vmul.f32 %v6340_v63, %v6308_v9 }
 0x6f9   :  { %v6344_v25 = vpop.eup %6343  ;;  %v3737_v49 = vmul.f32 %v6342_v5, %v6310_v26  ;;  %v9563_v53 = vadd.f32 %v3735_v14, %v3727_v47 }
 0x6fa   :  { %v6346_v2 = vpop.eup %6345  ;;  %v3738_v44 = vmul.f32 %v6344_v25, %v9536_v56  ;;  %v9567_v61 = vadd.f32 %v3736_v18, %v3728_v12 }
 0x6fb   :  { %v6348_v24 = vpop.eup %6347  ;;  %v3739_v10 = vmul.f32 %v6346_v2, %v9540_v45  ;;  %v9570_v50 = vadd.f32 %v3737_v49, %v3729_v3  ;;  %6369 = vtanh.f32 %v9563_v53 }
 0x6fc   :  { %v6350_v19 = vpop.eup %6349  ;;  %v3740_v46 = vmul.f32 %v6348_v24, %v9544_v51  ;;  %v9574_v17 = vadd.f32 %v3738_v44, %v3730_v31  ;;  %6371 = vtanh.f32 %v9567_v61 }
 0x6fd   :  { %v6352_v9 = vpop.eup %6351  ;;  %v9577_v26 = vadd.f32 %v3739_v10, %v3731_v41  ;;  %6373 = vtanh.f32 %v9570_v50  ;;  %v3741_v14 = vmul.f32 %v6350_v19, %v9548_v43 }
 0x6fe   :  { %v6354_v42 = vpop.eup %6353  ;;  %v9580_v56 = vadd.f32 %v3740_v46, %v3732_v52  ;;  %6375 = vtanh.f32 %v9574_v17  ;;  %v3742_v18 = vmul.f32 %v6352_v9, %v9552_v16 }
 0x6ff   :  { %v6356_v45 = vpop.eup %6355  ;;  %v3703_v4 = vadd.f32 1.0, %v6354_v42  ;;  %6377 = vtanh.f32 %v9577_v26  ;;  %v9589_v49 = vadd.f32 %v3741_v14, %v3733_v22  ;;  %v6831_v14 = vld [vmem:[%s10181_s1 + $0x80] sm:$0xff] }
 0x700   :  { %v6358_v58 = vpop.eup %6357  ;;  %v3704_v51 = vadd.f32 1.0, %v6356_v45  ;;  %6379 = vtanh.f32 %v9580_v56  ;;  %v9591_v8 = vadd.f32 %v3742_v18, %v3734_v29 }
 0x701   :  { %v6360_v33 = vpop.eup %6359  ;;  %v3705_v54 = vadd.f32 1.0, %v6358_v58  ;;  %6381 = vrcp.f32 %v3703_v4 }
 0x702   :  { %v6362_v57 = vpop.eup %6361  ;;  %v3706_v47 = vadd.f32 1.0, %v6360_v33  ;;  %6383 = vrcp.f32 %v3704_v51 }
 0x703   :  { %v6364_v12 = vpop.eup %6363  ;;  %v3707_v63 = vadd.f32 1.0, %v6362_v57  ;;  %6385 = vrcp.f32 %v3705_v54 }
 0x704   :  { %v6366_v3 = vpop.eup %6365  ;;  %v3708_v5 = vadd.f32 1.0, %v6364_v12  ;;  %6387 = vrcp.f32 %v3706_v47 }
 0x705   :  { %v6368_v31 = vpop.eup %6367  ;;  %v3709_v25 = vadd.f32 1.0, %v6366_v3  ;;  %6389 = vrcp.f32 %v3707_v63 }
 0x706   :  { %v3710_v48 = vadd.f32 1.0, %v6368_v31  ;;  %6391 = vrcp.f32 %v3708_v5 }
 0x707   :  { %6393 = vrcp.f32 %v3709_v25 }
 0x708   :  { %v6370_v0 = vpop.eup %6369  ;;  %6395 = vrcp.f32 %v3710_v48 }
 0x709   :  { %v6372_v55 = vpop.eup %6371  ;;  %6397 = vtanh.f32 %v9589_v49 }
 0x70a   :  { %v6374_v43 = vpop.eup %6373  ;;  %6399 = vtanh.f32 %v9591_v8 }
 0x70b   :  { %v6376_v41 = vpop.eup %6375 }
 0x70c   :  { %v6378_v16 = vpop.eup %6377 }
 0x70d   :  { %v6380_v2 = vpop.eup %6379 }
 0x70e   :  { %v6382_v44 = vpop.eup %6381 }
 0x70f   :  { %v6384_v52 = vpop.eup %6383  ;;  %v3759_v24 = vmul.f32 %v6382_v44, %v6370_v0 }
 0x710   :  { %v6386_v10 = vpop.eup %6385  ;;  %v3760_v19 = vmul.f32 %v6384_v52, %v6372_v55 }
 0x711   :  { %v6388_v46 = vpop.eup %6387  ;;  %v3761_v9 = vmul.f32 %v6386_v10, %v6374_v43  ;;  %v5607_v42 = vpack.c.bf16 %v3759_v24, %v3759_v24 }
 0x712   :  { %v6390_v45 = vpop.eup %6389  ;;  %v3762_v4 = vmul.f32 %v6388_v46, %v6376_v41  ;;  %v5608_v58 = vpack.c.bf16 %v3760_v19, %v3760_v19  ;;  %v3889_v51 = vcombine.low %v3759_v24, %v3760_v19  ;;  %v3844_v46 = vld [vmem:[%s10183_s2 + $0x4] sm:$0x4] }
 0x713   :  { %v6392_v33 = vpop.eup %6391  ;;  %v3763_v54 = vmul.f32 %v6390_v45, %v6378_v16  ;;  %v5609_v22 = vpack.c.bf16 %v3761_v9, %v3761_v9  ;;  %v3800_v57 = vshll.u32 %v5607_v42, 16  ;;  %v3841_v16 = vld [vmem:[%s10183_s2] sm:$0x4] }
 0x714   :  { %v6394_v47 = vpop.eup %6393  ;;  %v3764_v29 = vmul.f32 %v6392_v33, %v6380_v2  ;;  %v5610_v12 = vpack.c.bf16 %v3762_v4, %v3762_v4  ;;  %v3804_v63 = vshll.u32 %v5608_v58, 16  ;;  %v3890_v3 = vcombine.low %v3761_v9, %v3762_v4  ;;  %v3847_v58 = vld [vmem:[%s10183_s2 + $0x8] sm:$0x4] }
 0x715   :  { %v6396_v5 = vpop.eup %6395  ;;  %v5611_v18 = vpack.c.bf16 %v3763_v54, %v3763_v54  ;;  %v3802_v31 = vrot.slane %v3800_v57, 6  ;;  %v3808_v25 = vshll.u32 %v5609_v22, 16  ;;  %v3899_v48 = vrot.slane %v3889_v51, %v7322_v11  ;;  %v3850_v22 = vld [vmem:[%s10183_s2 + $0xc] sm:$0x4] }
 0x716   :  { %v6398_v0 = vpop.eup %6397  ;;  %v5612_v55 = vpack.c.bf16 %v3764_v29, %v3764_v29  ;;  %v3806_v43 = vrot.slane %v3804_v63, 6  ;;  %v3812_v41 = vshll.u32 %v5610_v12, 16  ;;  %v3891_v2 = vcombine.low %v3763_v54, %v3764_v29  ;;  %v3853_v63 = vld [vmem:[%s10183_s2 + $0x10] sm:$0x4] }
 0x717   :  { %v6400_v44 = vpop.eup %6399  ;;  %v3765_v52 = vmul.f32 %v6398_v0, %v6394_v47  ;;  %v3810_v24 = vrot.slane %v3808_v25, 6  ;;  %v3816_v10 = vshll.u32 %v5611_v18, 16  ;;  %v3842_v19 = vsel %vm9596_vm14, %v3802_v31, %v3841_v16  ;;  %v3856_v31 = vld [vmem:[%s10183_s2 + $0x14] sm:$0x4] }
 0x718   :  { %v3766_v9 = vmul.f32 %v6400_v44, %v6396_v5  ;;  %v3814_v42 = vrot.slane %v3812_v41, 6  ;;  %v3820_v45 = vshll.u32 %v5612_v55, 16  ;;  %3843 = vst [vmem:[%s10183_s2] sm:$0x4] %v3842_v19  ;;  %v3845_v4 = vsel %vm9596_vm14, %v3806_v43, %v3844_v46 }
 0x719   :  { %v5613_v51 = vpack.c.bf16 %v3765_v52, %v3765_v52  ;;  %v3818_v33 = vrot.slane %v3816_v10, 6  ;;  %3846 = vst [vmem:[%s10183_s2 + $0x4] sm:$0x4] %v3845_v4  ;;  %v3848_v54 = vsel %vm9596_vm14, %v3810_v24, %v3847_v58  ;;  %v3906_v57 = vrot.slane %v3890_v3, %v7322_v11  ;;  %v6834_v4 = vld [vmem:[%s10181_s1 + $0x78] sm:$0xff]  ;;  %v6835_v58 = vld [vmem:[%s10181_s1 + $0x60] sm:$0xff] }
 0x71a   :  { %v5614_v47 = vpack.c.bf16 %v3766_v9, %v3766_v9  ;;  %v3822_v29 = vrot.slane %v3820_v45, 6  ;;  %3849 = vst [vmem:[%s10183_s2 + $0x8] sm:$0x4] %v3848_v54  ;;  %v3851_v12 = vsel %vm9596_vm14, %v3814_v42, %v3850_v22  ;;  %v3892_v5 = vcombine.low %v3765_v52, %v3766_v9  ;;  %v6832_v42 = vld [vmem:[%s10181_s1 + $0x90] sm:$0xff]  ;;  %v6833_v45 = vld [vmem:[%s10181_s1 + $0x68] sm:$0xff]  ;;  %v6838_v54 = vld [vmem:[%s10181_s1 + $0x58] sm:$0xff] }
 0x71b   :  { %v3824_v18 = vshll.u32 %v5613_v51, 16  ;;  %3852 = vst [vmem:[%s10183_s2 + $0xc] sm:$0x4] %v3851_v12  ;;  %v3854_v3 = vsel %vm9596_vm14, %v3818_v33, %v3853_v63  ;;  %v3921_v25 = vcombine.low %v3899_v48, %v3906_v57  ;;  %v3913_v43 = vrot.slane %v3891_v2, %v7322_v11  ;;  %v3859_v48 = vld [vmem:[%s10183_s2 + $0x18] sm:$0x4]  ;;  %v6836_v51 = vld [vmem:[%s10181_s1 + $0x70] sm:$0xff] }
 0x71c   :  { %v3828_v0 = vshll.u32 %v5614_v47, 16  ;;  %3855 = vst [vmem:[%s10183_s2 + $0x10] sm:$0x4] %v3854_v3  ;;  %v3857_v55 = vsel %vm9596_vm14, %v3822_v29, %v3856_v31  ;;  %v3920_v41 = vrot.slane %v3892_v5, %v7322_v11  ;;  %v3862_v2 = vld [vmem:[%s10183_s2 + $0x1c] sm:$0x4]  ;;  %v6837_v33 = vld [vmem:[%s10181_s1 + $0x48] sm:$0xff] }
 0x71d   :  { %v3826_v16 = vrot.slane %v3824_v18, 6  ;;  %3858 = vst [vmem:[%s10183_s2 + $0x14] sm:$0x4] %v3857_v55  ;;  %v3929_v24 = vrot.slane %v3921_v25, %v7322_v11  ;;  %v6839_v22 = vld [vmem:[%s10181_s1 + $0x40] sm:$0xff]  ;;  %v6840_v57 = vld [vmem:[%s10181_s1 + $0x50] sm:$0xff]  ;;  %v6841_v47 = vld [vmem:[%s10181_s1 + $0x28] sm:$0xff] }
 0x71e   :  { %v3830_v44 = vrot.slane %v3828_v0, 6  ;;  %v3922_v52 = vcombine.low %v3913_v43, %v3920_v41  ;;  %v6842_v29 = vld [vmem:[%s10181_s1 + $0x38] sm:$0xff]  ;;  %v6843_v12 = vld [vmem:[%s10181_s1 + $0x20] sm:$0xff]  ;;  %v6844_v63 = vld [vmem:[%s10181_s1 + $0x30] sm:$0xff]  ;;  %v10377_v31 = vmov 0.0  }
 0x71f   :  { %v3860_v10 = vsel %vm9596_vm14, %v3826_v16, %v3859_v48  ;;  %v6845_v5 = vld [vmem:[%s10181_s1 + $0x8] sm:$0xff]  ;;  %v6846_v18 = vld [vmem:[%s10181_s1 + $0x18] sm:$0xff]  ;;  %v6847_v3 = vld [vmem:[%s10181_s1] sm:$0xff] }
 0x720   :  { %3861 = vst [vmem:[%s10183_s2 + $0x18] sm:$0x4] %v3860_v10  ;;  %v3863_v19 = vsel %vm9596_vm14, %v3830_v44, %v3862_v2  ;;  %v3936_v46 = vrot.slane %v3922_v52, %v7322_v11  ;;  %v6848_v25 = vld [vmem:[%s10181_s1 + $0x10] sm:$0xff] }
 0x721   :  { %3864 = vst [vmem:[%s10183_s2 + $0x1c] sm:$0x4] %v3863_v19 }
 0x722   :  { %v3937_v9 = vcombine.low %v3929_v24, %v3936_v46 }
 0x724   :  { %4004 = vmatmul.mubr.f32.vlgmr.msra.gmra.mxu0 %v3937_v9  ;;  %4075 = vmatmul.mubr.f32.vlgmr.msra.gmra.mxu1 %v3937_v9 }
 0x725   :  { %4567 = vmatpush1.msra.mxu0 %v9251_v28  ;;  %4638 = vmatpush1.msra.mxu1 %v9257_v23  ;;  %v10369_v28 = vld [vmem:[#allocation18_spill] sm:$0xff]  ;;  %v10370_v23 = vld [vmem:[#allocation4_spill] sm:$0xff] }
 0x726   :  { %4568 = vmatprep.subr.mxu0 %v9263_v40  ;;  %4639 = vmatprep.subr.mxu1 %v9269_v20  ;;  %v10371_v40 = vld [vmem:[#allocation5_spill] sm:$0xff]  ;;  %v10372_v20 = vld [vmem:[#allocation19_spill] sm:$0xff] }
 0x727   :  { %4569 = vmatpush1.msra.mxu0 %v9275_v30  ;;  %4640 = vmatpush1.msra.mxu1 %v9281_v37  ;;  %v10373_v30 = vld [vmem:[#allocation20_spill] sm:$0xff]  ;;  %v10374_v37 = vld [vmem:[#allocation21_spill] sm:$0xff] }
 0x728   :  { %4570 = vmatprep.subr.mxu0 %v9287_v21  ;;  %4641 = vmatprep.subr.mxu1 %v9293_v32  ;;  %v10375_v21 = vld [vmem:[#allocation6_spill] sm:$0xff]  ;;  %v10376_v32 = vld [vmem:[#allocation7_spill] sm:$0xff] }
 0x729   :  { %4571 = vmatpush1.msra.mxu0 %v9299_v35  ;;  %4642 = vmatpush1.msra.mxu1 %v9305_v59  ;;  %v6817_v35 = vld [vmem:[%s10181_s1 + $0xe8] sm:$0xff]  ;;  %v6818_v59 = vld [vmem:[%s10181_s1 + $0xf8] sm:$0xff] }
 0x72a   :  { %4572 = vmatprep.subr.mxu0 %v9311_v34  ;;  %4643 = vmatprep.subr.mxu1 %v9317_v1  ;;  %v6819_v34 = vld [vmem:[%s10181_s1 + $0xe0] sm:$0xff]  ;;  %v6820_v1 = vld [vmem:[%s10181_s1 + $0xf0] sm:$0xff] }
 0x72b   :  { %4573 = vmatpush1.msra.mxu0 %v9323_v36  ;;  %4644 = vmatpush1.msra.mxu1 %v9329_v38  ;;  %v6821_v36 = vld [vmem:[%s10181_s1 + $0xc8] sm:$0xff]  ;;  %v6822_v38 = vld [vmem:[%s10181_s1 + $0xd8] sm:$0xff] }
 0x72c   :  { %4574 = vmatprep.subr.mxu0 %v9335_v7  ;;  %4645 = vmatprep.subr.mxu1 %v9341_v60  ;;  %v6823_v7 = vld [vmem:[%s10181_s1 + $0xc0] sm:$0xff]  ;;  %v6824_v60 = vld [vmem:[%s10181_s1 + $0xd0] sm:$0xff] }
 0x72d   :  { %4575 = vmatpush1.msra.mxu0 %v9347_v27  ;;  %4646 = vmatpush1.msra.mxu1 %v9353_v6  ;;  %v6825_v27 = vld [vmem:[%s10181_s1 + $0xa8] sm:$0xff]  ;;  %v6826_v6 = vld [vmem:[%s10181_s1 + $0xb8] sm:$0xff] }
 0x72e   :  { %4576 = vmatprep.subr.mxu0 %v9359_v15  ;;  %4647 = vmatprep.subr.mxu1 %v9365_v13  ;;  %v6827_v15 = vld [vmem:[%s10181_s1 + $0xa0] sm:$0xff]  ;;  %v6828_v13 = vld [vmem:[%s10181_s1 + $0xb0] sm:$0xff] }
 0x72f   :  { %4577 = vmatpush1.msra.mxu0 %v9371_v62  ;;  %4648 = vmatpush1.msra.mxu1 %v9377_v39  ;;  %v6829_v62 = vld [vmem:[%s10181_s1 + $0x88] sm:$0xff]  ;;  %v6830_v39 = vld [vmem:[%s10181_s1 + $0x98] sm:$0xff] }
 0x730   :  { %4578 = vmatprep.subr.mxu0 %v10369_v28  ;;  %4649 = vmatprep.subr.mxu1 %v10370_v23 }
 0x731   :  { %4579 = vmatpush1.msra.mxu0 %v10371_v40  ;;  %4650 = vmatpush1.msra.mxu1 %v10372_v20  ;;  %v5495_v40 = vld [vmem:[%s10182_s0 + $0x6] ss:$8 sm:$0xf] }
 0x732   :  { %4580 = vmatprep.subr.mxu0 %v10373_v30  ;;  %4651 = vmatprep.subr.mxu1 %v10374_v37  ;;  %v5496_v20 = vld [vmem:[%s10182_s0 + $0x26] ss:$8 sm:$0xf] }
 0x733   :  { %4581 = vmatpush1.msra.mxu0 %v10375_v21  ;;  %4652 = vmatpush1.msra.mxu1 %v10376_v32  ;;  %v5497_v30 = vld [vmem:[%s10182_s0 + $0x46] ss:$8 sm:$0xf] }
 0x734   :  { %4582 = vmatprep.subr.mxu0 %v6817_v35  ;;  %4653 = vmatprep.subr.mxu1 %v6818_v59  ;;  %v5499_v37 = vld [vmem:[%s10182_s0 + $0x86] ss:$8 sm:$0xf] }
 0x735   :  { %4583 = vmatpush1.msra.mxu0 %v6819_v34  ;;  %4654 = vmatpush1.msra.mxu1 %v6820_v1  ;;  %v5498_v34 = vld [vmem:[%s10182_s0 + $0x66] ss:$8 sm:$0xf] }
 0x736   :  { %4584 = vmatprep.subr.mxu0 %v6821_v36  ;;  %4655 = vmatprep.subr.mxu1 %v6822_v38  ;;  %v5500_v1 = vld [vmem:[%s10182_s0 + $0xa6] ss:$8 sm:$0xf] }
 0x737   :  { %4585 = vmatpush1.msra.mxu0 %v6823_v7  ;;  %4656 = vmatpush1.msra.mxu1 %v6824_v60  ;;  %v5501_v36 = vld [vmem:[%s10182_s0 + $0xc6] ss:$8 sm:$0xf] }
 0x738   :  { %4586 = vmatprep.subr.mxu0 %v6825_v27  ;;  %4657 = vmatprep.subr.mxu1 %v6826_v6  ;;  %v5502_v6 = vld [vmem:[%s10182_s0 + $0xe6] ss:$8 sm:$0xf] }
 0x739   :  { %4587 = vmatpush1.msra.mxu0 %v6827_v15  ;;  %4658 = vmatpush1.msra.mxu1 %v6828_v13 }
 0x73a   :  { %4588 = vmatprep.subr.mxu0 %v6829_v62  ;;  %4659 = vmatprep.subr.mxu1 %v6830_v39 }
 0x73b   :  { %4589 = vmatpush1.msra.mxu0 %v6831_v14  ;;  %4660 = vmatpush1.msra.mxu1 %v6832_v42 }
 0x73c   :  { %4590 = vmatprep.subr.mxu0 %v6833_v45  ;;  %4661 = vmatprep.subr.mxu1 %v6834_v4 }
 0x73d   :  { %4591 = vmatpush1.msra.mxu0 %v6835_v58  ;;  %4662 = vmatpush1.msra.mxu1 %v6836_v51 }
 0x73e   :  { %4592 = vmatprep.subr.mxu0 %v6837_v33  ;;  %4663 = vmatprep.subr.mxu1 %v6838_v54 }
 0x73f   :  { %4593 = vmatpush1.msra.mxu0 %v6839_v22  ;;  %4664 = vmatpush1.msra.mxu1 %v6840_v57 }
 0x740   :  { %4594 = vmatprep.subr.mxu0 %v6841_v47  ;;  %4665 = vmatprep.subr.mxu1 %v6842_v29 }
 0x741   :  { %4595 = vmatpush1.msra.mxu0 %v6843_v12  ;;  %4666 = vmatpush1.msra.mxu1 %v6844_v63 }
 0x742   :  { %4596 = vmatprep.subr.mxu0 %v6845_v5  ;;  %4667 = vmatprep.subr.mxu1 %v6846_v18 }
 0x743   :  { %4597 = vmatpush1.msra.mxu0 %v6847_v3  ;;  %4630 = vmatprep.mubr.f32.mxu0 %v10377_v31 }
 0x744   :  { %4668 = vmatpush1.msra.mxu1 %v6848_v25  ;;  %4701 = vmatprep.mubr.f32.mxu1 %v10377_v31 }
 0x7e4   :  { %v4005_v0 = vpop.f32.mrf.mxu0  ;;  %v4076_v55 = vpop.f32.mrf.mxu1 }
 0x7e6   :  { %v4007_v43 = vpop.f32.mrf.mxu0  ;;  %v4078_v41 = vpop.f32.mrf.mxu1 }
 0x7e7   :  { %v4085_v16 = vcombine.low %v4005_v0, %v4007_v43  ;;  %v4086_v44 = vcombine.high %v4005_v0, %v4007_v43  ;;  %v4087_v48 = vcombine.low %v4076_v55, %v4078_v41  ;;  %v4088_v52 = vcombine.high %v4076_v55, %v4078_v41 }
 0x7e9   :  { %v4095_v24 = vrot.slane %v4085_v16, %v7322_v11  ;;  %v4102_v10 = vrot.slane %v4086_v44, %v7322_v11  ;;  %v4109_v2 = vrot.slane %v4087_v48, %v7322_v11  ;;  %v4116_v19 = vrot.slane %v4088_v52, %v7322_v11 }
 0x7eb   :  { %v4117_v46 = vcombine.low %v4095_v24, %v4109_v2  ;;  %v4118_v9 = vcombine.high %v4095_v24, %v4109_v2  ;;  %v4119_v28 = vcombine.low %v4102_v10, %v4116_v19  ;;  %v4120_v23 = vcombine.high %v4102_v10, %v4116_v19 }
 0x7ed   :  { %v4127_v21 = vrot.slane %v4117_v46, %v7322_v11  ;;  %v4134_v32 = vrot.slane %v4119_v28, %v7322_v11  ;;  %v4141_v35 = vrot.slane %v4118_v9, %v7322_v11  ;;  %v4148_v59 = vrot.slane %v4120_v23, %v7322_v11 }
 0x7ef   :  { %v4149_v38 = vcombine.high %v4127_v21, %v4127_v21  ;;  %v4150_v7 = vcombine.high %v4134_v32, %v4134_v32  ;;  %v4151_v60 = vcombine.high %v4141_v35, %v4141_v35  ;;  %v4152_v27 = vcombine.high %v4148_v59, %v4148_v59 }
 0x7f0   :  { %v9830_v15 = vadd.f32 %v5495_v40, %v4127_v21  ;;  %v9832_v13 = vadd.f32 %v5496_v20, %v4141_v35  ;;  %v9834_v62 = vadd.f32 %v5499_v37, %v4134_v32  ;;  %v9840_v42 = vadd.f32 %v5500_v1, %v4148_v59 }
 0x7f1   :  { %v9836_v39 = vadd.f32 %v5497_v30, %v4149_v38  ;;  %v9838_v14 = vadd.f32 %v5498_v34, %v4151_v60  ;;  %v9842_v45 = vadd.f32 %v5501_v36, %v4150_v7  ;;  %v9846_v51 = vadd.f32 %v5502_v6, %v4152_v27 }
 0x7f2   :  { %v5503_v4 = vmul.f32 -1.442695, %v9830_v15  ;;  %v5504_v58 = vmul.f32 -1.442695, %v9832_v13  ;;  %v5507_v22 = vmul.f32 -1.442695, %v9834_v62 }
 0x7f3   :  { %v5505_v33 = vmul.f32 -1.442695, %v9836_v39  ;;  %v5506_v54 = vmul.f32 -1.442695, %v9838_v14  ;;  %v4225_v57 = vrot.slane %v9830_v15, 1  ;;  %v4226_v29 = vrot.slane %v9832_v13, 1 }
 0x7f4   :  { %6401 = vpow2.f32 %v5503_v4  ;;  %v5508_v47 = vmul.f32 -1.442695, %v9840_v42  ;;  %v5509_v12 = vmul.f32 -1.442695, %v9842_v45  ;;  %v4227_v63 = vrot.slane %v9836_v39, 1 }
 0x7f5   :  { %6403 = vpow2.f32 %v5504_v58  ;;  %v5510_v5 = vmul.f32 -1.442695, %v9846_v51  ;;  %v4228_v18 = vrot.slane %v9838_v14, 1  ;;  %v4229_v3 = vrot.slane %v9834_v62, 1 }
 0x7f6   :  { %6405 = vpow2.f32 %v5505_v33  ;;  %v5511_v31 = vmul.f32 -1.442695, %v4225_v57  ;;  %v4230_v25 = vrot.slane %v9840_v42, 1  ;;  %v5512_v0 = vmul.f32 -1.442695, %v4226_v29 }
 0x7f7   :  { %6407 = vpow2.f32 %v5506_v54  ;;  %v4231_v55 = vrot.slane %v9842_v45, 1  ;;  %v5513_v43 = vmul.f32 -1.442695, %v4227_v63  ;;  %v4232_v41 = vrot.slane %v9846_v51, 1 }
 0x7f8   :  { %6409 = vpow2.f32 %v5507_v22  ;;  %v5514_v16 = vmul.f32 -1.442695, %v4228_v18  ;;  %v5515_v44 = vmul.f32 -1.442695, %v4229_v3  ;;  %v5516_v48 = vmul.f32 -1.442695, %v4230_v25 }
 0x7f9   :  { %6411 = vpow2.f32 %v5508_v47  ;;  %v5517_v52 = vmul.f32 -1.442695, %v4231_v55  ;;  %v5518_v24 = vmul.f32 -1.442695, %v4232_v41  ;;  %v4290_v18 = vrot.slane %v9832_v13, 2 }
 0x7fa   :  { %6413 = vpow2.f32 %v5509_v12  ;;  %v4289_v12 = vrot.slane %v9830_v15, 2  ;;  %v4313_v41 = vrot.slane %v9830_v15, 3  ;;  %v4316_v15 = vrot.slane %v9838_v14, 3 }
 0x7fb   :  { %6415 = vpow2.f32 %v5510_v5 }
 0x7fc   :  { %6417 = vpow2.f32 %v5511_v31  ;;  %v4291_v31 = vrot.slane %v9836_v39, 2 }
 0x7fd   :  { %6419 = vpow2.f32 %v5512_v0  ;;  %v4292_v0 = vrot.slane %v9838_v14, 2  ;;  %v4320_v14 = vrot.slane %v9846_v51, 3 }
 0x7fe   :  { %6421 = vpow2.f32 %v5513_v43  ;;  %v4293_v43 = vrot.slane %v9834_v62, 2 }
 0x7ff   :  { %6423 = vpow2.f32 %v5514_v16 }
 0x800   :  { %6425 = vpow2.f32 %v5515_v44  ;;  %v4294_v44 = vrot.slane %v9840_v42, 2 }
 0x801   :  { %v6402_v10 = vpop.eup %6401  ;;  %6427 = vpow2.f32 %v5516_v48  ;;  %v4314_v48 = vrot.slane %v9832_v13, 3  ;;  %v5519_v13 = vmul.f32 -1.442695, %v4313_v41 }
 0x802   :  { %v6404_v2 = vpop.eup %6403  ;;  %v4193_v19 = vadd.f32 1.0, %v6402_v10  ;;  %6429 = vpow2.f32 %v5517_v52  ;;  %v4315_v10 = vrot.slane %v9836_v39, 3  ;;  %v4319_v39 = vrot.slane %v9842_v45, 3 }
 0x803   :  { %v6406_v46 = vpop.eup %6405  ;;  %v4194_v9 = vadd.f32 1.0, %v6404_v2  ;;  %6431 = vpow2.f32 %v5518_v24  ;;  %v4295_v24 = vrot.slane %v9842_v45, 2 }
 0x804   :  { %v6408_v28 = vpop.eup %6407  ;;  %v4195_v23 = vadd.f32 1.0, %v6406_v46  ;;  %6433 = vrcp.f32 %v4193_v19  ;;  %v4296_v19 = vrot.slane %v9846_v51, 2 }
 0x805   :  { %v6410_v40 = vpop.eup %6409  ;;  %v4196_v20 = vadd.f32 1.0, %v6408_v28  ;;  %6435 = vrcp.f32 %v4194_v9  ;;  %v4317_v9 = vrot.slane %v9834_v62, 3 }
 0x806   :  { %v6412_v30 = vpop.eup %6411  ;;  %v4197_v37 = vadd.f32 1.0, %v6410_v40  ;;  %6437 = vrcp.f32 %v4195_v23  ;;  %v4318_v23 = vrot.slane %v9840_v42, 3  ;;  %v5520_v40 = vmul.f32 -1.442695, %v4314_v48 }
 0x807   :  { %v6414_v21 = vpop.eup %6413  ;;  %v4198_v32 = vadd.f32 1.0, %v6412_v30  ;;  %6439 = vrcp.f32 %v4196_v20  ;;  %v5521_v30 = vmul.f32 -1.442695, %v4315_v10  ;;  %v5525_v42 = vmul.f32 -1.442695, %v4319_v39 }
 0x808   :  { %v6416_v35 = vpop.eup %6415  ;;  %v4199_v59 = vadd.f32 1.0, %v6414_v21  ;;  %6441 = vrcp.f32 %v4197_v37  ;;  %v5522_v21 = vmul.f32 -1.442695, %v4316_v15 }
 0x809   :  { %v6418_v34 = vpop.eup %6417  ;;  %v4200_v1 = vadd.f32 1.0, %v6416_v35  ;;  %6443 = vrcp.f32 %v4198_v32  ;;  %v5523_v35 = vmul.f32 -1.442695, %v4317_v9 }
 0x80a   :  { %v6420_v36 = vpop.eup %6419  ;;  %6445 = vrcp.f32 %v4199_v59  ;;  %v4265_v38 = vadd.f32 1.0, %v6418_v34  ;;  %v5524_v59 = vmul.f32 -1.442695, %v4318_v23 }
 0x80b   :  { %v6422_v7 = vpop.eup %6421  ;;  %6447 = vrcp.f32 %v4200_v1  ;;  %v4266_v60 = vadd.f32 1.0, %v6420_v36  ;;  %v5526_v36 = vmul.f32 -1.442695, %v4320_v14 }
 0x80c   :  { %v6424_v27 = vpop.eup %6423  ;;  %v4267_v6 = vadd.f32 1.0, %v6422_v7  ;;  %6449 = vrcp.f32 %v4265_v38 }
 0x80d   :  { %v6426_v4 = vpop.eup %6425  ;;  %v4268_v58 = vadd.f32 1.0, %v6424_v27  ;;  %6451 = vrcp.f32 %v4266_v60 }
 0x80e   :  { %v6428_v33 = vpop.eup %6427  ;;  %v4269_v54 = vadd.f32 1.0, %v6426_v4  ;;  %6453 = vrcp.f32 %v4267_v6 }
 0x80f   :  { %v6430_v22 = vpop.eup %6429  ;;  %v4270_v57 = vadd.f32 1.0, %v6428_v33  ;;  %6455 = vrcp.f32 %v4268_v58 }
 0x810   :  { %v6432_v47 = vpop.eup %6431  ;;  %v4271_v29 = vadd.f32 1.0, %v6430_v22  ;;  %6457 = vrcp.f32 %v4269_v54 }
 0x811   :  { %v6434_v63 = vpop.eup %6433  ;;  %v4272_v5 = vadd.f32 1.0, %v6432_v47  ;;  %6459 = vrcp.f32 %v4270_v57 }
 0x812   :  { %v6436_v3 = vpop.eup %6435  ;;  %6461 = vrcp.f32 %v4271_v29 }
 0x813   :  { %v6438_v25 = vpop.eup %6437  ;;  %6463 = vrcp.f32 %v4272_v5 }
 0x814   :  { %v9866_v55 = vpop.eup %6439  ;;  %6465 = vtanh.f32 %v4289_v12 }
 0x815   :  { %v9870_v16 = vpop.eup %6441  ;;  %6467 = vtanh.f32 %v4290_v18 }
 0x816   :  { %v9874_v52 = vpop.eup %6443  ;;  %6469 = vtanh.f32 %v4291_v31 }
 0x817   :  { %v9878_v2 = vpop.eup %6445  ;;  %6471 = vtanh.f32 %v4292_v0 }
 0x818   :  { %v9882_v46 = vpop.eup %6447  ;;  %6473 = vtanh.f32 %v4293_v43 }
 0x819   :  { %v6450_v28 = vpop.eup %6449  ;;  %6475 = vtanh.f32 %v4294_v44 }
 0x81a   :  { %v6452_v20 = vpop.eup %6451  ;;  %6477 = vtanh.f32 %v4295_v24  ;;  %v4377_v45 = vmul.f32 %v6450_v28, %v9563_v53 }
 0x81b   :  { %v6454_v37 = vpop.eup %6453  ;;  %6479 = vtanh.f32 %v4296_v19  ;;  %v4378_v51 = vmul.f32 %v6452_v20, %v9567_v61 }
 0x81c   :  { %v6456_v32 = vpop.eup %6455  ;;  %6481 = vpow2.f32 %v5519_v13  ;;  %v4379_v6 = vmul.f32 %v6454_v37, %v9570_v50 }
 0x81d   :  { %v6458_v62 = vpop.eup %6457  ;;  %6483 = vpow2.f32 %v5520_v40  ;;  %v4380_v33 = vmul.f32 %v6456_v32, %v9574_v17 }
 0x81e   :  { %v6460_v34 = vpop.eup %6459  ;;  %6485 = vpow2.f32 %v5521_v30  ;;  %v4381_v57 = vmul.f32 %v6458_v62, %v9577_v26 }
 0x81f   :  { %v6462_v1 = vpop.eup %6461  ;;  %6487 = vpow2.f32 %v5522_v21  ;;  %v4382_v61 = vmul.f32 %v6460_v34, %v9580_v56 }
 0x820   :  { %v6464_v38 = vpop.eup %6463  ;;  %6489 = vpow2.f32 %v5523_v35  ;;  %v4383_v48 = vmul.f32 %v6462_v1, %v9589_v49 }
 0x821   :  { %v6466_v7 = vpop.eup %6465  ;;  %6491 = vpow2.f32 %v5524_v59  ;;  %v4384_v10 = vmul.f32 %v6464_v38, %v9591_v8 }
 0x822   :  { %v6468_v60 = vpop.eup %6467  ;;  %6493 = vpow2.f32 %v5525_v42  ;;  %v4385_v27 = vmul.f32 %v6466_v7, %v6434_v63 }
 0x823   :  { %v6470_v4 = vpop.eup %6469  ;;  %6495 = vpow2.f32 %v5526_v36  ;;  %v4386_v58 = vmul.f32 %v6468_v60, %v6436_v3  ;;  %v4468_v60 = vld [vmem:[%s10183_s2] sm:$0x8] }
 0x824   :  { %v6472_v54 = vpop.eup %6471  ;;  %v4387_v22 = vmul.f32 %v6470_v4, %v6438_v25  ;;  %v9893_v47 = vadd.f32 %v4385_v27, %v4377_v45 }
 0x825   :  { %v6474_v53 = vpop.eup %6473  ;;  %v4388_v29 = vmul.f32 %v6472_v54, %v9866_v55  ;;  %v9897_v12 = vadd.f32 %v4386_v58, %v4378_v51  ;;  %v4471_v54 = vld [vmem:[%s10183_s2 + $0x4] sm:$0x8] }
 0x826   :  { %v6476_v63 = vpop.eup %6475  ;;  %v4389_v50 = vmul.f32 %v6474_v53, %v9870_v16  ;;  %v9900_v5 = vadd.f32 %v4387_v22, %v4379_v6  ;;  %6497 = vtanh.f32 %v9893_v47 }
 0x827   :  { %v6478_v17 = vpop.eup %6477  ;;  %v4390_v18 = vmul.f32 %v6476_v63, %v9874_v52  ;;  %v9904_v26 = vadd.f32 %v4388_v29, %v4380_v33  ;;  %6499 = vtanh.f32 %v9897_v12 }
 0x828   :  { %v6480_v3 = vpop.eup %6479  ;;  %v9907_v31 = vadd.f32 %v4389_v50, %v4381_v57  ;;  %6501 = vtanh.f32 %v9900_v5  ;;  %v4391_v9 = vmul.f32 %v6478_v17, %v9878_v2 }
 0x829   :  { %v6482_v56 = vpop.eup %6481  ;;  %v9910_v25 = vadd.f32 %v4390_v18, %v4382_v61  ;;  %6503 = vtanh.f32 %v9904_v26  ;;  %v4392_v23 = vmul.f32 %v6480_v3, %v9882_v46  ;;  %v4474_v61 = vld [vmem:[%s10183_s2 + $0x8] sm:$0x8] }
 0x82a   :  { %v6484_v0 = vpop.eup %6483  ;;  %v4353_v55 = vadd.f32 1.0, %v6482_v56  ;;  %6505 = vtanh.f32 %v9907_v31  ;;  %v9919_v39 = vadd.f32 %v4391_v9, %v4383_v48  ;;  %v4477_v56 = vld [vmem:[%s10183_s2 + $0xc] sm:$0x8] }
 0x82b   :  { %v6486_v43 = vpop.eup %6485  ;;  %v4354_v41 = vadd.f32 1.0, %v6484_v0  ;;  %6507 = vtanh.f32 %v9910_v25  ;;  %v9921_v30 = vadd.f32 %v4392_v23, %v4384_v10 }
 0x82c   :  { %v6488_v16 = vpop.eup %6487  ;;  %v4355_v44 = vadd.f32 1.0, %v6486_v43  ;;  %6509 = vrcp.f32 %v4353_v55 }
 0x82d   :  { %v6490_v52 = vpop.eup %6489  ;;  %v4356_v24 = vadd.f32 1.0, %v6488_v16  ;;  %6511 = vrcp.f32 %v4354_v41  ;;  %v4480_v16 = vld [vmem:[%s10183_s2 + $0x10] sm:$0x8] }
 0x82e   :  { %v6492_v19 = vpop.eup %6491  ;;  %v4357_v15 = vadd.f32 1.0, %v6490_v52  ;;  %6513 = vrcp.f32 %v4355_v44 }
 0x82f   :  { %v6494_v13 = vpop.eup %6493  ;;  %v4358_v28 = vadd.f32 1.0, %v6492_v19  ;;  %6515 = vrcp.f32 %v4356_v24  ;;  %v4483_v19 = vld [vmem:[%s10183_s2 + $0x14] sm:$0x8] }
 0x830   :  { %v6496_v40 = vpop.eup %6495  ;;  %v4359_v20 = vadd.f32 1.0, %v6494_v13  ;;  %6517 = vrcp.f32 %v4357_v15 }
 0x831   :  { %v4360_v49 = vadd.f32 1.0, %v6496_v40  ;;  %6519 = vrcp.f32 %v4358_v28 }
 0x832   :  { %6521 = vrcp.f32 %v4359_v20 }
 0x833   :  { %v6498_v8 = vpop.eup %6497  ;;  %6523 = vrcp.f32 %v4360_v49 }
 0x834   :  { %v6500_v37 = vpop.eup %6499  ;;  %6525 = vtanh.f32 %v9919_v39 }
 0x835   :  { %v6502_v2 = vpop.eup %6501  ;;  %6527 = vtanh.f32 %v9921_v30 }
 0x836   :  { %v6504_v14 = vpop.eup %6503 }
 0x837   :  { %v6506_v46 = vpop.eup %6505 }
 0x838   :  { %v6508_v21 = vpop.eup %6507 }
 0x839   :  { %v6510_v32 = vpop.eup %6509 }
 0x83a   :  { %v6512_v35 = vpop.eup %6511  ;;  %v4409_v62 = vmul.f32 %v6510_v32, %v6498_v8 }
 0x83b   :  { %v6514_v59 = vpop.eup %6513  ;;  %v4410_v34 = vmul.f32 %v6512_v35, %v6500_v37  ;;  %v4486_v37 = vld [vmem:[%s10183_s2 + $0x18] sm:$0x8] }
 0x83c   :  { %v6516_v42 = vpop.eup %6515  ;;  %v4411_v1 = vmul.f32 %v6514_v59, %v6502_v2  ;;  %v5615_v36 = vpack.c.bf16 %v4409_v62, %v4409_v62 }
 0x83d   :  { %v6518_v38 = vpop.eup %6517  ;;  %v4412_v45 = vmul.f32 %v6516_v42, %v6504_v14  ;;  %v5616_v7 = vpack.c.bf16 %v4410_v34, %v4410_v34  ;;  %v4516_v27 = vcombine.low %v4409_v62, %v4410_v34 }
 0x83e   :  { %v6520_v6 = vpop.eup %6519  ;;  %v4413_v4 = vmul.f32 %v6518_v38, %v6506_v46  ;;  %v5617_v58 = vpack.c.bf16 %v4411_v1, %v4411_v1  ;;  %v4449_v33 = vrot.slane %v5615_v36, 5 }
 0x83f   :  { %v6522_v22 = vpop.eup %6521  ;;  %v4414_v57 = vmul.f32 %v6520_v6, %v6508_v21  ;;  %v5618_v53 = vpack.c.bf16 %v4412_v45, %v4412_v45  ;;  %v4450_v29 = vrot.slane %v5616_v7, 5  ;;  %v4517_v63 = vcombine.low %v4411_v1, %v4412_v45  ;;  %v4489_v21 = vld [vmem:[%s10183_s2 + $0x1c] sm:$0x8] }
 0x840   :  { %v6524_v50 = vpop.eup %6523  ;;  %v5619_v17 = vpack.c.bf16 %v4413_v4, %v4413_v4  ;;  %v4451_v18 = vrot.slane %v5617_v58, 5  ;;  %v4469_v3 = vsel %vm9926_vm1, %v4449_v33, %v4468_v60  ;;  %v4526_v44 = vrot.slane %v4516_v27, %v7322_v11 }
 0x841   :  { %v6526_v0 = vpop.eup %6525  ;;  %v5620_v55 = vpack.c.bf16 %v4414_v57, %v4414_v57  ;;  %v4452_v43 = vrot.slane %v5618_v53, 5  ;;  %4470 = vst [vmem:[%s10183_s2] sm:$0x8] %v4469_v3  ;;  %v4472_v41 = vsel %vm9926_vm1, %v4450_v29, %v4471_v54  ;;  %v4533_v15 = vrot.slane %v4517_v63, %v7322_v11  ;;  %v5539_v3 = vld [vmem:[%s10182_s0 + $0x87] ss:$8 sm:$0xf] }
 0x842   :  { %v6528_v48 = vpop.eup %6527  ;;  %v4415_v52 = vmul.f32 %v6526_v0, %v6522_v22  ;;  %v4453_v24 = vrot.slane %v5619_v17, 5  ;;  %4473 = vst [vmem:[%s10183_s2 + $0x4] sm:$0x8] %v4472_v41  ;;  %v4475_v10 = vsel %vm9926_vm1, %v4451_v18, %v4474_v61  ;;  %v4518_v23 = vcombine.low %v4413_v4, %v4414_v57  ;;  %v5536_v17 = vld [vmem:[%s10182_s0 + $0x27] ss:$8 sm:$0xf] }
 0x843   :  { %v4416_v9 = vmul.f32 %v6528_v48, %v6524_v50  ;;  %v4454_v13 = vrot.slane %v5620_v55, 5  ;;  %4476 = vst [vmem:[%s10183_s2 + $0x8] sm:$0x8] %v4475_v10  ;;  %v4478_v28 = vsel %vm9926_vm1, %v4452_v43, %v4477_v56  ;;  %v4548_v14 = vcombine.low %v4526_v44, %v4533_v15  ;;  %v5535_v50 = vld [vmem:[%s10182_s0 + $0x7] ss:$8 sm:$0xf] }
 0x844   :  { %v5621_v40 = vpack.c.bf16 %v4415_v52, %v4415_v52  ;;  %4479 = vst [vmem:[%s10183_s2 + $0xc] sm:$0x8] %v4478_v28  ;;  %v4481_v20 = vsel %vm9926_vm1, %v4453_v24, %v4480_v16  ;;  %v4540_v35 = vrot.slane %v4518_v23, %v7322_v11  ;;  %v5537_v18 = vld [vmem:[%s10182_s0 + $0x47] ss:$8 sm:$0xf] }
 0x845   :  { %v5622_v49 = vpack.c.bf16 %v4416_v9, %v4416_v9  ;;  %4482 = vst [vmem:[%s10183_s2 + $0x10] sm:$0x8] %v4481_v20  ;;  %v4484_v8 = vsel %vm9926_vm1, %v4454_v13, %v4483_v19  ;;  %v4519_v2 = vcombine.low %v4415_v52, %v4416_v9  ;;  %v4556_v1 = vrot.slane %v4548_v14, %v7322_v11  ;;  %v5538_v41 = vld [vmem:[%s10182_s0 + $0x67] ss:$8 sm:$0xf] }
 0x846   :  { %v4455_v46 = vrot.slane %v5621_v40, 5  ;;  %4485 = vst [vmem:[%s10183_s2 + $0x14] sm:$0x8] %v4484_v8  ;;  %v5540_v16 = vld [vmem:[%s10182_s0 + $0xa7] ss:$8 sm:$0xf] }
 0x847   :  { %v4456_v32 = vrot.slane %v5622_v49, 5  ;;  %v4547_v62 = vrot.slane %v4519_v2, %v7322_v11  ;;  %v5541_v44 = vld [vmem:[%s10182_s0 + $0xc7] ss:$8 sm:$0xf] }
 0x848   :  { %v4487_v59 = vsel %vm9926_vm1, %v4455_v46, %v4486_v37 }
 0x849   :  { %4488 = vst [vmem:[%s10183_s2 + $0x18] sm:$0x8] %v4487_v59  ;;  %v4490_v34 = vsel %vm9926_vm1, %v4456_v32, %v4489_v21  ;;  %v4549_v42 = vcombine.low %v4540_v35, %v4547_v62 }
 0x84a   :  { %4491 = vst [vmem:[%s10183_s2 + $0x1c] sm:$0x8] %v4490_v34 }
 0x84b   :  { %v4563_v36 = vrot.slane %v4549_v42, %v7322_v11 }
 0x84d   :  { %v4564_v38 = vcombine.low %v4556_v1, %v4563_v36 }
 0x84f   :  { %4631 = vmatmul.mubr.f32.vlgmr.msra.gmra.mxu0 %v4564_v38  ;;  %4702 = vmatmul.mubr.f32.vlgmr.msra.gmra.mxu1 %v4564_v38 }
 0x90f   :  { %v4632_v45 = vpop.f32.mrf.mxu0  ;;  %v4703_v7 = vpop.f32.mrf.mxu1 }
 0x911   :  { %v4634_v60 = vpop.f32.mrf.mxu0  ;;  %v4705_v27 = vpop.f32.mrf.mxu1 }
 0x912   :  { %v4712_v6 = vcombine.low %v4632_v45, %v4634_v60  ;;  %v4713_v4 = vcombine.high %v4632_v45, %v4634_v60  ;;  %v4714_v51 = vcombine.low %v4703_v7, %v4705_v27  ;;  %v4715_v58 = vcombine.high %v4703_v7, %v4705_v27 }
 0x914   :  { %v4722_v33 = vrot.slane %v4712_v6, %v7322_v11  ;;  %v4729_v54 = vrot.slane %v4713_v4, %v7322_v11  ;;  %v4736_v22 = vrot.slane %v4714_v51, %v7322_v11  ;;  %v4743_v57 = vrot.slane %v4715_v58, %v7322_v11 }
 0x916   :  { %v4744_v53 = vcombine.low %v4722_v33, %v4736_v22  ;;  %v4745_v29 = vcombine.high %v4722_v33, %v4736_v22  ;;  %v4746_v61 = vcombine.low %v4729_v54, %v4743_v57  ;;  %v4747_v63 = vcombine.high %v4729_v54, %v4743_v57 }
 0x918   :  { %v4754_v56 = vrot.slane %v4744_v53, %v7322_v11  ;;  %v4761_v0 = vrot.slane %v4746_v61, %v7322_v11  ;;  %v4768_v55 = vrot.slane %v4745_v29, %v7322_v11  ;;  %v4775_v43 = vrot.slane %v4747_v63, %v7322_v11  ;;  %v5542_v11 = vld [vmem:[%s10182_s0 + $0xe7] ss:$8 sm:$0xf] }
 0x91a   :  { %v4776_v48 = vcombine.high %v4754_v56, %v4754_v56  ;;  %v4777_v52 = vcombine.high %v4761_v0, %v4761_v0  ;;  %v4778_v24 = vcombine.high %v4768_v55, %v4768_v55  ;;  %v4779_v10 = vcombine.high %v4775_v43, %v4775_v43 }
 0x91b   :  { %v10032_v19 = vadd.f32 %v5535_v50, %v4754_v56  ;;  %v10034_v15 = vadd.f32 %v5536_v17, %v4768_v55  ;;  %v10036_v9 = vadd.f32 %v5539_v3, %v4761_v0  ;;  %v10042_v23 = vadd.f32 %v5540_v16, %v4775_v43 }
 0x91c   :  { %v10038_v13 = vadd.f32 %v5537_v18, %v4776_v48  ;;  %v10040_v28 = vadd.f32 %v5538_v41, %v4778_v24  ;;  %v10044_v40 = vadd.f32 %v5541_v44, %v4777_v52  ;;  %v10048_v8 = vadd.f32 %v5542_v11, %v4779_v10 }
 0x91d   :  { %v5543_v20 = vmul.f32 -1.442695, %v10032_v19  ;;  %v5544_v49 = vmul.f32 -1.442695, %v10034_v15  ;;  %v5547_v14 = vmul.f32 -1.442695, %v10036_v9 }
 0x91e   :  { %v5545_v37 = vmul.f32 -1.442695, %v10038_v13  ;;  %v5546_v2 = vmul.f32 -1.442695, %v10040_v28  ;;  %v4852_v46 = vrot.slane %v10032_v19, 1  ;;  %v4853_v32 = vrot.slane %v10034_v15, 1 }
 0x91f   :  { %6529 = vpow2.f32 %v5543_v20  ;;  %v5548_v21 = vmul.f32 -1.442695, %v10042_v23  ;;  %v5549_v35 = vmul.f32 -1.442695, %v10044_v40  ;;  %v4854_v62 = vrot.slane %v10038_v13, 1 }
 0x920   :  { %6531 = vpow2.f32 %v5544_v49  ;;  %v5550_v59 = vmul.f32 -1.442695, %v10048_v8  ;;  %v4855_v34 = vrot.slane %v10040_v28, 1  ;;  %v4856_v42 = vrot.slane %v10036_v9, 1 }
 0x921   :  { %6533 = vpow2.f32 %v5545_v37  ;;  %v5551_v1 = vmul.f32 -1.442695, %v4852_v46  ;;  %v4857_v36 = vrot.slane %v10042_v23, 1  ;;  %v5552_v38 = vmul.f32 -1.442695, %v4853_v32 }
 0x922   :  { %6535 = vpow2.f32 %v5546_v2  ;;  %v4858_v45 = vrot.slane %v10044_v40, 1  ;;  %v5553_v7 = vmul.f32 -1.442695, %v4854_v62  ;;  %v4859_v60 = vrot.slane %v10048_v8, 1 }
 0x923   :  { %6537 = vpow2.f32 %v5547_v14  ;;  %v5554_v27 = vmul.f32 -1.442695, %v4855_v34  ;;  %v5555_v6 = vmul.f32 -1.442695, %v4856_v42  ;;  %v5556_v4 = vmul.f32 -1.442695, %v4857_v36 }
 0x924   :  { %6539 = vpow2.f32 %v5548_v21  ;;  %v5557_v51 = vmul.f32 -1.442695, %v4858_v45  ;;  %v5558_v58 = vmul.f32 -1.442695, %v4859_v60  ;;  %v4916_v32 = vrot.slane %v10032_v19, 2 }
 0x925   :  { %6541 = vpow2.f32 %v5549_v35  ;;  %v4918_v42 = vrot.slane %v10038_v13, 2  ;;  %v4919_v36 = vrot.slane %v10040_v28, 2  ;;  %v4920_v45 = vrot.slane %v10036_v9, 2 }
 0x926   :  { %6543 = vpow2.f32 %v5550_v59  ;;  %v4917_v59 = vrot.slane %v10034_v15, 2 }
 0x927   :  { %6545 = vpow2.f32 %v5551_v1 }
 0x928   :  { %6547 = vpow2.f32 %v5552_v38 }
 0x929   :  { %6549 = vpow2.f32 %v5553_v7  ;;  %v4940_v7 = vrot.slane %v10032_v19, 3  ;;  %v4943_v19 = vrot.slane %v10040_v28, 3  ;;  %v4947_v28 = vrot.slane %v10048_v8, 3 }
 0x92a   :  { %6551 = vpow2.f32 %v5554_v27  ;;  %v4921_v27 = vrot.slane %v10042_v23, 2 }
 0x92b   :  { %6553 = vpow2.f32 %v5555_v6  ;;  %v4941_v6 = vrot.slane %v10034_v15, 3  ;;  %v5559_v15 = vmul.f32 -1.442695, %v4940_v7 }
 0x92c   :  { %v6530_v33 = vpop.eup %6529  ;;  %6555 = vpow2.f32 %v5556_v4 }
 0x92d   :  { %v6532_v54 = vpop.eup %6531  ;;  %v4820_v22 = vadd.f32 1.0, %v6530_v33  ;;  %6557 = vpow2.f32 %v5557_v51  ;;  %v4922_v51 = vrot.slane %v10044_v40, 2 }
 0x92e   :  { %v6534_v57 = vpop.eup %6533  ;;  %v4821_v53 = vadd.f32 1.0, %v6532_v54  ;;  %6559 = vpow2.f32 %v5558_v58  ;;  %v4942_v58 = vrot.slane %v10038_v13, 3  ;;  %v4923_v54 = vrot.slane %v10048_v8, 2 }
 0x92f   :  { %v6536_v29 = vpop.eup %6535  ;;  %v4822_v61 = vadd.f32 1.0, %v6534_v57  ;;  %6561 = vrcp.f32 %v4820_v22  ;;  %v4944_v57 = vrot.slane %v10036_v9, 3  ;;  %v4946_v13 = vrot.slane %v10044_v40, 3 }
 0x930   :  { %v6538_v63 = vpop.eup %6537  ;;  %v4823_v50 = vadd.f32 1.0, %v6536_v29  ;;  %6563 = vrcp.f32 %v4821_v53  ;;  %v4945_v29 = vrot.slane %v10042_v23, 3 }
 0x931   :  { %v6540_v17 = vpop.eup %6539  ;;  %v4824_v18 = vadd.f32 1.0, %v6538_v63  ;;  %6565 = vrcp.f32 %v4822_v61  ;;  %v5560_v61 = vmul.f32 -1.442695, %v4941_v6  ;;  %v5565_v23 = vmul.f32 -1.442695, %v4946_v13 }
 0x932   :  { %v6542_v3 = vpop.eup %6541  ;;  %v4825_v56 = vadd.f32 1.0, %v6540_v17  ;;  %6567 = vrcp.f32 %v4823_v50  ;;  %v5561_v50 = vmul.f32 -1.442695, %v4942_v58 }
 0x933   :  { %v6544_v0 = vpop.eup %6543  ;;  %v4826_v55 = vadd.f32 1.0, %v6542_v3  ;;  %6569 = vrcp.f32 %v4824_v18  ;;  %v5562_v18 = vmul.f32 -1.442695, %v4943_v19 }
 0x934   :  { %v6546_v43 = vpop.eup %6545  ;;  %v4827_v41 = vadd.f32 1.0, %v6544_v0  ;;  %6571 = vrcp.f32 %v4825_v56  ;;  %v5563_v56 = vmul.f32 -1.442695, %v4944_v57  ;;  %v5564_v0 = vmul.f32 -1.442695, %v4945_v29 }
 0x935   :  { %v6548_v16 = vpop.eup %6547  ;;  %6573 = vrcp.f32 %v4826_v55  ;;  %v4892_v44 = vadd.f32 1.0, %v6546_v43 }
 0x936   :  { %v6550_v48 = vpop.eup %6549  ;;  %6575 = vrcp.f32 %v4827_v41  ;;  %v4893_v52 = vadd.f32 1.0, %v6548_v16  ;;  %v5566_v41 = vmul.f32 -1.442695, %v4947_v28 }
 0x937   :  { %v6552_v24 = vpop.eup %6551  ;;  %v4894_v10 = vadd.f32 1.0, %v6550_v48  ;;  %6577 = vrcp.f32 %v4892_v44 }
 0x938   :  { %v6554_v11 = vpop.eup %6553  ;;  %v4895_v20 = vadd.f32 1.0, %v6552_v24  ;;  %6579 = vrcp.f32 %v4893_v52 }
 0x939   :  { %v6556_v49 = vpop.eup %6555  ;;  %v4896_v37 = vadd.f32 1.0, %v6554_v11  ;;  %6581 = vrcp.f32 %v4894_v10 }
 0x93a   :  { %v6558_v2 = vpop.eup %6557  ;;  %v4897_v14 = vadd.f32 1.0, %v6556_v49  ;;  %6583 = vrcp.f32 %v4895_v20 }
 0x93b   :  { %v6560_v46 = vpop.eup %6559  ;;  %v4898_v21 = vadd.f32 1.0, %v6558_v2  ;;  %6585 = vrcp.f32 %v4896_v37 }
 0x93c   :  { %v10065_v35 = vpop.eup %6561  ;;  %v4899_v62 = vadd.f32 1.0, %v6560_v46  ;;  %6587 = vrcp.f32 %v4897_v14 }
 0x93d   :  { %v10068_v34 = vpop.eup %6563  ;;  %6589 = vrcp.f32 %v4898_v21 }
 0x93e   :  { %v10071_v1 = vpop.eup %6565  ;;  %6591 = vrcp.f32 %v4899_v62 }
 0x93f   :  { %v10074_v38 = vpop.eup %6567  ;;  %6593 = vtanh.f32 %v4916_v32 }
 0x940   :  { %v10078_v60 = vpop.eup %6569  ;;  %6595 = vtanh.f32 %v4917_v59 }
 0x941   :  { %v10082_v4 = vpop.eup %6571  ;;  %6597 = vtanh.f32 %v4918_v42 }
 0x942   :  { %v10086_v33 = vpop.eup %6573  ;;  %6599 = vtanh.f32 %v4919_v36 }
 0x943   :  { %v10090_v22 = vpop.eup %6575  ;;  %6601 = vtanh.f32 %v4920_v45 }
 0x944   :  { %v6578_v53 = vpop.eup %6577  ;;  %6603 = vtanh.f32 %v4921_v27 }
 0x945   :  { %v6580_v63 = vpop.eup %6579  ;;  %6605 = vtanh.f32 %v4922_v51  ;;  %v5004_v40 = vmul.f32 %v6578_v53, %v9893_v47 }
 0x946   :  { %v6582_v17 = vpop.eup %6581  ;;  %6607 = vtanh.f32 %v4923_v54  ;;  %v5005_v8 = vmul.f32 %v6580_v63, %v9897_v12 }
 0x947   :  { %v6584_v3 = vpop.eup %6583  ;;  %6609 = vpow2.f32 %v5559_v15  ;;  %v5006_v52 = vmul.f32 %v6582_v17, %v9900_v5 }
 0x948   :  { %v6586_v9 = vpop.eup %6585  ;;  %6611 = vpow2.f32 %v5560_v61  ;;  %v5007_v11 = vmul.f32 %v6584_v3, %v9904_v26 }
 0x949   :  { %v6588_v55 = vpop.eup %6587  ;;  %6613 = vpow2.f32 %v5561_v50  ;;  %v5008_v37 = vmul.f32 %v6586_v9, %v9907_v31 }
 0x94a   :  { %v6590_v43 = vpop.eup %6589  ;;  %6615 = vpow2.f32 %v5562_v18  ;;  %v5009_v12 = vmul.f32 %v6588_v55, %v9910_v25 }
 0x94b   :  { %v6592_v16 = vpop.eup %6591  ;;  %6617 = vpow2.f32 %v5563_v56  ;;  %v5010_v27 = vmul.f32 %v6590_v43, %v9919_v39 }
 0x94c   :  { %v6594_v44 = vpop.eup %6593  ;;  %6619 = vpow2.f32 %v5564_v0  ;;  %v5011_v51 = vmul.f32 %v6592_v16, %v9921_v30 }
 0x94d   :  { %v6596_v48 = vpop.eup %6595  ;;  %6621 = vpow2.f32 %v5565_v23  ;;  %v5012_v24 = vmul.f32 %v6594_v44, %v10065_v35 }
 0x94e   :  { %v6598_v10 = vpop.eup %6597  ;;  %6623 = vpow2.f32 %v5566_v41  ;;  %v5013_v20 = vmul.f32 %v6596_v48, %v10068_v34 }
 0x94f   :  { %v6600_v49 = vpop.eup %6599  ;;  %v5014_v47 = vmul.f32 %v6598_v10, %v10071_v1  ;;  %v5020_v2 = vadd.f32 %v5012_v24, %v5004_v40 }
 0x950   :  { %v6602_v14 = vpop.eup %6601  ;;  %v5015_v46 = vmul.f32 %v6600_v49, %v10074_v38  ;;  %v5021_v5 = vadd.f32 %v5013_v20, %v5005_v8 }
 0x951   :  { %v6604_v21 = vpop.eup %6603  ;;  %v5016_v32 = vmul.f32 %v6602_v14, %v10078_v60  ;;  %v5022_v35 = vadd.f32 %v5014_v47, %v5006_v52  ;;  %6625 = vtanh.f32 %v5020_v2 }
 0x952   :  { %v6606_v26 = vpop.eup %6605  ;;  %v5017_v62 = vmul.f32 %v6604_v21, %v10082_v4  ;;  %v5023_v59 = vadd.f32 %v5015_v46, %v5007_v11  ;;  %6627 = vtanh.f32 %v5021_v5 }
 0x953   :  { %v6608_v31 = vpop.eup %6607  ;;  %v5024_v34 = vadd.f32 %v5016_v32, %v5008_v37  ;;  %6629 = vtanh.f32 %v5022_v35  ;;  %v5018_v19 = vmul.f32 %v6606_v26, %v10086_v33  ;;  %v5118_v32 = vld [vmem:[%s10183_s2] sm:$0x8] }
 0x954   :  { %v6610_v42 = vpop.eup %6609  ;;  %v5025_v1 = vadd.f32 %v5017_v62, %v5009_v12  ;;  %6631 = vtanh.f32 %v5023_v59  ;;  %v5019_v53 = vmul.f32 %v6608_v31, %v10090_v22 }
 0x955   :  { %v6612_v25 = vpop.eup %6611  ;;  %v4980_v36 = vadd.f32 1.0, %v6610_v42  ;;  %6633 = vtanh.f32 %v5024_v34  ;;  %v5026_v63 = vadd.f32 %v5018_v19, %v5010_v27  ;;  %v5121_v34 = vld [vmem:[%s10183_s2 + $0x4] sm:$0x8]  ;;  %v5127_v27 = vld [vmem:[%s10183_s2 + $0xc] sm:$0x8] }
 0x956   :  { %v6614_v38 = vpop.eup %6613  ;;  %v4981_v45 = vadd.f32 1.0, %v6612_v25  ;;  %6635 = vtanh.f32 %v5025_v1  ;;  %v5027_v13 = vadd.f32 %v5019_v53, %v5011_v51 }
 0x957   :  { %v6616_v7 = vpop.eup %6615  ;;  %v4982_v60 = vadd.f32 1.0, %v6614_v38  ;;  %6637 = vrcp.f32 %v4980_v36  ;;  %v5124_v38 = vld [vmem:[%s10183_s2 + $0x8] sm:$0x8] }
 0x958   :  { %v6618_v6 = vpop.eup %6617  ;;  %v4983_v4 = vadd.f32 1.0, %v6616_v7  ;;  %6639 = vrcp.f32 %v4981_v45 }
 0x959   :  { %v6620_v58 = vpop.eup %6619  ;;  %v4984_v54 = vadd.f32 1.0, %v6618_v6  ;;  %6641 = vrcp.f32 %v4982_v60 }
 0x95a   :  { %v6622_v57 = vpop.eup %6621  ;;  %v4985_v15 = vadd.f32 1.0, %v6620_v58  ;;  %6643 = vrcp.f32 %v4983_v4  ;;  %v5130_v58 = vld [vmem:[%s10183_s2 + $0x10] sm:$0x8] }
 0x95b   :  { %v6624_v29 = vpop.eup %6623  ;;  %v4986_v61 = vadd.f32 1.0, %v6622_v57  ;;  %6645 = vrcp.f32 %v4984_v54  ;;  %v5133_v57 = vld [vmem:[%s10183_s2 + $0x14] sm:$0x8] }
 0x95c   :  { %v4987_v39 = vadd.f32 1.0, %v6624_v29  ;;  %6647 = vrcp.f32 %v4985_v15 }
 0x95d   :  { %6649 = vrcp.f32 %v4986_v61 }
 0x95e   :  { %v6626_v50 = vpop.eup %6625  ;;  %6651 = vrcp.f32 %v4987_v39 }
 0x95f   :  { %v6628_v30 = vpop.eup %6627  ;;  %6653 = vtanh.f32 %v5026_v63  ;;  %v5136_v63 = vld [vmem:[%s10183_s2 + $0x18] sm:$0x8] }
 0x960   :  { %v6630_v17 = vpop.eup %6629  ;;  %6655 = vtanh.f32 %v5027_v13  ;;  %v5139_v13 = vld [vmem:[%s10183_s2 + $0x1c] sm:$0x8] }
 0x961   :  { %v6632_v33 = vpop.eup %6631 }
 0x962   :  { %v6634_v28 = vpop.eup %6633 }
 0x963   :  { %v6636_v18 = vpop.eup %6635 }
 0x964   :  { %v6638_v3 = vpop.eup %6637 }
 0x965   :  { %v6640_v56 = vpop.eup %6639  ;;  %v5036_v22 = vmul.f32 %v6638_v3, %v6626_v50 }
 0x966   :  { %v6642_v9 = vpop.eup %6641  ;;  %v5037_v0 = vmul.f32 %v6640_v56, %v6628_v30 }
 0x967   :  { %v6644_v55 = vpop.eup %6643  ;;  %v5038_v23 = vmul.f32 %v6642_v9, %v6630_v17  ;;  %v5623_v43 = vpack.c.bf16 %v5036_v22, %v5036_v22 }
 0x968   :  { %v6646_v41 = vpop.eup %6645  ;;  %v5039_v16 = vmul.f32 %v6644_v55, %v6632_v33  ;;  %v5624_v40 = vpack.c.bf16 %v5037_v0, %v5037_v0 }
 0x969   :  { %v6648_v44 = vpop.eup %6647  ;;  %v5040_v8 = vmul.f32 %v6646_v41, %v6634_v28  ;;  %v5625_v48 = vpack.c.bf16 %v5038_v23, %v5038_v23  ;;  %v5077_v52 = vshll.u32 %v5623_v43, 16 }
 0x96a   :  { %v6650_v24 = vpop.eup %6649  ;;  %v5041_v11 = vmul.f32 %v6648_v44, %v6636_v18  ;;  %v5626_v20 = vpack.c.bf16 %v5039_v16, %v5039_v16  ;;  %v5081_v49 = vshll.u32 %v5624_v40, 16 }
 0x96b   :  { %v6652_v37 = vpop.eup %6651  ;;  %v5627_v47 = vpack.c.bf16 %v5040_v8, %v5040_v8  ;;  %v5079_v2 = vrot.slane %v5077_v52, 5  ;;  %v5085_v14 = vshll.u32 %v5625_v48, 16 }
 0x96c   :  { %v6654_v12 = vpop.eup %6653  ;;  %v5628_v46 = vpack.c.bf16 %v5041_v11, %v5041_v11  ;;  %v5083_v5 = vrot.slane %v5081_v49, 5  ;;  %v5089_v21 = vshll.u32 %v5626_v20, 16 }
 0x96d   :  { %v6656_v35 = vpop.eup %6655  ;;  %v5042_v26 = vmul.f32 %v6654_v12, %v6650_v24  ;;  %v5087_v62 = vrot.slane %v5085_v14, 5  ;;  %v5093_v59 = vshll.u32 %v5627_v47, 16  ;;  %v5119_v31 = vsel %vm10113_vm3, %v5079_v2, %v5118_v32 }
 0x96e   :  { %v5043_v42 = vmul.f32 %v6656_v35, %v6652_v37  ;;  %v5091_v1 = vrot.slane %v5089_v21, 5  ;;  %v5097_v25 = vshll.u32 %v5628_v46, 16  ;;  %5120 = vst [vmem:[%s10183_s2] sm:$0x8] %v5119_v31  ;;  %v5122_v36 = vsel %vm10113_vm3, %v5083_v5, %v5121_v34 }
 0x96f   :  { %v5629_v45 = vpack.c.bf16 %v5042_v26, %v5042_v26  ;;  %v5095_v7 = vrot.slane %v5093_v59, 5  ;;  %5123 = vst [vmem:[%s10183_s2 + $0x4] sm:$0x8] %v5122_v36  ;;  %v5125_v60 = vsel %vm10113_vm3, %v5087_v62, %v5124_v38 }
 0x970   :  { %v5630_v6 = vpack.c.bf16 %v5043_v42, %v5043_v42  ;;  %v5099_v4 = vrot.slane %v5097_v25, 5  ;;  %5126 = vst [vmem:[%s10183_s2 + $0x8] sm:$0x8] %v5125_v60  ;;  %v5128_v51 = vsel %vm10113_vm3, %v5091_v1, %v5127_v27 }
 0x971   :  { %v5101_v54 = vshll.u32 %v5629_v45, 16  ;;  %5129 = vst [vmem:[%s10183_s2 + $0xc] sm:$0x8] %v5128_v51  ;;  %v5131_v19 = vsel %vm10113_vm3, %v5095_v7, %v5130_v58 }
 0x972   :  { %v5105_v15 = vshll.u32 %v5630_v6, 16  ;;  %5132 = vst [vmem:[%s10183_s2 + $0x10] sm:$0x8] %v5131_v19  ;;  %v5134_v53 = vsel %vm10113_vm3, %v5099_v4, %v5133_v57 }
 0x973   :  { %v5103_v29 = vrot.slane %v5101_v54, 5  ;;  %5135 = vst [vmem:[%s10183_s2 + $0x14] sm:$0x8] %v5134_v53 }
 0x974   :  { %v5107_v61 = vrot.slane %v5105_v15, 5 }
 0x975   :  { %v5137_v39 = vsel %vm10113_vm3, %v5103_v29, %v5136_v63 }
 0x976   :  { %5138 = vst [vmem:[%s10183_s2 + $0x18] sm:$0x8] %v5137_v39  ;;  %v5140_v50 = vsel %vm10113_vm3, %v5107_v61, %v5139_v13 }
 0x977   :  { %5141 = vst [vmem:[%s10183_s2 + $0x1c] sm:$0x8] %v5140_v50 }

</bundles_post_ra>
